<compile_context>
chip_gen: v6e
topology: v6e:2x2x1
jax: 0.10.0
libtpu: 0.0.40
codegen_flags: <defaults>
</compile_context>

<pallas_src>
import functools

import jax
import jax.numpy as jnp
from jax.experimental import pallas as pl
from jax.experimental.pallas import tpu as pltpu

KSIZE = 3   # kernel_size
PAD = 3     # padding   (module default; output is D+4, H+4, W+4)
# stride = 1, dilation = 1 (module defaults)


def _conv3d_kernel(xprev_ref, xcur_ref, w_ref, b_ref, o_ref,
                   pad_ref, patch_ref, *, d_in, h_in, w_in, cin, bd):
    """One grid step: `bd` output depth planes for one batch element.

    xprev_ref/xcur_ref : (1, bd, Cin, H, W)  input depth blocks j-1 and j
    w_ref  : (Cout, 27*Cin)                  weight, tap-major / cin-minor cols
    b_ref  : (Cout, 1)
    o_ref  : (1, 1, Cout, bd*Hp*Wp)          flattened padded-spatial slab
    pad_ref  : VMEM (Cin, (bd+3)*Hp*Wp)      flat zero-padded window (+tail)
    patch_ref: VMEM (27*Cin, bd*Hp*Wp)       im2col patch
    """
    j = pl.program_id(1)                     # depth-block index
    hp = h_in + 2 * PAD
    wp = w_in + 2 * PAD
    sp = hp * wp                             # flattened padded-plane stride

    # 1) zero the flat padded window (spatial borders, out-of-range depth
    #    planes and the tail stay exactly zero) -- replaces HBM jnp.pad.
    pad_ref[...] = jnp.zeros_like(pad_ref)

    # 2) copy the bd+2 input depth planes this block needs into the window,
    #    masking planes that fall outside [0, D) (depth padding).
    for s in range(bd + KSIZE - 1):
        ip = j * bd + (s - PAD)              # original input depth index
        valid = jnp.logical_and(ip >= 0, ip < d_in)
        if s < PAD:                          # lives in depth block j-1
            plane = xprev_ref[0, bd + s - PAD]
        else:                                # lives in depth block j
            plane = xcur_ref[0, s - PAD]
        plane = jnp.where(valid, plane, 0.0)              # (Cin, H, W)
        for hh in range(h_in):
            base = s * sp + (hh + PAD) * wp + PAD
            pad_ref[:, base:base + w_in] = plane[:, hh, :]

    # 3) im2col: 27 lane-shifted views of the flat window.  Column
    #    c = td*sp + h*wp + w of tap (kd,kh,kw) reads flat position
    #    (td+kd)*sp + (h+kh)*wp + (w+kw) == padded x[td+kd, h+kh, w+kw].
    for kd in range(KSIZE):
        for kh in range(KSIZE):
            for kw in range(KSIZE):
                t = (kd * KSIZE + kh) * KSIZE + kw
                start = kd * sp + kh * wp + kw
                patch_ref[t * cin:(t + 1) * cin, :] = (
                    pad_ref[:, start:start + bd * sp])

    # 4) single fused MXU contraction over all 27 taps * Cin (K = 27*Cin).
    acc = jnp.dot(w_ref[...], patch_ref[...],
                  preferred_element_type=jnp.float32)     # (Cout, bd*sp)
    o_ref[0, 0] = (acc + b_ref[...]).astype(o_ref.dtype)


def depthwise_forward(x_ncdhw, weight, bias):
    """Conv3d(k=3, s=1, p=3, d=1) forward matching the PyTorch module.

    x_ncdhw : (N, Cin, D, H, W)  float32
    weight  : (3, 3, 3, Cin, Cout)  (torch's (Cout,Cin,kD,kH,kW) permuted)
    bias    : (Cout,)
    returns : (N, Cout, D+4, H+4, W+4)
    """
    n, cin, d, h, w = x_ncdhw.shape
    kd_, kh_, kw_, wcin, cout = weight.shape
    assert (kd_, kh_, kw_) == (KSIZE, KSIZE, KSIZE) and wcin == cin

    d_out = d + 2 * PAD - (KSIZE - 1)
    h_out = h + 2 * PAD - (KSIZE - 1)
    w_out = w + 2 * PAD - (KSIZE - 1)
    hp, wp = h + 2 * PAD, w + 2 * PAD
    sp = hp * wp

    # depth tile: bd >= PAD output planes per grid step, bd | d_out.
    bd = next((t for t in (8, 7, 6, 5, 4, 3) if d_out % t == 0), d_out)
    nb = d_out // bd                       # grid steps along depth
    nbi = -(-d // bd)                      # number of input depth blocks
    last_blk = nbi - 1

    # glue: channel-major layout; no HBM-side padding of the volume.
    xt = jnp.transpose(x_ncdhw, (0, 2, 1, 3, 4))           # (N, D, Cin, H, W)
    w2 = jnp.transpose(weight, (4, 0, 1, 2, 3)).reshape(cout, KSIZE ** 3 * cin)
    b2 = bias.reshape(cout, 1)

    kernel = functools.partial(_conv3d_kernel, d_in=d, h_in=h, w_in=w,
                               cin=cin, bd=bd)

    flops = 2 * n * d_out * h_out * w_out * cout * (KSIZE ** 3) * cin
    bytes_accessed = 4 * (2 * xt.size + w2.size + b2.size
                          + n * nb * cout * bd * sp)

    out = pl.pallas_call(
        kernel,
        out_shape=jax.ShapeDtypeStruct((n, nb, cout, bd * sp), jnp.float32),
        grid_spec=pltpu.PrefetchScalarGridSpec(
            num_scalar_prefetch=0,
            grid=(n, nb),
            in_specs=[
                # depth blocks j-1 (clamped) and j of the same array: the
                # bd+2-plane window needed by bd output planes always lives
                # inside these two blocks (since bd >= PAD).
                pl.BlockSpec((1, bd, cin, h, w),
                             lambda b, jj: (b, jnp.clip(jj - 1, 0, last_blk),
                                            0, 0, 0)),
                pl.BlockSpec((1, bd, cin, h, w),
                             lambda b, jj: (b, jnp.minimum(jj, last_blk),
                                            0, 0, 0)),
                pl.BlockSpec((cout, KSIZE ** 3 * cin), lambda b, jj: (0, 0)),
                pl.BlockSpec((cout, 1), lambda b, jj: (0, 0)),
            ],
            out_specs=pl.BlockSpec((1, 1, cout, bd * sp),
                                   lambda b, jj: (b, jj, 0, 0)),
            scratch_shapes=[
                pltpu.VMEM((cin, (bd + KSIZE) * sp), jnp.float32),
                pltpu.VMEM((KSIZE ** 3 * cin, bd * sp), jnp.float32),
            ],
        ),
        compiler_params=pltpu.CompilerParams(
            dimension_semantics=("parallel", "parallel"),
            vmem_limit_bytes=32 * 1024 * 1024),
        cost_estimate=pl.CostEstimate(flops=flops, transcendentals=0,
                                      bytes_accessed=bytes_accessed),
    )(xt, xt, w2, b2)

    # drop the padded-spatial garbage columns and restore NCDHW.
    out = out.reshape(n, nb, cout, bd, hp, wp)[..., :h_out, :w_out]
    out = jnp.transpose(out, (0, 2, 1, 3, 4, 5))
    return out.reshape(n, cout, d_out, h_out, w_out)


if __name__ == "__main__":
    key = jax.random.PRNGKey(0)
    kx, kw_, kb = jax.random.split(key, 3)

    # small shapes consistent with the module: N=2, cin=4, cout=8, spatial=8
    N, CIN, COUT, S = 2, 4, 8, 8
    x = jax.random.normal(kx, (N, CIN, S, S, S), dtype=jnp.float32)

    # deterministic parameter init (PyTorch-style uniform bounds)
    fan_in = CIN * KSIZE ** 3
    bound = 1.0 / (fan_in ** 0.5)
    weight = jax.random.uniform(kw_, (KSIZE, KSIZE, KSIZE, CIN, COUT),
                                jnp.float32, -bound, bound)
    bias = jax.random.uniform(kb, (COUT,), jnp.float32, -bound, bound)

    out = jax.block_until_ready(depthwise_forward(x, weight, bias))

    # reference (XLA conv) to validate semantics
    x_ndhwc = jnp.transpose(x, (0, 2, 3, 4, 1))
    ref = jax.lax.conv_general_dilated(
        x_ndhwc, weight, window_strides=(1, 1, 1),
        padding=[(PAD, PAD)] * 3,
        dimension_numbers=("NDHWC", "DHWIO", "NDHWC")) + bias
    ref = jnp.transpose(ref, (0, 4, 1, 2, 3))

    assert out.shape == (N, COUT, S + 4, S + 4, S + 4), out.shape
    err = float(jnp.max(jnp.abs(out - ref)))
    assert err < 1e-3, err
    print("KERNEL_OK")
</pallas_src>

<mosaic_0001>
module attributes {stable_mosaic.version = 11 : i64} {
  func.func @_conv3d_kernel(%arg0: i32, %arg1: i32, %arg2: memref<1x6x4x8x8xf32, #tpu.memory_space<vmem>>, %arg3: memref<1x6x4x8x8xf32, #tpu.memory_space<vmem>>, %arg4: memref<8x108xf32, #tpu.memory_space<vmem>>, %arg5: memref<8x1xf32, #tpu.memory_space<vmem>>, %arg6: memref<1x1x8x1176xf32, #tpu.memory_space<vmem>>, %arg7: memref<4x1764xf32, #tpu.memory_space<vmem>>, %arg8: memref<108x1176xf32, #tpu.memory_space<vmem>>) attributes {dimension_semantics = [#tpu.dimension_semantics<parallel>, #tpu.dimension_semantics<parallel>], iteration_bounds = array<i64: 2, 2>, scalar_prefetch = 0 : i64, scratch_operands = 2 : i64, tpu.core_type = #tpu.core_type<tc>, window_params = [{transform_indices = @transform_0, window_bounds = array<i64: 1, 6, 4, 8, 8>}, {transform_indices = @transform_1, window_bounds = array<i64: 1, 6, 4, 8, 8>}, {pipeline_mode = #tpu.pipeline_mode<synchronous>, transform_indices = @transform_2, window_bounds = array<i64: 8, 108>}, {pipeline_mode = #tpu.pipeline_mode<synchronous>, transform_indices = @transform_3, window_bounds = array<i64: 8, 1>}, {transform_indices = @transform_4, window_bounds = array<i64: 1, 1, 8, 1176>}]} {
    %cst = arith.constant 0.000000e+00 : f32
    %0 = vector.broadcast %cst : f32 to vector<4x1764xf32>
    %c0 = arith.constant 0 : index
    %c0_0 = arith.constant 0 : index
    %1 = vector.load %arg7[%c0, %c0_0] : memref<4x1764xf32, #tpu.memory_space<vmem>>, vector<4x1764xf32>
    tpu.vector_store %arg7[%c0, %c0_0], %0 {strides = array<i32>} : memref<4x1764xf32, #tpu.memory_space<vmem>>, vector<4x1764xf32>,
    %c6_i32 = arith.constant 6 : i32
    %2 = arith.muli %arg1, %c6_i32 : i32
    %c-3_i32 = arith.constant -3 : i32
    %3 = arith.addi %2, %c-3_i32 : i32
    %c0_i32 = arith.constant 0 : i32
    %4 = arith.cmpi sge, %3, %c0_i32 : i32
    %c8_i32 = arith.constant 8 : i32
    %5 = arith.cmpi slt, %3, %c8_i32 : i32
    %6 = arith.andi %4, %5 : i1
    %c0_1 = arith.constant 0 : index
    %c3 = arith.constant 3 : index
    %c0_2 = arith.constant 0 : index
    %c0_3 = arith.constant 0 : index
    %c0_4 = arith.constant 0 : index
    %7 = vector.load %arg2[%c0_1, %c3, %c0_2, %c0_3, %c0_4] : memref<1x6x4x8x8xf32, #tpu.memory_space<vmem>>, vector<1x1x4x8x8xf32>
    %8 = vector.shape_cast %7 : vector<1x1x4x8x8xf32> to vector<4x8x8xf32>
    %cst_5 = arith.constant 0.000000e+00 : f32
    %9 = vector.broadcast %cst_5 : f32 to vector<4x8x8xf32>
    %10 = arith.select %6, %8, %9 : vector<4x8x8xf32>
    %11 = vector.extract_strided_slice %10 {offsets = [0, 0, 0], sizes = [4, 1, 8], strides = [1, 1, 1]} : vector<4x8x8xf32> to vector<4x1x8xf32>
    %12 = vector.shape_cast %11 : vector<4x1x8xf32> to vector<4x8xf32>
    %c0_6 = arith.constant 0 : index
    %c45 = arith.constant 45 : index
    %13 = vector.load %arg7[%c0_6, %c45] : memref<4x1764xf32, #tpu.memory_space<vmem>>, vector<4x8xf32>
    tpu.vector_store %arg7[%c0_6, %c45], %12 {strides = array<i32>} : memref<4x1764xf32, #tpu.memory_space<vmem>>, vector<4x8xf32>,
    %14 = vector.extract_strided_slice %10 {offsets = [0, 1, 0], sizes = [4, 1, 8], strides = [1, 1, 1]} : vector<4x8x8xf32> to vector<4x1x8xf32>
    %15 = vector.shape_cast %14 : vector<4x1x8xf32> to vector<4x8xf32>
    %c0_7 = arith.constant 0 : index
    %c59 = arith.constant 59 : index
    %16 = vector.load %arg7[%c0_7, %c59] : memref<4x1764xf32, #tpu.memory_space<vmem>>, vector<4x8xf32>
    tpu.vector_store %arg7[%c0_7, %c59], %15 {strides = array<i32>} : memref<4x1764xf32, #tpu.memory_space<vmem>>, vector<4x8xf32>,
    %17 = vector.extract_strided_slice %10 {offsets = [0, 2, 0], sizes = [4, 1, 8], strides = [1, 1, 1]} : vector<4x8x8xf32> to vector<4x1x8xf32>
    %18 = vector.shape_cast %17 : vector<4x1x8xf32> to vector<4x8xf32>
    %c0_8 = arith.constant 0 : index
    %c73 = arith.constant 73 : index
    %19 = vector.load %arg7[%c0_8, %c73] : memref<4x1764xf32, #tpu.memory_space<vmem>>, vector<4x8xf32>
    tpu.vector_store %arg7[%c0_8, %c73], %18 {strides = array<i32>} : memref<4x1764xf32, #tpu.memory_space<vmem>>, vector<4x8xf32>,
    %20 = vector.extract_strided_slice %10 {offsets = [0, 3, 0], sizes = [4, 1, 8], strides = [1, 1, 1]} : vector<4x8x8xf32> to vector<4x1x8xf32>
    %21 = vector.shape_cast %20 : vector<4x1x8xf32> to vector<4x8xf32>
    %c0_9 = arith.constant 0 : index
    %c87 = arith.constant 87 : index
    %22 = vector.load %arg7[%c0_9, %c87] : memref<4x1764xf32, #tpu.memory_space<vmem>>, vector<4x8xf32>
    tpu.vector_store %arg7[%c0_9, %c87], %21 {strides = array<i32>} : memref<4x1764xf32, #tpu.memory_space<vmem>>, vector<4x8xf32>,
    %23 = vector.extract_strided_slice %10 {offsets = [0, 4, 0], sizes = [4, 1, 8], strides = [1, 1, 1]} : vector<4x8x8xf32> to vector<4x1x8xf32>
    %24 = vector.shape_cast %23 : vector<4x1x8xf32> to vector<4x8xf32>
    %c0_10 = arith.constant 0 : index
    %c101 = arith.constant 101 : index
    %25 = vector.load %arg7[%c0_10, %c101] : memref<4x1764xf32, #tpu.memory_space<vmem>>, vector<4x8xf32>
    tpu.vector_store %arg7[%c0_10, %c101], %24 {strides = array<i32>} : memref<4x1764xf32, #tpu.memory_space<vmem>>, vector<4x8xf32>,
    %26 = vector.extract_strided_slice %10 {offsets = [0, 5, 0], sizes = [4, 1, 8], strides = [1, 1, 1]} : vector<4x8x8xf32> to vector<4x1x8xf32>
    %27 = vector.shape_cast %26 : vector<4x1x8xf32> to vector<4x8xf32>
    %c0_11 = arith.constant 0 : index
    %c115 = arith.constant 115 : index
    %28 = vector.load %arg7[%c0_11, %c115] : memref<4x1764xf32, #tpu.memory_space<vmem>>, vector<4x8xf32>
    tpu.vector_store %arg7[%c0_11, %c115], %27 {strides = array<i32>} : memref<4x1764xf32, #tpu.memory_space<vmem>>, vector<4x8xf32>,
    %29 = vector.extract_strided_slice %10 {offsets = [0, 6, 0], sizes = [4, 1, 8], strides = [1, 1, 1]} : vector<4x8x8xf32> to vector<4x1x8xf32>
    %30 = vector.shape_cast %29 : vector<4x1x8xf32> to vector<4x8xf32>
    %c0_12 = arith.constant 0 : index
    %c129 = arith.constant 129 : index
    %31 = vector.load %arg7[%c0_12, %c129] : memref<4x1764xf32, #tpu.memory_space<vmem>>, vector<4x8xf32>
    tpu.vector_store %arg7[%c0_12, %c129], %30 {strides = array<i32>} : memref<4x1764xf32, #tpu.memory_space<vmem>>, vector<4x8xf32>,
    %32 = vector.extract_strided_slice %10 {offsets = [0, 7, 0], sizes = [4, 1, 8], strides = [1, 1, 1]} : vector<4x8x8xf32> to vector<4x1x8xf32>
    %33 = vector.shape_cast %32 : vector<4x1x8xf32> to vector<4x8xf32>
    %c0_13 = arith.constant 0 : index
    %c143 = arith.constant 143 : index
    %34 = vector.load %arg7[%c0_13, %c143] : memref<4x1764xf32, #tpu.memory_space<vmem>>, vector<4x8xf32>
    tpu.vector_store %arg7[%c0_13, %c143], %33 {strides = array<i32>} : memref<4x1764xf32, #tpu.memory_space<vmem>>, vector<4x8xf32>,
    %c6_i32_14 = arith.constant 6 : i32
    %35 = arith.muli %arg1, %c6_i32_14 : i32
    %c-2_i32 = arith.constant -2 : i32
    %36 = arith.addi %35, %c-2_i32 : i32
    %c0_i32_15 = arith.constant 0 : i32
    %37 = arith.cmpi sge, %36, %c0_i32_15 : i32
    %c8_i32_16 = arith.constant 8 : i32
    %38 = arith.cmpi slt, %36, %c8_i32_16 : i32
    %39 = arith.andi %37, %38 : i1
    %c0_17 = arith.constant 0 : index
    %c4 = arith.constant 4 : index
    %c0_18 = arith.constant 0 : index
    %c0_19 = arith.constant 0 : index
    %c0_20 = arith.constant 0 : index
    %40 = vector.load %arg2[%c0_17, %c4, %c0_18, %c0_19, %c0_20] : memref<1x6x4x8x8xf32, #tpu.memory_space<vmem>>, vector<1x1x4x8x8xf32>
    %41 = vector.shape_cast %40 : vector<1x1x4x8x8xf32> to vector<4x8x8xf32>
    %cst_21 = arith.constant 0.000000e+00 : f32
    %42 = vector.broadcast %cst_21 : f32 to vector<4x8x8xf32>
    %43 = arith.select %39, %41, %42 : vector<4x8x8xf32>
    %44 = vector.extract_strided_slice %43 {offsets = [0, 0, 0], sizes = [4, 1, 8], strides = [1, 1, 1]} : vector<4x8x8xf32> to vector<4x1x8xf32>
    %45 = vector.shape_cast %44 : vector<4x1x8xf32> to vector<4x8xf32>
    %c0_22 = arith.constant 0 : index
    %c241 = arith.constant 241 : index
    %46 = vector.load %arg7[%c0_22, %c241] : memref<4x1764xf32, #tpu.memory_space<vmem>>, vector<4x8xf32>
    tpu.vector_store %arg7[%c0_22, %c241], %45 {strides = array<i32>} : memref<4x1764xf32, #tpu.memory_space<vmem>>, vector<4x8xf32>,
    %47 = vector.extract_strided_slice %43 {offsets = [0, 1, 0], sizes = [4, 1, 8], strides = [1, 1, 1]} : vector<4x8x8xf32> to vector<4x1x8xf32>
    %48 = vector.shape_cast %47 : vector<4x1x8xf32> to vector<4x8xf32>
    %c0_23 = arith.constant 0 : index
    %c255 = arith.constant 255 : index
    %49 = vector.load %arg7[%c0_23, %c255] : memref<4x1764xf32, #tpu.memory_space<vmem>>, vector<4x8xf32>
    tpu.vector_store %arg7[%c0_23, %c255], %48 {strides = array<i32>} : memref<4x1764xf32, #tpu.memory_space<vmem>>, vector<4x8xf32>,
    %50 = vector.extract_strided_slice %43 {offsets = [0, 2, 0], sizes = [4, 1, 8], strides = [1, 1, 1]} : vector<4x8x8xf32> to vector<4x1x8xf32>
    %51 = vector.shape_cast %50 : vector<4x1x8xf32> to vector<4x8xf32>
    %c0_24 = arith.constant 0 : index
    %c269 = arith.constant 269 : index
    %52 = vector.load %arg7[%c0_24, %c269] : memref<4x1764xf32, #tpu.memory_space<vmem>>, vector<4x8xf32>
    tpu.vector_store %arg7[%c0_24, %c269], %51 {strides = array<i32>} : memref<4x1764xf32, #tpu.memory_space<vmem>>, vector<4x8xf32>,
    %53 = vector.extract_strided_slice %43 {offsets = [0, 3, 0], sizes = [4, 1, 8], strides = [1, 1, 1]} : vector<4x8x8xf32> to vector<4x1x8xf32>
    %54 = vector.shape_cast %53 : vector<4x1x8xf32> to vector<4x8xf32>
    %c0_25 = arith.constant 0 : index
    %c283 = arith.constant 283 : index
    %55 = vector.load %arg7[%c0_25, %c283] : memref<4x1764xf32, #tpu.memory_space<vmem>>, vector<4x8xf32>
    tpu.vector_store %arg7[%c0_25, %c283], %54 {strides = array<i32>} : memref<4x1764xf32, #tpu.memory_space<vmem>>, vector<4x8xf32>,
    %56 = vector.extract_strided_slice %43 {offsets = [0, 4, 0], sizes = [4, 1, 8], strides = [1, 1, 1]} : vector<4x8x8xf32> to vector<4x1x8xf32>
    %57 = vector.shape_cast %56 : vector<4x1x8xf32> to vector<4x8xf32>
    %c0_26 = arith.constant 0 : index
    %c297 = arith.constant 297 : index
    %58 = vector.load %arg7[%c0_26, %c297] : memref<4x1764xf32, #tpu.memory_space<vmem>>, vector<4x8xf32>
    tpu.vector_store %arg7[%c0_26, %c297], %57 {strides = array<i32>} : memref<4x1764xf32, #tpu.memory_space<vmem>>, vector<4x8xf32>,
    %59 = vector.extract_strided_slice %43 {offsets = [0, 5, 0], sizes = [4, 1, 8], strides = [1, 1, 1]} : vector<4x8x8xf32> to vector<4x1x8xf32>
    %60 = vector.shape_cast %59 : vector<4x1x8xf32> to vector<4x8xf32>
    %c0_27 = arith.constant 0 : index
    %c311 = arith.constant 311 : index
    %61 = vector.load %arg7[%c0_27, %c311] : memref<4x1764xf32, #tpu.memory_space<vmem>>, vector<4x8xf32>
    tpu.vector_store %arg7[%c0_27, %c311], %60 {strides = array<i32>} : memref<4x1764xf32, #tpu.memory_space<vmem>>, vector<4x8xf32>,
    %62 = vector.extract_strided_slice %43 {offsets = [0, 6, 0], sizes = [4, 1, 8], strides = [1, 1, 1]} : vector<4x8x8xf32> to vector<4x1x8xf32>
    %63 = vector.shape_cast %62 : vector<4x1x8xf32> to vector<4x8xf32>
    %c0_28 = arith.constant 0 : index
    %c325 = arith.constant 325 : index
    %64 = vector.load %arg7[%c0_28, %c325] : memref<4x1764xf32, #tpu.memory_space<vmem>>, vector<4x8xf32>
    tpu.vector_store %arg7[%c0_28, %c325], %63 {strides = array<i32>} : memref<4x1764xf32, #tpu.memory_space<vmem>>, vector<4x8xf32>,
    %65 = vector.extract_strided_slice %43 {offsets = [0, 7, 0], sizes = [4, 1, 8], strides = [1, 1, 1]} : vector<4x8x8xf32> to vector<4x1x8xf32>
    %66 = vector.shape_cast %65 : vector<4x1x8xf32> to vector<4x8xf32>
    %c0_29 = arith.constant 0 : index
    %c339 = arith.constant 339 : index
    %67 = vector.load %arg7[%c0_29, %c339] : memref<4x1764xf32, #tpu.memory_space<vmem>>, vector<4x8xf32>
    tpu.vector_store %arg7[%c0_29, %c339], %66 {strides = array<i32>} : memref<4x1764xf32, #tpu.memory_space<vmem>>, vector<4x8xf32>,
    %c6_i32_30 = arith.constant 6 : i32
    %68 = arith.muli %arg1, %c6_i32_30 : i32
    %c-1_i32 = arith.constant -1 : i32
    %69 = arith.addi %68, %c-1_i32 : i32
    %c0_i32_31 = arith.constant 0 : i32
    %70 = arith.cmpi sge, %69, %c0_i32_31 : i32
    %c8_i32_32 = arith.constant 8 : i32
    %71 = arith.cmpi slt, %69, %c8_i32_32 : i32
    %72 = arith.andi %70, %71 : i1
    %c0_33 = arith.constant 0 : index
    %c5 = arith.constant 5 : index
    %c0_34 = arith.constant 0 : index
    %c0_35 = arith.constant 0 : index
    %c0_36 = arith.constant 0 : index
    %73 = vector.load %arg2[%c0_33, %c5, %c0_34, %c0_35, %c0_36] : memref<1x6x4x8x8xf32, #tpu.memory_space<vmem>>, vector<1x1x4x8x8xf32>
    %74 = vector.shape_cast %73 : vector<1x1x4x8x8xf32> to vector<4x8x8xf32>
    %cst_37 = arith.constant 0.000000e+00 : f32
    %75 = vector.broadcast %cst_37 : f32 to vector<4x8x8xf32>
    %76 = arith.select %72, %74, %75 : vector<4x8x8xf32>
    %77 = vector.extract_strided_slice %76 {offsets = [0, 0, 0], sizes = [4, 1, 8], strides = [1, 1, 1]} : vector<4x8x8xf32> to vector<4x1x8xf32>
    %78 = vector.shape_cast %77 : vector<4x1x8xf32> to vector<4x8xf32>
    %c0_38 = arith.constant 0 : index
    %c437 = arith.constant 437 : index
    %79 = vector.load %arg7[%c0_38, %c437] : memref<4x1764xf32, #tpu.memory_space<vmem>>, vector<4x8xf32>
    tpu.vector_store %arg7[%c0_38, %c437], %78 {strides = array<i32>} : memref<4x1764xf32, #tpu.memory_space<vmem>>, vector<4x8xf32>,
    %80 = vector.extract_strided_slice %76 {offsets = [0, 1, 0], sizes = [4, 1, 8], strides = [1, 1, 1]} : vector<4x8x8xf32> to vector<4x1x8xf32>
    %81 = vector.shape_cast %80 : vector<4x1x8xf32> to vector<4x8xf32>
    %c0_39 = arith.constant 0 : index
    %c451 = arith.constant 451 : index
    %82 = vector.load %arg7[%c0_39, %c451] : memref<4x1764xf32, #tpu.memory_space<vmem>>, vector<4x8xf32>
    tpu.vector_store %arg7[%c0_39, %c451], %81 {strides = array<i32>} : memref<4x1764xf32, #tpu.memory_space<vmem>>, vector<4x8xf32>,
    %83 = vector.extract_strided_slice %76 {offsets = [0, 2, 0], sizes = [4, 1, 8], strides = [1, 1, 1]} : vector<4x8x8xf32> to vector<4x1x8xf32>
    %84 = vector.shape_cast %83 : vector<4x1x8xf32> to vector<4x8xf32>
    %c0_40 = arith.constant 0 : index
    %c465 = arith.constant 465 : index
    %85 = vector.load %arg7[%c0_40, %c465] : memref<4x1764xf32, #tpu.memory_space<vmem>>, vector<4x8xf32>
    tpu.vector_store %arg7[%c0_40, %c465], %84 {strides = array<i32>} : memref<4x1764xf32, #tpu.memory_space<vmem>>, vector<4x8xf32>,
    %86 = vector.extract_strided_slice %76 {offsets = [0, 3, 0], sizes = [4, 1, 8], strides = [1, 1, 1]} : vector<4x8x8xf32> to vector<4x1x8xf32>
    %87 = vector.shape_cast %86 : vector<4x1x8xf32> to vector<4x8xf32>
    %c0_41 = arith.constant 0 : index
    %c479 = arith.constant 479 : index
    %88 = vector.load %arg7[%c0_41, %c479] : memref<4x1764xf32, #tpu.memory_space<vmem>>, vector<4x8xf32>
    tpu.vector_store %arg7[%c0_41, %c479], %87 {strides = array<i32>} : memref<4x1764xf32, #tpu.memory_space<vmem>>, vector<4x8xf32>,
    %89 = vector.extract_strided_slice %76 {offsets = [0, 4, 0], sizes = [4, 1, 8], strides = [1, 1, 1]} : vector<4x8x8xf32> to vector<4x1x8xf32>
    %90 = vector.shape_cast %89 : vector<4x1x8xf32> to vector<4x8xf32>
    %c0_42 = arith.constant 0 : index
    %c493 = arith.constant 493 : index
    %91 = vector.load %arg7[%c0_42, %c493] : memref<4x1764xf32, #tpu.memory_space<vmem>>, vector<4x8xf32>
    tpu.vector_store %arg7[%c0_42, %c493], %90 {strides = array<i32>} : memref<4x1764xf32, #tpu.memory_space<vmem>>, vector<4x8xf32>,
    %92 = vector.extract_strided_slice %76 {offsets = [0, 5, 0], sizes = [4, 1, 8], strides = [1, 1, 1]} : vector<4x8x8xf32> to vector<4x1x8xf32>
    %93 = vector.shape_cast %92 : vector<4x1x8xf32> to vector<4x8xf32>
    %c0_43 = arith.constant 0 : index
    %c507 = arith.constant 507 : index
    %94 = vector.load %arg7[%c0_43, %c507] : memref<4x1764xf32, #tpu.memory_space<vmem>>, vector<4x8xf32>
    tpu.vector_store %arg7[%c0_43, %c507], %93 {strides = array<i32>} : memref<4x1764xf32, #tpu.memory_space<vmem>>, vector<4x8xf32>,
    %95 = vector.extract_strided_slice %76 {offsets = [0, 6, 0], sizes = [4, 1, 8], strides = [1, 1, 1]} : vector<4x8x8xf32> to vector<4x1x8xf32>
    %96 = vector.shape_cast %95 : vector<4x1x8xf32> to vector<4x8xf32>
    %c0_44 = arith.constant 0 : index
    %c521 = arith.constant 521 : index
    %97 = vector.load %arg7[%c0_44, %c521] : memref<4x1764xf32, #tpu.memory_space<vmem>>, vector<4x8xf32>
    tpu.vector_store %arg7[%c0_44, %c521], %96 {strides = array<i32>} : memref<4x1764xf32, #tpu.memory_space<vmem>>, vector<4x8xf32>,
    %98 = vector.extract_strided_slice %76 {offsets = [0, 7, 0], sizes = [4, 1, 8], strides = [1, 1, 1]} : vector<4x8x8xf32> to vector<4x1x8xf32>
    %99 = vector.shape_cast %98 : vector<4x1x8xf32> to vector<4x8xf32>
    %c0_45 = arith.constant 0 : index
    %c535 = arith.constant 535 : index
    %100 = vector.load %arg7[%c0_45, %c535] : memref<4x1764xf32, #tpu.memory_space<vmem>>, vector<4x8xf32>
    tpu.vector_store %arg7[%c0_45, %c535], %99 {strides = array<i32>} : memref<4x1764xf32, #tpu.memory_space<vmem>>, vector<4x8xf32>,
    %c6_i32_46 = arith.constant 6 : i32
    %101 = arith.muli %arg1, %c6_i32_46 : i32
    %c0_i32_47 = arith.constant 0 : i32
    %102 = arith.addi %101, %c0_i32_47 : i32
    %c0_i32_48 = arith.constant 0 : i32
    %103 = arith.cmpi sge, %102, %c0_i32_48 : i32
    %c8_i32_49 = arith.constant 8 : i32
    %104 = arith.cmpi slt, %102, %c8_i32_49 : i32
    %105 = arith.andi %103, %104 : i1
    %c0_50 = arith.constant 0 : index
    %c0_51 = arith.constant 0 : index
    %c0_52 = arith.constant 0 : index
    %c0_53 = arith.constant 0 : index
    %c0_54 = arith.constant 0 : index
    %106 = vector.load %arg3[%c0_50, %c0_51, %c0_52, %c0_53, %c0_54] : memref<1x6x4x8x8xf32, #tpu.memory_space<vmem>>, vector<1x1x4x8x8xf32>
    %107 = vector.shape_cast %106 : vector<1x1x4x8x8xf32> to vector<4x8x8xf32>
    %cst_55 = arith.constant 0.000000e+00 : f32
    %108 = vector.broadcast %cst_55 : f32 to vector<4x8x8xf32>
    %109 = arith.select %105, %107, %108 : vector<4x8x8xf32>
    %110 = vector.extract_strided_slice %109 {offsets = [0, 0, 0], sizes = [4, 1, 8], strides = [1, 1, 1]} : vector<4x8x8xf32> to vector<4x1x8xf32>
    %111 = vector.shape_cast %110 : vector<4x1x8xf32> to vector<4x8xf32>
    %c0_56 = arith.constant 0 : index
    %c633 = arith.constant 633 : index
    %112 = vector.load %arg7[%c0_56, %c633] : memref<4x1764xf32, #tpu.memory_space<vmem>>, vector<4x8xf32>
    tpu.vector_store %arg7[%c0_56, %c633], %111 {strides = array<i32>} : memref<4x1764xf32, #tpu.memory_space<vmem>>, vector<4x8xf32>,
    %113 = vector.extract_strided_slice %109 {offsets = [0, 1, 0], sizes = [4, 1, 8], strides = [1, 1, 1]} : vector<4x8x8xf32> to vector<4x1x8xf32>
    %114 = vector.shape_cast %113 : vector<4x1x8xf32> to vector<4x8xf32>
    %c0_57 = arith.constant 0 : index
    %c647 = arith.constant 647 : index
    %115 = vector.load %arg7[%c0_57, %c647] : memref<4x1764xf32, #tpu.memory_space<vmem>>, vector<4x8xf32>
    tpu.vector_store %arg7[%c0_57, %c647], %114 {strides = array<i32>} : memref<4x1764xf32, #tpu.memory_space<vmem>>, vector<4x8xf32>,
    %116 = vector.extract_strided_slice %109 {offsets = [0, 2, 0], sizes = [4, 1, 8], strides = [1, 1, 1]} : vector<4x8x8xf32> to vector<4x1x8xf32>
    %117 = vector.shape_cast %116 : vector<4x1x8xf32> to vector<4x8xf32>
    %c0_58 = arith.constant 0 : index
    %c661 = arith.constant 661 : index
    %118 = vector.load %arg7[%c0_58, %c661] : memref<4x1764xf32, #tpu.memory_space<vmem>>, vector<4x8xf32>
    tpu.vector_store %arg7[%c0_58, %c661], %117 {strides = array<i32>} : memref<4x1764xf32, #tpu.memory_space<vmem>>, vector<4x8xf32>,
    %119 = vector.extract_strided_slice %109 {offsets = [0, 3, 0], sizes = [4, 1, 8], strides = [1, 1, 1]} : vector<4x8x8xf32> to vector<4x1x8xf32>
    %120 = vector.shape_cast %119 : vector<4x1x8xf32> to vector<4x8xf32>
    %c0_59 = arith.constant 0 : index
    %c675 = arith.constant 675 : index
    %121 = vector.load %arg7[%c0_59, %c675] : memref<4x1764xf32, #tpu.memory_space<vmem>>, vector<4x8xf32>
    tpu.vector_store %arg7[%c0_59, %c675], %120 {strides = array<i32>} : memref<4x1764xf32, #tpu.memory_space<vmem>>, vector<4x8xf32>,
    %122 = vector.extract_strided_slice %109 {offsets = [0, 4, 0], sizes = [4, 1, 8], strides = [1, 1, 1]} : vector<4x8x8xf32> to vector<4x1x8xf32>
    %123 = vector.shape_cast %122 : vector<4x1x8xf32> to vector<4x8xf32>
    %c0_60 = arith.constant 0 : index
    %c689 = arith.constant 689 : index
    %124 = vector.load %arg7[%c0_60, %c689] : memref<4x1764xf32, #tpu.memory_space<vmem>>, vector<4x8xf32>
    tpu.vector_store %arg7[%c0_60, %c689], %123 {strides = array<i32>} : memref<4x1764xf32, #tpu.memory_space<vmem>>, vector<4x8xf32>,
    %125 = vector.extract_strided_slice %109 {offsets = [0, 5, 0], sizes = [4, 1, 8], strides = [1, 1, 1]} : vector<4x8x8xf32> to vector<4x1x8xf32>
    %126 = vector.shape_cast %125 : vector<4x1x8xf32> to vector<4x8xf32>
    %c0_61 = arith.constant 0 : index
    %c703 = arith.constant 703 : index
    %127 = vector.load %arg7[%c0_61, %c703] : memref<4x1764xf32, #tpu.memory_space<vmem>>, vector<4x8xf32>
    tpu.vector_store %arg7[%c0_61, %c703], %126 {strides = array<i32>} : memref<4x1764xf32, #tpu.memory_space<vmem>>, vector<4x8xf32>,
    %128 = vector.extract_strided_slice %109 {offsets = [0, 6, 0], sizes = [4, 1, 8], strides = [1, 1, 1]} : vector<4x8x8xf32> to vector<4x1x8xf32>
    %129 = vector.shape_cast %128 : vector<4x1x8xf32> to vector<4x8xf32>
    %c0_62 = arith.constant 0 : index
    %c717 = arith.constant 717 : index
    %130 = vector.load %arg7[%c0_62, %c717] : memref<4x1764xf32, #tpu.memory_space<vmem>>, vector<4x8xf32>
    tpu.vector_store %arg7[%c0_62, %c717], %129 {strides = array<i32>} : memref<4x1764xf32, #tpu.memory_space<vmem>>, vector<4x8xf32>,
    %131 = vector.extract_strided_slice %109 {offsets = [0, 7, 0], sizes = [4, 1, 8], strides = [1, 1, 1]} : vector<4x8x8xf32> to vector<4x1x8xf32>
    %132 = vector.shape_cast %131 : vector<4x1x8xf32> to vector<4x8xf32>
    %c0_63 = arith.constant 0 : index
    %c731 = arith.constant 731 : index
    %133 = vector.load %arg7[%c0_63, %c731] : memref<4x1764xf32, #tpu.memory_space<vmem>>, vector<4x8xf32>
    tpu.vector_store %arg7[%c0_63, %c731], %132 {strides = array<i32>} : memref<4x1764xf32, #tpu.memory_space<vmem>>, vector<4x8xf32>,
    %c6_i32_64 = arith.constant 6 : i32
    %134 = arith.muli %arg1, %c6_i32_64 : i32
    %c1_i32 = arith.constant 1 : i32
    %135 = arith.addi %134, %c1_i32 : i32
    %c0_i32_65 = arith.constant 0 : i32
    %136 = arith.cmpi sge, %135, %c0_i32_65 : i32
    %c8_i32_66 = arith.constant 8 : i32
    %137 = arith.cmpi slt, %135, %c8_i32_66 : i32
    %138 = arith.andi %136, %137 : i1
    %c0_67 = arith.constant 0 : index
    %c1 = arith.constant 1 : index
    %c0_68 = arith.constant 0 : index
    %c0_69 = arith.constant 0 : index
    %c0_70 = arith.constant 0 : index
    %139 = vector.load %arg3[%c0_67, %c1, %c0_68, %c0_69, %c0_70] : memref<1x6x4x8x8xf32, #tpu.memory_space<vmem>>, vector<1x1x4x8x8xf32>
    %140 = vector.shape_cast %139 : vector<1x1x4x8x8xf32> to vector<4x8x8xf32>
    %cst_71 = arith.constant 0.000000e+00 : f32
    %141 = vector.broadcast %cst_71 : f32 to vector<4x8x8xf32>
    %142 = arith.select %138, %140, %141 : vector<4x8x8xf32>
    %143 = vector.extract_strided_slice %142 {offsets = [0, 0, 0], sizes = [4, 1, 8], strides = [1, 1, 1]} : vector<4x8x8xf32> to vector<4x1x8xf32>
    %144 = vector.shape_cast %143 : vector<4x1x8xf32> to vector<4x8xf32>
    %c0_72 = arith.constant 0 : index
    %c829 = arith.constant 829 : index
    %145 = vector.load %arg7[%c0_72, %c829] : memref<4x1764xf32, #tpu.memory_space<vmem>>, vector<4x8xf32>
    tpu.vector_store %arg7[%c0_72, %c829], %144 {strides = array<i32>} : memref<4x1764xf32, #tpu.memory_space<vmem>>, vector<4x8xf32>,
    %146 = vector.extract_strided_slice %142 {offsets = [0, 1, 0], sizes = [4, 1, 8], strides = [1, 1, 1]} : vector<4x8x8xf32> to vector<4x1x8xf32>
    %147 = vector.shape_cast %146 : vector<4x1x8xf32> to vector<4x8xf32>
    %c0_73 = arith.constant 0 : index
    %c843 = arith.constant 843 : index
    %148 = vector.load %arg7[%c0_73, %c843] : memref<4x1764xf32, #tpu.memory_space<vmem>>, vector<4x8xf32>
    tpu.vector_store %arg7[%c0_73, %c843], %147 {strides = array<i32>} : memref<4x1764xf32, #tpu.memory_space<vmem>>, vector<4x8xf32>,
    %149 = vector.extract_strided_slice %142 {offsets = [0, 2, 0], sizes = [4, 1, 8], strides = [1, 1, 1]} : vector<4x8x8xf32> to vector<4x1x8xf32>
    %150 = vector.shape_cast %149 : vector<4x1x8xf32> to vector<4x8xf32>
    %c0_74 = arith.constant 0 : index
    %c857 = arith.constant 857 : index
    %151 = vector.load %arg7[%c0_74, %c857] : memref<4x1764xf32, #tpu.memory_space<vmem>>, vector<4x8xf32>
    tpu.vector_store %arg7[%c0_74, %c857], %150 {strides = array<i32>} : memref<4x1764xf32, #tpu.memory_space<vmem>>, vector<4x8xf32>,
    %152 = vector.extract_strided_slice %142 {offsets = [0, 3, 0], sizes = [4, 1, 8], strides = [1, 1, 1]} : vector<4x8x8xf32> to vector<4x1x8xf32>
    %153 = vector.shape_cast %152 : vector<4x1x8xf32> to vector<4x8xf32>
    %c0_75 = arith.constant 0 : index
    %c871 = arith.constant 871 : index
    %154 = vector.load %arg7[%c0_75, %c871] : memref<4x1764xf32, #tpu.memory_space<vmem>>, vector<4x8xf32>
    tpu.vector_store %arg7[%c0_75, %c871], %153 {strides = array<i32>} : memref<4x1764xf32, #tpu.memory_space<vmem>>, vector<4x8xf32>,
    %155 = vector.extract_strided_slice %142 {offsets = [0, 4, 0], sizes = [4, 1, 8], strides = [1, 1, 1]} : vector<4x8x8xf32> to vector<4x1x8xf32>
    %156 = vector.shape_cast %155 : vector<4x1x8xf32> to vector<4x8xf32>
    %c0_76 = arith.constant 0 : index
    %c885 = arith.constant 885 : index
    %157 = vector.load %arg7[%c0_76, %c885] : memref<4x1764xf32, #tpu.memory_space<vmem>>, vector<4x8xf32>
    tpu.vector_store %arg7[%c0_76, %c885], %156 {strides = array<i32>} : memref<4x1764xf32, #tpu.memory_space<vmem>>, vector<4x8xf32>,
    %158 = vector.extract_strided_slice %142 {offsets = [0, 5, 0], sizes = [4, 1, 8], strides = [1, 1, 1]} : vector<4x8x8xf32> to vector<4x1x8xf32>
    %159 = vector.shape_cast %158 : vector<4x1x8xf32> to vector<4x8xf32>
    %c0_77 = arith.constant 0 : index
    %c899 = arith.constant 899 : index
    %160 = vector.load %arg7[%c0_77, %c899] : memref<4x1764xf32, #tpu.memory_space<vmem>>, vector<4x8xf32>
    tpu.vector_store %arg7[%c0_77, %c899], %159 {strides = array<i32>} : memref<4x1764xf32, #tpu.memory_space<vmem>>, vector<4x8xf32>,
    %161 = vector.extract_strided_slice %142 {offsets = [0, 6, 0], sizes = [4, 1, 8], strides = [1, 1, 1]} : vector<4x8x8xf32> to vector<4x1x8xf32>
    %162 = vector.shape_cast %161 : vector<4x1x8xf32> to vector<4x8xf32>
    %c0_78 = arith.constant 0 : index
    %c913 = arith.constant 913 : index
    %163 = vector.load %arg7[%c0_78, %c913] : memref<4x1764xf32, #tpu.memory_space<vmem>>, vector<4x8xf32>
    tpu.vector_store %arg7[%c0_78, %c913], %162 {strides = array<i32>} : memref<4x1764xf32, #tpu.memory_space<vmem>>, vector<4x8xf32>,
    %164 = vector.extract_strided_slice %142 {offsets = [0, 7, 0], sizes = [4, 1, 8], strides = [1, 1, 1]} : vector<4x8x8xf32> to vector<4x1x8xf32>
    %165 = vector.shape_cast %164 : vector<4x1x8xf32> to vector<4x8xf32>
    %c0_79 = arith.constant 0 : index
    %c927 = arith.constant 927 : index
    %166 = vector.load %arg7[%c0_79, %c927] : memref<4x1764xf32, #tpu.memory_space<vmem>>, vector<4x8xf32>
    tpu.vector_store %arg7[%c0_79, %c927], %165 {strides = array<i32>} : memref<4x1764xf32, #tpu.memory_space<vmem>>, vector<4x8xf32>,
    %c6_i32_80 = arith.constant 6 : i32
    %167 = arith.muli %arg1, %c6_i32_80 : i32
    %c2_i32 = arith.constant 2 : i32
    %168 = arith.addi %167, %c2_i32 : i32
    %c0_i32_81 = arith.constant 0 : i32
    %169 = arith.cmpi sge, %168, %c0_i32_81 : i32
    %c8_i32_82 = arith.constant 8 : i32
    %170 = arith.cmpi slt, %168, %c8_i32_82 : i32
    %171 = arith.andi %169, %170 : i1
    %c0_83 = arith.constant 0 : index
    %c2 = arith.constant 2 : index
    %c0_84 = arith.constant 0 : index
    %c0_85 = arith.constant 0 : index
    %c0_86 = arith.constant 0 : index
    %172 = vector.load %arg3[%c0_83, %c2, %c0_84, %c0_85, %c0_86] : memref<1x6x4x8x8xf32, #tpu.memory_space<vmem>>, vector<1x1x4x8x8xf32>
    %173 = vector.shape_cast %172 : vector<1x1x4x8x8xf32> to vector<4x8x8xf32>
    %cst_87 = arith.constant 0.000000e+00 : f32
    %174 = vector.broadcast %cst_87 : f32 to vector<4x8x8xf32>
    %175 = arith.select %171, %173, %174 : vector<4x8x8xf32>
    %176 = vector.extract_strided_slice %175 {offsets = [0, 0, 0], sizes = [4, 1, 8], strides = [1, 1, 1]} : vector<4x8x8xf32> to vector<4x1x8xf32>
    %177 = vector.shape_cast %176 : vector<4x1x8xf32> to vector<4x8xf32>
    %c0_88 = arith.constant 0 : index
    %c1025 = arith.constant 1025 : index
    %178 = vector.load %arg7[%c0_88, %c1025] : memref<4x1764xf32, #tpu.memory_space<vmem>>, vector<4x8xf32>
    tpu.vector_store %arg7[%c0_88, %c1025], %177 {strides = array<i32>} : memref<4x1764xf32, #tpu.memory_space<vmem>>, vector<4x8xf32>,
    %179 = vector.extract_strided_slice %175 {offsets = [0, 1, 0], sizes = [4, 1, 8], strides = [1, 1, 1]} : vector<4x8x8xf32> to vector<4x1x8xf32>
    %180 = vector.shape_cast %179 : vector<4x1x8xf32> to vector<4x8xf32>
    %c0_89 = arith.constant 0 : index
    %c1039 = arith.constant 1039 : index
    %181 = vector.load %arg7[%c0_89, %c1039] : memref<4x1764xf32, #tpu.memory_space<vmem>>, vector<4x8xf32>
    tpu.vector_store %arg7[%c0_89, %c1039], %180 {strides = array<i32>} : memref<4x1764xf32, #tpu.memory_space<vmem>>, vector<4x8xf32>,
    %182 = vector.extract_strided_slice %175 {offsets = [0, 2, 0], sizes = [4, 1, 8], strides = [1, 1, 1]} : vector<4x8x8xf32> to vector<4x1x8xf32>
    %183 = vector.shape_cast %182 : vector<4x1x8xf32> to vector<4x8xf32>
    %c0_90 = arith.constant 0 : index
    %c1053 = arith.constant 1053 : index
    %184 = vector.load %arg7[%c0_90, %c1053] : memref<4x1764xf32, #tpu.memory_space<vmem>>, vector<4x8xf32>
    tpu.vector_store %arg7[%c0_90, %c1053], %183 {strides = array<i32>} : memref<4x1764xf32, #tpu.memory_space<vmem>>, vector<4x8xf32>,
    %185 = vector.extract_strided_slice %175 {offsets = [0, 3, 0], sizes = [4, 1, 8], strides = [1, 1, 1]} : vector<4x8x8xf32> to vector<4x1x8xf32>
    %186 = vector.shape_cast %185 : vector<4x1x8xf32> to vector<4x8xf32>
    %c0_91 = arith.constant 0 : index
    %c1067 = arith.constant 1067 : index
    %187 = vector.load %arg7[%c0_91, %c1067] : memref<4x1764xf32, #tpu.memory_space<vmem>>, vector<4x8xf32>
    tpu.vector_store %arg7[%c0_91, %c1067], %186 {strides = array<i32>} : memref<4x1764xf32, #tpu.memory_space<vmem>>, vector<4x8xf32>,
    %188 = vector.extract_strided_slice %175 {offsets = [0, 4, 0], sizes = [4, 1, 8], strides = [1, 1, 1]} : vector<4x8x8xf32> to vector<4x1x8xf32>
    %189 = vector.shape_cast %188 : vector<4x1x8xf32> to vector<4x8xf32>
    %c0_92 = arith.constant 0 : index
    %c1081 = arith.constant 1081 : index
    %190 = vector.load %arg7[%c0_92, %c1081] : memref<4x1764xf32, #tpu.memory_space<vmem>>, vector<4x8xf32>
    tpu.vector_store %arg7[%c0_92, %c1081], %189 {strides = array<i32>} : memref<4x1764xf32, #tpu.memory_space<vmem>>, vector<4x8xf32>,
    %191 = vector.extract_strided_slice %175 {offsets = [0, 5, 0], sizes = [4, 1, 8], strides = [1, 1, 1]} : vector<4x8x8xf32> to vector<4x1x8xf32>
    %192 = vector.shape_cast %191 : vector<4x1x8xf32> to vector<4x8xf32>
    %c0_93 = arith.constant 0 : index
    %c1095 = arith.constant 1095 : index
    %193 = vector.load %arg7[%c0_93, %c1095] : memref<4x1764xf32, #tpu.memory_space<vmem>>, vector<4x8xf32>
    tpu.vector_store %arg7[%c0_93, %c1095], %192 {strides = array<i32>} : memref<4x1764xf32, #tpu.memory_space<vmem>>, vector<4x8xf32>,
    %194 = vector.extract_strided_slice %175 {offsets = [0, 6, 0], sizes = [4, 1, 8], strides = [1, 1, 1]} : vector<4x8x8xf32> to vector<4x1x8xf32>
    %195 = vector.shape_cast %194 : vector<4x1x8xf32> to vector<4x8xf32>
    %c0_94 = arith.constant 0 : index
    %c1109 = arith.constant 1109 : index
    %196 = vector.load %arg7[%c0_94, %c1109] : memref<4x1764xf32, #tpu.memory_space<vmem>>, vector<4x8xf32>
    tpu.vector_store %arg7[%c0_94, %c1109], %195 {strides = array<i32>} : memref<4x1764xf32, #tpu.memory_space<vmem>>, vector<4x8xf32>,
    %197 = vector.extract_strided_slice %175 {offsets = [0, 7, 0], sizes = [4, 1, 8], strides = [1, 1, 1]} : vector<4x8x8xf32> to vector<4x1x8xf32>
    %198 = vector.shape_cast %197 : vector<4x1x8xf32> to vector<4x8xf32>
    %c0_95 = arith.constant 0 : index
    %c1123 = arith.constant 1123 : index
    %199 = vector.load %arg7[%c0_95, %c1123] : memref<4x1764xf32, #tpu.memory_space<vmem>>, vector<4x8xf32>
    tpu.vector_store %arg7[%c0_95, %c1123], %198 {strides = array<i32>} : memref<4x1764xf32, #tpu.memory_space<vmem>>, vector<4x8xf32>,
    %c6_i32_96 = arith.constant 6 : i32
    %200 = arith.muli %arg1, %c6_i32_96 : i32
    %c3_i32 = arith.constant 3 : i32
    %201 = arith.addi %200, %c3_i32 : i32
    %c0_i32_97 = arith.constant 0 : i32
    %202 = arith.cmpi sge, %201, %c0_i32_97 : i32
    %c8_i32_98 = arith.constant 8 : i32
    %203 = arith.cmpi slt, %201, %c8_i32_98 : i32
    %204 = arith.andi %202, %203 : i1
    %c0_99 = arith.constant 0 : index
    %c3_100 = arith.constant 3 : index
    %c0_101 = arith.constant 0 : index
    %c0_102 = arith.constant 0 : index
    %c0_103 = arith.constant 0 : index
    %205 = vector.load %arg3[%c0_99, %c3_100, %c0_101, %c0_102, %c0_103] : memref<1x6x4x8x8xf32, #tpu.memory_space<vmem>>, vector<1x1x4x8x8xf32>
    %206 = vector.shape_cast %205 : vector<1x1x4x8x8xf32> to vector<4x8x8xf32>
    %cst_104 = arith.constant 0.000000e+00 : f32
    %207 = vector.broadcast %cst_104 : f32 to vector<4x8x8xf32>
    %208 = arith.select %204, %206, %207 : vector<4x8x8xf32>
    %209 = vector.extract_strided_slice %208 {offsets = [0, 0, 0], sizes = [4, 1, 8], strides = [1, 1, 1]} : vector<4x8x8xf32> to vector<4x1x8xf32>
    %210 = vector.shape_cast %209 : vector<4x1x8xf32> to vector<4x8xf32>
    %c0_105 = arith.constant 0 : index
    %c1221 = arith.constant 1221 : index
    %211 = vector.load %arg7[%c0_105, %c1221] : memref<4x1764xf32, #tpu.memory_space<vmem>>, vector<4x8xf32>
    tpu.vector_store %arg7[%c0_105, %c1221], %210 {strides = array<i32>} : memref<4x1764xf32, #tpu.memory_space<vmem>>, vector<4x8xf32>,
    %212 = vector.extract_strided_slice %208 {offsets = [0, 1, 0], sizes = [4, 1, 8], strides = [1, 1, 1]} : vector<4x8x8xf32> to vector<4x1x8xf32>
    %213 = vector.shape_cast %212 : vector<4x1x8xf32> to vector<4x8xf32>
    %c0_106 = arith.constant 0 : index
    %c1235 = arith.constant 1235 : index
    %214 = vector.load %arg7[%c0_106, %c1235] : memref<4x1764xf32, #tpu.memory_space<vmem>>, vector<4x8xf32>
    tpu.vector_store %arg7[%c0_106, %c1235], %213 {strides = array<i32>} : memref<4x1764xf32, #tpu.memory_space<vmem>>, vector<4x8xf32>,
    %215 = vector.extract_strided_slice %208 {offsets = [0, 2, 0], sizes = [4, 1, 8], strides = [1, 1, 1]} : vector<4x8x8xf32> to vector<4x1x8xf32>
    %216 = vector.shape_cast %215 : vector<4x1x8xf32> to vector<4x8xf32>
    %c0_107 = arith.constant 0 : index
    %c1249 = arith.constant 1249 : index
    %217 = vector.load %arg7[%c0_107, %c1249] : memref<4x1764xf32, #tpu.memory_space<vmem>>, vector<4x8xf32>
    tpu.vector_store %arg7[%c0_107, %c1249], %216 {strides = array<i32>} : memref<4x1764xf32, #tpu.memory_space<vmem>>, vector<4x8xf32>,
    %218 = vector.extract_strided_slice %208 {offsets = [0, 3, 0], sizes = [4, 1, 8], strides = [1, 1, 1]} : vector<4x8x8xf32> to vector<4x1x8xf32>
    %219 = vector.shape_cast %218 : vector<4x1x8xf32> to vector<4x8xf32>
    %c0_108 = arith.constant 0 : index
    %c1263 = arith.constant 1263 : index
    %220 = vector.load %arg7[%c0_108, %c1263] : memref<4x1764xf32, #tpu.memory_space<vmem>>, vector<4x8xf32>
    tpu.vector_store %arg7[%c0_108, %c1263], %219 {strides = array<i32>} : memref<4x1764xf32, #tpu.memory_space<vmem>>, vector<4x8xf32>,
    %221 = vector.extract_strided_slice %208 {offsets = [0, 4, 0], sizes = [4, 1, 8], strides = [1, 1, 1]} : vector<4x8x8xf32> to vector<4x1x8xf32>
    %222 = vector.shape_cast %221 : vector<4x1x8xf32> to vector<4x8xf32>
    %c0_109 = arith.constant 0 : index
    %c1277 = arith.constant 1277 : index
    %223 = vector.load %arg7[%c0_109, %c1277] : memref<4x1764xf32, #tpu.memory_space<vmem>>, vector<4x8xf32>
    tpu.vector_store %arg7[%c0_109, %c1277], %222 {strides = array<i32>} : memref<4x1764xf32, #tpu.memory_space<vmem>>, vector<4x8xf32>,
    %224 = vector.extract_strided_slice %208 {offsets = [0, 5, 0], sizes = [4, 1, 8], strides = [1, 1, 1]} : vector<4x8x8xf32> to vector<4x1x8xf32>
    %225 = vector.shape_cast %224 : vector<4x1x8xf32> to vector<4x8xf32>
    %c0_110 = arith.constant 0 : index
    %c1291 = arith.constant 1291 : index
    %226 = vector.load %arg7[%c0_110, %c1291] : memref<4x1764xf32, #tpu.memory_space<vmem>>, vector<4x8xf32>
    tpu.vector_store %arg7[%c0_110, %c1291], %225 {strides = array<i32>} : memref<4x1764xf32, #tpu.memory_space<vmem>>, vector<4x8xf32>,
    %227 = vector.extract_strided_slice %208 {offsets = [0, 6, 0], sizes = [4, 1, 8], strides = [1, 1, 1]} : vector<4x8x8xf32> to vector<4x1x8xf32>
    %228 = vector.shape_cast %227 : vector<4x1x8xf32> to vector<4x8xf32>
    %c0_111 = arith.constant 0 : index
    %c1305 = arith.constant 1305 : index
    %229 = vector.load %arg7[%c0_111, %c1305] : memref<4x1764xf32, #tpu.memory_space<vmem>>, vector<4x8xf32>
    tpu.vector_store %arg7[%c0_111, %c1305], %228 {strides = array<i32>} : memref<4x1764xf32, #tpu.memory_space<vmem>>, vector<4x8xf32>,
    %230 = vector.extract_strided_slice %208 {offsets = [0, 7, 0], sizes = [4, 1, 8], strides = [1, 1, 1]} : vector<4x8x8xf32> to vector<4x1x8xf32>
    %231 = vector.shape_cast %230 : vector<4x1x8xf32> to vector<4x8xf32>
    %c0_112 = arith.constant 0 : index
    %c1319 = arith.constant 1319 : index
    %232 = vector.load %arg7[%c0_112, %c1319] : memref<4x1764xf32, #tpu.memory_space<vmem>>, vector<4x8xf32>
    tpu.vector_store %arg7[%c0_112, %c1319], %231 {strides = array<i32>} : memref<4x1764xf32, #tpu.memory_space<vmem>>, vector<4x8xf32>,
    %c6_i32_113 = arith.constant 6 : i32
    %233 = arith.muli %arg1, %c6_i32_113 : i32
    %c4_i32 = arith.constant 4 : i32
    %234 = arith.addi %233, %c4_i32 : i32
    %c0_i32_114 = arith.constant 0 : i32
    %235 = arith.cmpi sge, %234, %c0_i32_114 : i32
    %c8_i32_115 = arith.constant 8 : i32
    %236 = arith.cmpi slt, %234, %c8_i32_115 : i32
    %237 = arith.andi %235, %236 : i1
    %c0_116 = arith.constant 0 : index
    %c4_117 = arith.constant 4 : index
    %c0_118 = arith.constant 0 : index
    %c0_119 = arith.constant 0 : index
    %c0_120 = arith.constant 0 : index
    %238 = vector.load %arg3[%c0_116, %c4_117, %c0_118, %c0_119, %c0_120] : memref<1x6x4x8x8xf32, #tpu.memory_space<vmem>>, vector<1x1x4x8x8xf32>
    %239 = vector.shape_cast %238 : vector<1x1x4x8x8xf32> to vector<4x8x8xf32>
    %cst_121 = arith.constant 0.000000e+00 : f32
    %240 = vector.broadcast %cst_121 : f32 to vector<4x8x8xf32>
    %241 = arith.select %237, %239, %240 : vector<4x8x8xf32>
    %242 = vector.extract_strided_slice %241 {offsets = [0, 0, 0], sizes = [4, 1, 8], strides = [1, 1, 1]} : vector<4x8x8xf32> to vector<4x1x8xf32>
    %243 = vector.shape_cast %242 : vector<4x1x8xf32> to vector<4x8xf32>
    %c0_122 = arith.constant 0 : index
    %c1417 = arith.constant 1417 : index
    %244 = vector.load %arg7[%c0_122, %c1417] : memref<4x1764xf32, #tpu.memory_space<vmem>>, vector<4x8xf32>
    tpu.vector_store %arg7[%c0_122, %c1417], %243 {strides = array<i32>} : memref<4x1764xf32, #tpu.memory_space<vmem>>, vector<4x8xf32>,
    %245 = vector.extract_strided_slice %241 {offsets = [0, 1, 0], sizes = [4, 1, 8], strides = [1, 1, 1]} : vector<4x8x8xf32> to vector<4x1x8xf32>
    %246 = vector.shape_cast %245 : vector<4x1x8xf32> to vector<4x8xf32>
    %c0_123 = arith.constant 0 : index
    %c1431 = arith.constant 1431 : index
    %247 = vector.load %arg7[%c0_123, %c1431] : memref<4x1764xf32, #tpu.memory_space<vmem>>, vector<4x8xf32>
    tpu.vector_store %arg7[%c0_123, %c1431], %246 {strides = array<i32>} : memref<4x1764xf32, #tpu.memory_space<vmem>>, vector<4x8xf32>,
    %248 = vector.extract_strided_slice %241 {offsets = [0, 2, 0], sizes = [4, 1, 8], strides = [1, 1, 1]} : vector<4x8x8xf32> to vector<4x1x8xf32>
    %249 = vector.shape_cast %248 : vector<4x1x8xf32> to vector<4x8xf32>
    %c0_124 = arith.constant 0 : index
    %c1445 = arith.constant 1445 : index
    %250 = vector.load %arg7[%c0_124, %c1445] : memref<4x1764xf32, #tpu.memory_space<vmem>>, vector<4x8xf32>
    tpu.vector_store %arg7[%c0_124, %c1445], %249 {strides = array<i32>} : memref<4x1764xf32, #tpu.memory_space<vmem>>, vector<4x8xf32>,
    %251 = vector.extract_strided_slice %241 {offsets = [0, 3, 0], sizes = [4, 1, 8], strides = [1, 1, 1]} : vector<4x8x8xf32> to vector<4x1x8xf32>
    %252 = vector.shape_cast %251 : vector<4x1x8xf32> to vector<4x8xf32>
    %c0_125 = arith.constant 0 : index
    %c1459 = arith.constant 1459 : index
    %253 = vector.load %arg7[%c0_125, %c1459] : memref<4x1764xf32, #tpu.memory_space<vmem>>, vector<4x8xf32>
    tpu.vector_store %arg7[%c0_125, %c1459], %252 {strides = array<i32>} : memref<4x1764xf32, #tpu.memory_space<vmem>>, vector<4x8xf32>,
    %254 = vector.extract_strided_slice %241 {offsets = [0, 4, 0], sizes = [4, 1, 8], strides = [1, 1, 1]} : vector<4x8x8xf32> to vector<4x1x8xf32>
    %255 = vector.shape_cast %254 : vector<4x1x8xf32> to vector<4x8xf32>
    %c0_126 = arith.constant 0 : index
    %c1473 = arith.constant 1473 : index
    %256 = vector.load %arg7[%c0_126, %c1473] : memref<4x1764xf32, #tpu.memory_space<vmem>>, vector<4x8xf32>
    tpu.vector_store %arg7[%c0_126, %c1473], %255 {strides = array<i32>} : memref<4x1764xf32, #tpu.memory_space<vmem>>, vector<4x8xf32>,
    %257 = vector.extract_strided_slice %241 {offsets = [0, 5, 0], sizes = [4, 1, 8], strides = [1, 1, 1]} : vector<4x8x8xf32> to vector<4x1x8xf32>
    %258 = vector.shape_cast %257 : vector<4x1x8xf32> to vector<4x8xf32>
    %c0_127 = arith.constant 0 : index
    %c1487 = arith.constant 1487 : index
    %259 = vector.load %arg7[%c0_127, %c1487] : memref<4x1764xf32, #tpu.memory_space<vmem>>, vector<4x8xf32>
    tpu.vector_store %arg7[%c0_127, %c1487], %258 {strides = array<i32>} : memref<4x1764xf32, #tpu.memory_space<vmem>>, vector<4x8xf32>,
    %260 = vector.extract_strided_slice %241 {offsets = [0, 6, 0], sizes = [4, 1, 8], strides = [1, 1, 1]} : vector<4x8x8xf32> to vector<4x1x8xf32>
    %261 = vector.shape_cast %260 : vector<4x1x8xf32> to vector<4x8xf32>
    %c0_128 = arith.constant 0 : index
    %c1501 = arith.constant 1501 : index
    %262 = vector.load %arg7[%c0_128, %c1501] : memref<4x1764xf32, #tpu.memory_space<vmem>>, vector<4x8xf32>
    tpu.vector_store %arg7[%c0_128, %c1501], %261 {strides = array<i32>} : memref<4x1764xf32, #tpu.memory_space<vmem>>, vector<4x8xf32>,
    %263 = vector.extract_strided_slice %241 {offsets = [0, 7, 0], sizes = [4, 1, 8], strides = [1, 1, 1]} : vector<4x8x8xf32> to vector<4x1x8xf32>
    %264 = vector.shape_cast %263 : vector<4x1x8xf32> to vector<4x8xf32>
    %c0_129 = arith.constant 0 : index
    %c1515 = arith.constant 1515 : index
    %265 = vector.load %arg7[%c0_129, %c1515] : memref<4x1764xf32, #tpu.memory_space<vmem>>, vector<4x8xf32>
    tpu.vector_store %arg7[%c0_129, %c1515], %264 {strides = array<i32>} : memref<4x1764xf32, #tpu.memory_space<vmem>>, vector<4x8xf32>,
    %c0_130 = arith.constant 0 : index
    %c0_131 = arith.constant 0 : index
    %266 = vector.load %arg7[%c0_130, %c0_131] : memref<4x1764xf32, #tpu.memory_space<vmem>>, vector<4x1176xf32>
    %c0_132 = arith.constant 0 : index
    %c0_133 = arith.constant 0 : index
    %267 = vector.load %arg8[%c0_132, %c0_133] : memref<108x1176xf32, #tpu.memory_space<vmem>>, vector<4x1176xf32>
    tpu.vector_store %arg8[%c0_132, %c0_133], %266 {strides = array<i32>} : memref<108x1176xf32, #tpu.memory_space<vmem>>, vector<4x1176xf32>,
    %c0_134 = arith.constant 0 : index
    %c1_135 = arith.constant 1 : index
    %268 = vector.load %arg7[%c0_134, %c1_135] : memref<4x1764xf32, #tpu.memory_space<vmem>>, vector<4x1176xf32>
    %c4_136 = arith.constant 4 : index
    %c0_137 = arith.constant 0 : index
    %269 = vector.load %arg8[%c4_136, %c0_137] : memref<108x1176xf32, #tpu.memory_space<vmem>>, vector<4x1176xf32>
    tpu.vector_store %arg8[%c4_136, %c0_137], %268 {strides = array<i32>} : memref<108x1176xf32, #tpu.memory_space<vmem>>, vector<4x1176xf32>,
    %c0_138 = arith.constant 0 : index
    %c2_139 = arith.constant 2 : index
    %270 = vector.load %arg7[%c0_138, %c2_139] : memref<4x1764xf32, #tpu.memory_space<vmem>>, vector<4x1176xf32>
    %c8 = arith.constant 8 : index
    %c0_140 = arith.constant 0 : index
    %271 = vector.load %arg8[%c8, %c0_140] : memref<108x1176xf32, #tpu.memory_space<vmem>>, vector<4x1176xf32>
    tpu.vector_store %arg8[%c8, %c0_140], %270 {strides = array<i32>} : memref<108x1176xf32, #tpu.memory_space<vmem>>, vector<4x1176xf32>,
    %c0_141 = arith.constant 0 : index
    %c14 = arith.constant 14 : index
    %272 = vector.load %arg7[%c0_141, %c14] : memref<4x1764xf32, #tpu.memory_space<vmem>>, vector<4x1176xf32>
    %c12 = arith.constant 12 : index
    %c0_142 = arith.constant 0 : index
    %273 = vector.load %arg8[%c12, %c0_142] : memref<108x1176xf32, #tpu.memory_space<vmem>>, vector<4x1176xf32>
    tpu.vector_store %arg8[%c12, %c0_142], %272 {strides = array<i32>} : memref<108x1176xf32, #tpu.memory_space<vmem>>, vector<4x1176xf32>,
    %c0_143 = arith.constant 0 : index
    %c15 = arith.constant 15 : index
    %274 = vector.load %arg7[%c0_143, %c15] : memref<4x1764xf32, #tpu.memory_space<vmem>>, vector<4x1176xf32>
    %c16 = arith.constant 16 : index
    %c0_144 = arith.constant 0 : index
    %275 = vector.load %arg8[%c16, %c0_144] : memref<108x1176xf32, #tpu.memory_space<vmem>>, vector<4x1176xf32>
    tpu.vector_store %arg8[%c16, %c0_144], %274 {strides = array<i32>} : memref<108x1176xf32, #tpu.memory_space<vmem>>, vector<4x1176xf32>,
    %c0_145 = arith.constant 0 : index
    %c16_146 = arith.constant 16 : index
    %276 = vector.load %arg7[%c0_145, %c16_146] : memref<4x1764xf32, #tpu.memory_space<vmem>>, vector<4x1176xf32>
    %c20 = arith.constant 20 : index
    %c0_147 = arith.constant 0 : index
    %277 = vector.load %arg8[%c20, %c0_147] : memref<108x1176xf32, #tpu.memory_space<vmem>>, vector<4x1176xf32>
    tpu.vector_store %arg8[%c20, %c0_147], %276 {strides = array<i32>} : memref<108x1176xf32, #tpu.memory_space<vmem>>, vector<4x1176xf32>,
    %c0_148 = arith.constant 0 : index
    %c28 = arith.constant 28 : index
    %278 = vector.load %arg7[%c0_148, %c28] : memref<4x1764xf32, #tpu.memory_space<vmem>>, vector<4x1176xf32>
    %c24 = arith.constant 24 : index
    %c0_149 = arith.constant 0 : index
    %279 = vector.load %arg8[%c24, %c0_149] : memref<108x1176xf32, #tpu.memory_space<vmem>>, vector<4x1176xf32>
    tpu.vector_store %arg8[%c24, %c0_149], %278 {strides = array<i32>} : memref<108x1176xf32, #tpu.memory_space<vmem>>, vector<4x1176xf32>,
    %c0_150 = arith.constant 0 : index
    %c29 = arith.constant 29 : index
    %280 = vector.load %arg7[%c0_150, %c29] : memref<4x1764xf32, #tpu.memory_space<vmem>>, vector<4x1176xf32>
    %c28_151 = arith.constant 28 : index
    %c0_152 = arith.constant 0 : index
    %281 = vector.load %arg8[%c28_151, %c0_152] : memref<108x1176xf32, #tpu.memory_space<vmem>>, vector<4x1176xf32>
    tpu.vector_store %arg8[%c28_151, %c0_152], %280 {strides = array<i32>} : memref<108x1176xf32, #tpu.memory_space<vmem>>, vector<4x1176xf32>,
    %c0_153 = arith.constant 0 : index
    %c30 = arith.constant 30 : index
    %282 = vector.load %arg7[%c0_153, %c30] : memref<4x1764xf32, #tpu.memory_space<vmem>>, vector<4x1176xf32>
    %c32 = arith.constant 32 : index
    %c0_154 = arith.constant 0 : index
    %283 = vector.load %arg8[%c32, %c0_154] : memref<108x1176xf32, #tpu.memory_space<vmem>>, vector<4x1176xf32>
    tpu.vector_store %arg8[%c32, %c0_154], %282 {strides = array<i32>} : memref<108x1176xf32, #tpu.memory_space<vmem>>, vector<4x1176xf32>,
    %c0_155 = arith.constant 0 : index
    %c196 = arith.constant 196 : index
    %284 = vector.load %arg7[%c0_155, %c196] : memref<4x1764xf32, #tpu.memory_space<vmem>>, vector<4x1176xf32>
    %c36 = arith.constant 36 : index
    %c0_156 = arith.constant 0 : index
    %285 = vector.load %arg8[%c36, %c0_156] : memref<108x1176xf32, #tpu.memory_space<vmem>>, vector<4x1176xf32>
    tpu.vector_store %arg8[%c36, %c0_156], %284 {strides = array<i32>} : memref<108x1176xf32, #tpu.memory_space<vmem>>, vector<4x1176xf32>,
    %c0_157 = arith.constant 0 : index
    %c197 = arith.constant 197 : index
    %286 = vector.load %arg7[%c0_157, %c197] : memref<4x1764xf32, #tpu.memory_space<vmem>>, vector<4x1176xf32>
    %c40 = arith.constant 40 : index
    %c0_158 = arith.constant 0 : index
    %287 = vector.load %arg8[%c40, %c0_158] : memref<108x1176xf32, #tpu.memory_space<vmem>>, vector<4x1176xf32>
    tpu.vector_store %arg8[%c40, %c0_158], %286 {strides = array<i32>} : memref<108x1176xf32, #tpu.memory_space<vmem>>, vector<4x1176xf32>,
    %c0_159 = arith.constant 0 : index
    %c198 = arith.constant 198 : index
    %288 = vector.load %arg7[%c0_159, %c198] : memref<4x1764xf32, #tpu.memory_space<vmem>>, vector<4x1176xf32>
    %c44 = arith.constant 44 : index
    %c0_160 = arith.constant 0 : index
    %289 = vector.load %arg8[%c44, %c0_160] : memref<108x1176xf32, #tpu.memory_space<vmem>>, vector<4x1176xf32>
    tpu.vector_store %arg8[%c44, %c0_160], %288 {strides = array<i32>} : memref<108x1176xf32, #tpu.memory_space<vmem>>, vector<4x1176xf32>,
    %c0_161 = arith.constant 0 : index
    %c210 = arith.constant 210 : index
    %290 = vector.load %arg7[%c0_161, %c210] : memref<4x1764xf32, #tpu.memory_space<vmem>>, vector<4x1176xf32>
    %c48 = arith.constant 48 : index
    %c0_162 = arith.constant 0 : index
    %291 = vector.load %arg8[%c48, %c0_162] : memref<108x1176xf32, #tpu.memory_space<vmem>>, vector<4x1176xf32>
    tpu.vector_store %arg8[%c48, %c0_162], %290 {strides = array<i32>} : memref<108x1176xf32, #tpu.memory_space<vmem>>, vector<4x1176xf32>,
    %c0_163 = arith.constant 0 : index
    %c211 = arith.constant 211 : index
    %292 = vector.load %arg7[%c0_163, %c211] : memref<4x1764xf32, #tpu.memory_space<vmem>>, vector<4x1176xf32>
    %c52 = arith.constant 52 : index
    %c0_164 = arith.constant 0 : index
    %293 = vector.load %arg8[%c52, %c0_164] : memref<108x1176xf32, #tpu.memory_space<vmem>>, vector<4x1176xf32>
    tpu.vector_store %arg8[%c52, %c0_164], %292 {strides = array<i32>} : memref<108x1176xf32, #tpu.memory_space<vmem>>, vector<4x1176xf32>,
    %c0_165 = arith.constant 0 : index
    %c212 = arith.constant 212 : index
    %294 = vector.load %arg7[%c0_165, %c212] : memref<4x1764xf32, #tpu.memory_space<vmem>>, vector<4x1176xf32>
    %c56 = arith.constant 56 : index
    %c0_166 = arith.constant 0 : index
    %295 = vector.load %arg8[%c56, %c0_166] : memref<108x1176xf32, #tpu.memory_space<vmem>>, vector<4x1176xf32>
    tpu.vector_store %arg8[%c56, %c0_166], %294 {strides = array<i32>} : memref<108x1176xf32, #tpu.memory_space<vmem>>, vector<4x1176xf32>,
    %c0_167 = arith.constant 0 : index
    %c224 = arith.constant 224 : index
    %296 = vector.load %arg7[%c0_167, %c224] : memref<4x1764xf32, #tpu.memory_space<vmem>>, vector<4x1176xf32>
    %c60 = arith.constant 60 : index
    %c0_168 = arith.constant 0 : index
    %297 = vector.load %arg8[%c60, %c0_168] : memref<108x1176xf32, #tpu.memory_space<vmem>>, vector<4x1176xf32>
    tpu.vector_store %arg8[%c60, %c0_168], %296 {strides = array<i32>} : memref<108x1176xf32, #tpu.memory_space<vmem>>, vector<4x1176xf32>,
    %c0_169 = arith.constant 0 : index
    %c225 = arith.constant 225 : index
    %298 = vector.load %arg7[%c0_169, %c225] : memref<4x1764xf32, #tpu.memory_space<vmem>>, vector<4x1176xf32>
    %c64 = arith.constant 64 : index
    %c0_170 = arith.constant 0 : index
    %299 = vector.load %arg8[%c64, %c0_170] : memref<108x1176xf32, #tpu.memory_space<vmem>>, vector<4x1176xf32>
    tpu.vector_store %arg8[%c64, %c0_170], %298 {strides = array<i32>} : memref<108x1176xf32, #tpu.memory_space<vmem>>, vector<4x1176xf32>,
    %c0_171 = arith.constant 0 : index
    %c226 = arith.constant 226 : index
    %300 = vector.load %arg7[%c0_171, %c226] : memref<4x1764xf32, #tpu.memory_space<vmem>>, vector<4x1176xf32>
    %c68 = arith.constant 68 : index
    %c0_172 = arith.constant 0 : index
    %301 = vector.load %arg8[%c68, %c0_172] : memref<108x1176xf32, #tpu.memory_space<vmem>>, vector<4x1176xf32>
    tpu.vector_store %arg8[%c68, %c0_172], %300 {strides = array<i32>} : memref<108x1176xf32, #tpu.memory_space<vmem>>, vector<4x1176xf32>,
    %c0_173 = arith.constant 0 : index
    %c392 = arith.constant 392 : index
    %302 = vector.load %arg7[%c0_173, %c392] : memref<4x1764xf32, #tpu.memory_space<vmem>>, vector<4x1176xf32>
    %c72 = arith.constant 72 : index
    %c0_174 = arith.constant 0 : index
    %303 = vector.load %arg8[%c72, %c0_174] : memref<108x1176xf32, #tpu.memory_space<vmem>>, vector<4x1176xf32>
    tpu.vector_store %arg8[%c72, %c0_174], %302 {strides = array<i32>} : memref<108x1176xf32, #tpu.memory_space<vmem>>, vector<4x1176xf32>,
    %c0_175 = arith.constant 0 : index
    %c393 = arith.constant 393 : index
    %304 = vector.load %arg7[%c0_175, %c393] : memref<4x1764xf32, #tpu.memory_space<vmem>>, vector<4x1176xf32>
    %c76 = arith.constant 76 : index
    %c0_176 = arith.constant 0 : index
    %305 = vector.load %arg8[%c76, %c0_176] : memref<108x1176xf32, #tpu.memory_space<vmem>>, vector<4x1176xf32>
    tpu.vector_store %arg8[%c76, %c0_176], %304 {strides = array<i32>} : memref<108x1176xf32, #tpu.memory_space<vmem>>, vector<4x1176xf32>,
    %c0_177 = arith.constant 0 : index
    %c394 = arith.constant 394 : index
    %306 = vector.load %arg7[%c0_177, %c394] : memref<4x1764xf32, #tpu.memory_space<vmem>>, vector<4x1176xf32>
    %c80 = arith.constant 80 : index
    %c0_178 = arith.constant 0 : index
    %307 = vector.load %arg8[%c80, %c0_178] : memref<108x1176xf32, #tpu.memory_space<vmem>>, vector<4x1176xf32>
    tpu.vector_store %arg8[%c80, %c0_178], %306 {strides = array<i32>} : memref<108x1176xf32, #tpu.memory_space<vmem>>, vector<4x1176xf32>,
    %c0_179 = arith.constant 0 : index
    %c406 = arith.constant 406 : index
    %308 = vector.load %arg7[%c0_179, %c406] : memref<4x1764xf32, #tpu.memory_space<vmem>>, vector<4x1176xf32>
    %c84 = arith.constant 84 : index
    %c0_180 = arith.constant 0 : index
    %309 = vector.load %arg8[%c84, %c0_180] : memref<108x1176xf32, #tpu.memory_space<vmem>>, vector<4x1176xf32>
    tpu.vector_store %arg8[%c84, %c0_180], %308 {strides = array<i32>} : memref<108x1176xf32, #tpu.memory_space<vmem>>, vector<4x1176xf32>,
    %c0_181 = arith.constant 0 : index
    %c407 = arith.constant 407 : index
    %310 = vector.load %arg7[%c0_181, %c407] : memref<4x1764xf32, #tpu.memory_space<vmem>>, vector<4x1176xf32>
    %c88 = arith.constant 88 : index
    %c0_182 = arith.constant 0 : index
    %311 = vector.load %arg8[%c88, %c0_182] : memref<108x1176xf32, #tpu.memory_space<vmem>>, vector<4x1176xf32>
    tpu.vector_store %arg8[%c88, %c0_182], %310 {strides = array<i32>} : memref<108x1176xf32, #tpu.memory_space<vmem>>, vector<4x1176xf32>,
    %c0_183 = arith.constant 0 : index
    %c408 = arith.constant 408 : index
    %312 = vector.load %arg7[%c0_183, %c408] : memref<4x1764xf32, #tpu.memory_space<vmem>>, vector<4x1176xf32>
    %c92 = arith.constant 92 : index
    %c0_184 = arith.constant 0 : index
    %313 = vector.load %arg8[%c92, %c0_184] : memref<108x1176xf32, #tpu.memory_space<vmem>>, vector<4x1176xf32>
    tpu.vector_store %arg8[%c92, %c0_184], %312 {strides = array<i32>} : memref<108x1176xf32, #tpu.memory_space<vmem>>, vector<4x1176xf32>,
    %c0_185 = arith.constant 0 : index
    %c420 = arith.constant 420 : index
    %314 = vector.load %arg7[%c0_185, %c420] : memref<4x1764xf32, #tpu.memory_space<vmem>>, vector<4x1176xf32>
    %c96 = arith.constant 96 : index
    %c0_186 = arith.constant 0 : index
    %315 = vector.load %arg8[%c96, %c0_186] : memref<108x1176xf32, #tpu.memory_space<vmem>>, vector<4x1176xf32>
    tpu.vector_store %arg8[%c96, %c0_186], %314 {strides = array<i32>} : memref<108x1176xf32, #tpu.memory_space<vmem>>, vector<4x1176xf32>,
    %c0_187 = arith.constant 0 : index
    %c421 = arith.constant 421 : index
    %316 = vector.load %arg7[%c0_187, %c421] : memref<4x1764xf32, #tpu.memory_space<vmem>>, vector<4x1176xf32>
    %c100 = arith.constant 100 : index
    %c0_188 = arith.constant 0 : index
    %317 = vector.load %arg8[%c100, %c0_188] : memref<108x1176xf32, #tpu.memory_space<vmem>>, vector<4x1176xf32>
    tpu.vector_store %arg8[%c100, %c0_188], %316 {strides = array<i32>} : memref<108x1176xf32, #tpu.memory_space<vmem>>, vector<4x1176xf32>,
    %c0_189 = arith.constant 0 : index
    %c422 = arith.constant 422 : index
    %318 = vector.load %arg7[%c0_189, %c422] : memref<4x1764xf32, #tpu.memory_space<vmem>>, vector<4x1176xf32>
    %c104 = arith.constant 104 : index
    %c0_190 = arith.constant 0 : index
    %319 = vector.load %arg8[%c104, %c0_190] : memref<108x1176xf32, #tpu.memory_space<vmem>>, vector<4x1176xf32>
    tpu.vector_store %arg8[%c104, %c0_190], %318 {strides = array<i32>} : memref<108x1176xf32, #tpu.memory_space<vmem>>, vector<4x1176xf32>,
    %c0_191 = arith.constant 0 : index
    %c0_192 = arith.constant 0 : index
    %320 = vector.load %arg4[%c0_191, %c0_192] : memref<8x108xf32, #tpu.memory_space<vmem>>, vector<8x108xf32>
    %c0_193 = arith.constant 0 : index
    %c0_194 = arith.constant 0 : index
    %321 = vector.load %arg8[%c0_193, %c0_194] : memref<108x1176xf32, #tpu.memory_space<vmem>>, vector<108x1176xf32>
    %cst_195 = arith.constant dense<0.000000e+00> : vector<8x1176xf32>
    %322 = tpu.matmul %320, %321, %cst_195 {dimension_numbers = #tpu.dot_dimension_numbers<[1], [0], [0], [1], [0, 0, 1, 1], [], []>} : vector<8x108xf32>, vector<108x1176xf32>, vector<8x1176xf32> -> vector<8x1176xf32>
    %c0_196 = arith.constant 0 : index
    %c0_197 = arith.constant 0 : index
    %323 = vector.load %arg5[%c0_196, %c0_197] : memref<8x1xf32, #tpu.memory_space<vmem>>, vector<8x1xf32>
    %324 = vector.broadcast %323 : vector<8x1xf32> to vector<8x1176xf32>
    %325 = arith.addf %322, %324 : vector<8x1176xf32>
    %c0_198 = arith.constant 0 : index
    %c0_199 = arith.constant 0 : index
    %c0_200 = arith.constant 0 : index
    %c0_201 = arith.constant 0 : index
    %326 = vector.load %arg6[%c0_198, %c0_199, %c0_200, %c0_201] : memref<1x1x8x1176xf32, #tpu.memory_space<vmem>>, vector<1x1x8x1176xf32>
    %327 = vector.shape_cast %326 : vector<1x1x8x1176xf32> to vector<8x1176xf32>
    %328 = vector.shape_cast %325 : vector<8x1176xf32> to vector<1x1x8x1176xf32>
    tpu.vector_store %arg6[%c0_198, %c0_199, %c0_200, %c0_201], %328 {strides = array<i32>} : memref<1x1x8x1176xf32, #tpu.memory_space<vmem>>, vector<1x1x8x1176xf32>,
    return
  }
  func.func @transform_0(%arg0: i32, %arg1: i32) -> (i32, i32, i32, i32, i32) {
    %c1_i32 = arith.constant 1 : i32
    %0 = arith.subi %arg1, %c1_i32 : i32
    %c0_i32 = arith.constant 0 : i32
    %c1_i32_0 = arith.constant 1 : i32
    %1 = arith.maxsi %c0_i32, %0 : i32
    %2 = arith.minsi %c1_i32_0, %1 : i32
    %c0_i32_1 = arith.constant 0 : i32
    %c0_i32_2 = arith.constant 0 : i32
    %c0_i32_3 = arith.constant 0 : i32
    %c0_i32_4 = arith.constant 0 : i32
    return %arg0, %2, %c0_i32_1, %c0_i32_2, %c0_i32_3 : i32, i32, i32, i32, i32
  }
  func.func @transform_1(%arg0: i32, %arg1: i32) -> (i32, i32, i32, i32, i32) {
    %c1_i32 = arith.constant 1 : i32
    %0 = arith.minsi %arg1, %c1_i32 : i32
    %c0_i32 = arith.constant 0 : i32
    %c0_i32_0 = arith.constant 0 : i32
    %c0_i32_1 = arith.constant 0 : i32
    %c0_i32_2 = arith.constant 0 : i32
    return %arg0, %0, %c0_i32, %c0_i32_0, %c0_i32_1 : i32, i32, i32, i32, i32
  }
  func.func @transform_2(%arg0: i32, %arg1: i32) -> (i32, i32) {
    %c0_i32 = arith.constant 0 : i32
    %c0_i32_0 = arith.constant 0 : i32
    %c0_i32_1 = arith.constant 0 : i32
    return %c0_i32, %c0_i32_0 : i32, i32
  }
  func.func @transform_3(%arg0: i32, %arg1: i32) -> (i32, i32) {
    %c0_i32 = arith.constant 0 : i32
    %c0_i32_0 = arith.constant 0 : i32
    %c0_i32_1 = arith.constant 0 : i32
    return %c0_i32, %c0_i32_0 : i32, i32
  }
  func.func @transform_4(%arg0: i32, %arg1: i32) -> (i32, i32, i32, i32) {
    %c0_i32 = arith.constant 0 : i32
    %c0_i32_0 = arith.constant 0 : i32
    %c0_i32_1 = arith.constant 0 : i32
    return %arg0, %arg1, %c0_i32, %c0_i32_0 : i32, i32, i32, i32
  }
}

</mosaic_0001>

<bundles_post_ra>
// kernel: tpu_custom_call.1
= control target key start
LH: loop header
LB: loop body
LE: loop exit
PB: predicated region body
PF: predicated region fallthrough
CT: control target
= control target key end

     0   :  { %s7084_s0 = inlined_call_operand.hbm [shape: f32[2,8,4,8,8], index: 0, kind: input, shape index: {}]   ;;  %s7085_s1 = inlined_call_operand.hbm [shape: f32[2,8,4,8,8], index: 1, kind: input, shape index: {}]   ;;  %s7086_s2 = inlined_call_operand.vmem [shape: f32[8,108], index: 2, kind: input, shape index: {}]   ;;  %s7087_s3 = inlined_call_operand.vmem [shape: f32[8,1], index: 3, kind: input, shape index: {}]   ;;  %s7088_s4 = inlined_call_operand.hbm [shape: f32[2,2,8,1176], index: 4, kind: output, shape index: {}]  }
   0x1   :  { %7114 = sst [smem:[#allocation22_spill]] %s7086_s2 }
   0x2   :  { %7115 = sst [smem:[#allocation23_spill]] %s7087_s3 }
   0x3   :  { %7116 = sst [smem:[#allocation24_spill]] %s7088_s4 }
   0x4   :  { %9 = vsyncpa [#allocation5], 0 }
   0x5   :  { %11 = vsyncpa [#allocation5 + $0x1], 0 }
   0x6   :  { %12 = vsyncpa [#allocation8], 0 }
   0x7   :  { %14 = vsyncpa [#allocation8 + $0x1], 0 }
   0x8   :  { %15 = vsyncpa [#allocation6], 0 }
   0x9   :  { %17 = vsyncpa [#allocation6 + $0x1], 0  ;;  %s4757_s15 = smov 0   ;;  %s4759_s16 = smov 0  }
   0xa   :  { %s4761_s17 = smov 0   ;;  %s4763_s18 = smov 0  }
   0xb   :  { %s4765_s19 = smov 0   ;;  %s4767_s20 = smov 0  }
   0xc   :  { %s4769_s21 = smov 0   ;;  %s4771_s22 = smov 0  }
   0xd   :  { %s4773_s23 = smov 0   ;;  %s4775_s24 = smov 0  }
   0xe   :  { %s4777_s25 = smov 0   ;;  %s4779_s26 = smov 0  }
   0xf   :  { %s4781_s27 = smov 0   ;;  %s4783_s28 = smov 0  }
  0x10 LB: > { %7117 = sst [smem:[#allocation13_spill]] %s4600_s17  ;;  %s7089_s29 = sadd.s32 4294967295, %s4644_s28   ;;  %s4644_s28 = sphi %s4783_s28, %s23_s28   ;;  %s4640_s27 = sphi %s4781_s27, %s7237_s27   ;;  %s4636_s26 = sphi %s4779_s26, %s7236_s26   ;;  %s4632_s25 = sphi %s4777_s25, %s7235_s25   ;;  %s4628_s24 = sphi %s4775_s24, %s7234_s24   ;;  %s4624_s23 = sphi %s4773_s23, %s7233_s23   ;;  %s4620_s22 = sphi %s4771_s22, %s7232_s22   ;;  %s4616_s21 = sphi %s4769_s21, %s7231_s21   ;;  %s4612_s20 = sphi %s4767_s20, %s7230_s20   ;;  %s4608_s19 = sphi %s4765_s19, %s7229_s19   ;;  %s4604_s18 = sphi %s4763_s18, %s7228_s18   ;;  %s4600_s17 = sphi %s4761_s17, %s7219_s17   ;;  %s4596_s16 = sphi %s4759_s16, %s7227_s16   ;;  %s4592_s15 = sphi %s4757_s15, %s7226_s15  }
  0x11   : > { %7118 = sst [smem:[#allocation14_spill]] %s4628_s24  ;;  %s32_s5 = sadd.s32 1, %s4636_s26 }
  0x12   : > { %7119 = sst [smem:[#allocation15_spill]] %s4632_s25  ;;  %s35_s6 = sadd.s32 1, %s4640_s27 }
  0x13   : > { %7120 = sst [smem:[#allocation16_spill]] %s4636_s26  ;;  %p33_p0 = scmp.ge.s32.totalorder %s32_s5, 2 }
  0x14   : > { %s54_s8 = sadd.s32 1, %s4624_s23  ;;  %p61_p2 = scmp.ne.s32.totalorder %s4624_s23, %s4620_s22 }
  0x15   : > { %s7239_s5 = smov (%p33_p0, %s32_s5), 0  ;;  %s7241_s6 = smov (!%p33_p0, %s35_s6), %s4640_s27 }
  0x16   : > { %7121 = sst [smem:[#allocation17_spill]] %s7239_s5  ;;  %p37_p1 = scmp.ge.s32.totalorder %s7241_s6, 2 }
  0x17   : > { %p62_p3 = scmp.eq.s32.totalorder %s4644_s28, 0  ;;  %p67_p5 = scmp.ne.s32.totalorder %s4620_s22, %s4616_s21 }
  0x18   : > { %s7243_s6 = smov (%p37_p1, %s7241_s6), 0  ;;  %p68_p6 = scmp.eq.s32.totalorder %s7089_s29, 0 }
  0x19   : > { %7122 = sst [smem:[#allocation18_spill]] %s7243_s6  ;;  %s49_s7 = ssub.s32 %s4640_s27, %s7243_s6 }
  0x1a   : > { %p4842_p4 = por %p62_p3, %p61_p2  ;;  %p77_p7 = scmp.lt.s32.totalorder %s4636_s26, 1 }
  0x1b   : > { %p52_p8 = scmp.eq.s32.totalorder %s49_s7, 0  ;;  %p4850_p9 = por %p68_p6, %p67_p5 }
  0x1c   : > { %s4855_s11 = scalar_select %p77_p7, %s4636_s26, 1 }
  0x1d   : > { %s4858_s12 = scalar_select %p52_p8, %s4624_s23, %s54_s8  }
  0x1e   : > { %p79_p10 = scmp.lt.s32.totalorder %s7239_s5, 1  ;;  %s86_s13 = sadd.s32 1, %s4612_s20 }
  0x1f   : > { %7125 = sst [smem:[#allocation19_spill]] %s4858_s12  ;;  %p93_p11 = scmp.ne.s32.totalorder %s4612_s20, %s4608_s19 }
  0x20   : > { %p99_p12 = scmp.ne.s32.totalorder %s4608_s19, %s4604_s18  ;;  %s152_s29 = ssub.s32 %s4636_s26, %s7239_s5 }
  0x21   : > { %s80_s14 = scalar_select %p79_p10, %s7239_s5, 1 }
  0x22   : > { %p4869_p13 = por %p93_p11, %p62_p3  ;;  %p4873_p0 = por %p99_p12, %p68_p6 }
  0x23   : > { %s82_s8 = ssub.s32 %s4855_s11, %s80_s14  ;;  %s153_s12 = sor.u32 %s152_s29, %s49_s7 }
  0x24   : > { %s83_s6 = sor.u32 %s82_s8, %s49_s7  ;;  %p154_p2 = scmp.eq.s32.totalorder %s153_s12, 0 }
  0x25   : > { %p84_p1 = scmp.eq.s32.totalorder %s83_s6, 0  ;;  %s156_s4 = sadd.s32 1, %s4600_s17 }
  0x26   : > { %p166_p5 = scmp.ne.s32.totalorder %s4600_s17, %s4596_s16  ;;  %s7130_s3 = sadd.s32 4294967295, %s4644_s28  }
  0x27   : > { %s4884_s18 = scalar_select %p84_p1, %s4612_s20, %s86_s13  }
  0x28   : > { %s4887_s25 = scalar_select %p154_p2, %s4600_s17, %s156_s4  }
  0x29   : > { %7128 = sst [smem:[#allocation20_spill]] %s4884_s18  ;;  %p167_p3 = scmp.eq.s32.totalorder %s7130_s3, 3 }
  0x2a   : > { %7129 = sst [smem:[#allocation21_spill]] %s4887_s25  ;;  %p172_p7 = scmp.ne.s32.totalorder %s4596_s16, %s4592_s15 }
  0x2b   : > { %s7131_s2 = sadd.s32 4294967294, %s4644_s28   ;;  %p4895_p8 = por %p167_p3, %p166_p5 }
  0x2c   : > { %p173_p6 = scmp.eq.s32.totalorder %s7131_s2, 3  ;;  %p3874_p11 = scmp.ge.s32.totalorder %s4644_s28, 4 }
  0x2e   : > { %p4899_p10 = por %p173_p6, %p172_p7  ;;  %195 = sbr.rel (%p3874_p11) target bundleno = 112 (0x70), region = 24 }
  0x30   : > { %s7133_s14 = scalar_select %p4899_p10, 1, 0 }
  0x33   : > { %198 = sbr.rel (!%p4842_p4) target bundleno = 76 (0x4c), region = 28  ;;  %s199_s3 = sand.u32 (%p4842_p4), 1, %s4624_s23  }
  0x34   : > { %s3968_s4 = smul.u32 (%p4842_p4), 192, %s199_s3  ;;  %s4907_s29 = scalar_lea.sflag (%p4842_p4), [#allocation5], %s199_s3 }
  0x35   : > { %s4587_s7 = sshll.u32 (%p4842_p4), %s4640_s27, 12  ;;  %s4445_s9 = scalar_lea.hbm (%p4842_p4), %s7084_s0, 8192 }
  0x36   : > { %s203_s2 = scalar_lea.vmem (%p4842_p4), [#allocation4], %s3968_s4  ;;  %s223_s8 = scalar_lea.hbm (%p4842_p4), %s7084_s0, %s4587_s7 }
  0x37   : > { %s226_s6 = sshll.u32 (%p4842_p4), %s203_s2, 4  ;;  %s4441_s5 = scalar_lea.hbm (%p4842_p4), %s223_s8, 3072  ;;  %s227_s6 = int_to_ptr.vmem [resolvable:$true] %s226_s6 }
  0x38   : > { %p4442_p12 = scmp.ne.s32.totalorder %s223_s8, %s4441_s5  ;;  %p4446_p4 = scmp.lt.s32.totalorder %s223_s8, %s7084_s0 }
  0x39   : > { %p4447_p1 = scmp.lt.s32.totalorder %s4445_s9, %s4441_s5 }
  0x3b   : > { %p4448_p2 = por %p4447_p1, %p4446_p4 }
  0x3d   : > { %p4449_p5 = pnand %p4448_p2, %p4442_p12 }
  0x3f   : > { %4452 = shalt.err (!%p4449_p5)
}
  0x40   : > { %s4453_s3 = scalar_lea.vmem %s227_s6, 3072  ;;  %s4646_s4 = smov [#allocation4]  }
  0x41   : > { %p4454_p3 = scmp.ne.s32.totalorder %s227_s6, %s4453_s3  ;;  %s4457_s2 = sshll.u32 %s4646_s4, 4  ;;  %s4458_s2 = int_to_ptr.vmem [resolvable:$false] %s4457_s2 }
  0x42   : > { %s4459_s7 = scalar_lea.vmem %s4458_s2, 6144  ;;  %p4460_p7 = scmp.lt.s32.totalorder %s227_s6, %s4458_s2 }
  0x43   : > { %p4461_p6 = scmp.lt.s32.totalorder %s4459_s7, %s4453_s3 }
  0x45   : > { %p4462_p11 = por %p4461_p6, %p4460_p7 }
  0x47   : > { %p4463_p10 = pnand %p4462_p11, %p4454_p3 }
  0x49   : > { %4466 = shalt.err (!%p4463_p10)
}
  0x4a   : > { %s4647_s26 = smov 128   ;;  %s4648_s18 = smov 8  }
  0x4b   : > { %232 = dma.hbm_to_vmem [thread:$0]  %s223_s8, 3072, %s227_s6, %s4907_s29, %s4647_s26, %s4647_s26, %s4648_s18  }
  0x4c PF: > { %235 = sbr.rel (!%p4869_p13) target bundleno = 112 (0x70), region = 32  ;;  %s236_s17 = sand.u32 (%p4869_p13), 1, %s4612_s20  }
  0x4d   : > { %s243_s25 = smul.u32 (%p4869_p13), 6, %s4855_s11  ;;  %s4927_s3 = scalar_lea.sflag (%p4869_p13), [#allocation8], %s236_s17 }
  0x4e   : > { %s3969_s5 = smul.u32 (%p4869_p13), 192, %s236_s17 }
  0x4f   : > { %s244_s12 = ssub.s32 (%p4869_p13), 8, %s243_s25 }
  0x50   : > { %p245_p12 = scmp.lt.s32.totalorder (%p4869_p13), %s244_s12, 6  ;;  %s240_s29 = scalar_lea.vmem (%p4869_p13), [#allocation7], %s3969_s5 }
  0x52   : > { %s7245_s12 = smov (!%p245_p12, %s244_s12), 6 }
  0x53   : > { %s4924_s13 = sshll.u32 %s7245_s12, 9 }
  0x54   : > { %s250_s9 = ssub.s32 3072, %s4924_s13 }
  0x55   : > { %251 = vsyncadd %s4927_s3, %s250_s9  ;;  %p3892_p13 = scmp.ne.s32.totalorder %s4924_s13, 0  ;;  %s3965_s21 = smul.u32 24, %s4855_s11 }
  0x56   : > { %s3894_s6 = sshll.u32 %s4640_s27, 5  ;;  %s260_s8 = sshll.u32 %s240_s29, 4  ;;  %s4933_s8 = int_to_ptr.vmem [resolvable:$true] %s260_s8 }
  0x57   : > { %s255_s4 = sadd.s32 %s3965_s21, %s3894_s6  ;;  %s4471_s5 = scalar_lea.hbm %s7085_s1, 8192 }
  0x58   : > { %s3895_s2 = sshll.u32 %s255_s4, 7 }
  0x59   : > { %s4938_s18 = scalar_lea.hbm %s7085_s1, %s3895_s2 }
  0x5a   : > { %s4467_s17 = scalar_lea.hbm %s4938_s18, %s4924_s13 }
  0x5b   : > { %p4468_p10 = scmp.ne.s32.totalorder %s4938_s18, %s4467_s17  ;;  %p4473_p2 = scmp.lt.s32.totalorder %s4471_s5, %s4467_s17 }
  0x5d   : > { %p4469_p4 = pnand %p4468_p10, %p3892_p13 }
  0x5f   : > { %p4470_p1 = pneg %p4469_p4 }
  0x61   : > { %p4475_p5 = pnand %p4473_p2, %p4470_p1 }
  0x63   : > { %4478 = shalt.err (!%p4475_p5)
}
  0x64   : > { %s4479_s12 = scalar_lea.vmem %s4933_s8, %s4924_s13  ;;  %s4649_s9 = smov [#allocation7]  }
  0x65   : > { %p4480_p3 = scmp.ne.s32.totalorder %s4933_s8, %s4479_s12  ;;  %s4483_s29 = sshll.u32 %s4649_s9, 4  ;;  %s4484_s29 = int_to_ptr.vmem [resolvable:$false] %s4483_s29 }
  0x66   : > { %s4485_s21 = scalar_lea.vmem %s4484_s29, 6144  ;;  %p4486_p11 = scmp.lt.s32.totalorder %s4933_s8, %s4484_s29 }
  0x67   : > { %p4481_p7 = pnand %p4480_p3, %p3892_p13  ;;  %p4487_p12 = scmp.lt.s32.totalorder %s4485_s21, %s4479_s12 }
  0x69   : > { %p4482_p6 = pneg %p4481_p7  ;;  %p4488_p10 = por %p4487_p12, %p4486_p11 }
  0x6b   : > { %p4489_p4 = pnand %p4488_p10, %p4482_p6 }
  0x6d   : > { %4492 = shalt.err (!%p4489_p4)
}
  0x6e   : > { %s4650_s6 = smov 128   ;;  %s4651_s4 = smov 8  }
  0x6f   : > { %266 = dma.hbm_to_vmem [thread:$0]  (%p3892_p13), %s4938_s18, %s4924_s13, %s4933_s8, %s4927_s3, %s4650_s6, %s4650_s6, %s4651_s4  }
  0x70 PF: > { %p3899_p1 = scmp.ge.s32.totalorder %s4644_s28, 1  ;;  %p268_p2 = scmp.lt.s32.totalorder %s4644_s28, 5 }
  0x72   : > { %p269_p5 = pnand %p3899_p1, %p268_p2 }
  0x73   : > { %s274_s2 = sand.u32 (!%p269_p5), 1, %s4620_s22  }
  0x74   : > { %272 = sbr.rel (%p269_p5) target bundleno = 1251 (0x4e3), region = 36  ;;  %s275_s26 = scalar_lea.sflag (!%p269_p5), [#allocation5], %s274_s2 }
  0x75   : > { %s3970_s7 = smul.u32 (!%p269_p5), 192, %s274_s2 }
  0x77   : > { %s4963_s17 = scalar_lea.vmem (!%p269_p5), [#allocation4], %s3970_s7 }
  0x79   : > { %4576 = dma.done.wait (%p4850_p9), %s275_s26, 3072  }
  0x7a   : > { %4578 = vsyncadd (%p4850_p9), %s275_s26, 4294964224  ;;  %s283_s13 = sand.u32 1, %s4608_s19  }
  0x7b   : > { %s3971_s3 = smul.u32 192, %s283_s13  ;;  %s284_s8 = scalar_lea.sflag [#allocation8], %s283_s13 }
  0x7d   : > { %s4970_s18 = scalar_lea.vmem [#allocation7], %s3971_s3 }
  0x7e   : > { %4580 = dma.done.wait (%p4873_p0), %s284_s8, 3072  }
  0x7f   : > { %4582 = vsyncadd (%p4873_p0), %s284_s8, 4294964224  ;;  %s7134_s25 = sld [smem:[#allocation14_spill]]  ;;  %vm369_vm0 = vcmask 1041409   ;;  %vm371_vm1 = vcmask 1045509   ;;  %vm374_vm2 = vcmask 1042434   ;;  %vm376_vm3 = vcmask 1046534  }
  0x80   : > { %vm7098_vm4 = vcmask 1043459   ;;  %vm7097_vm5 = vcmask 1047559   ;;  %s4652_s4 = smov 73   ;;  %s7108_s2 = smov 45   ;;  %vm386_vm6 = vcmask 429416   ;;  %vm400_vm7 = vcmask 544216  }
  0x81   : > { %s4654_s7 = smov 87   ;;  %s7106_s26 = smov 59   ;;  %vm414_vm8 = vcmask 659016   ;;  %vm428_vm9 = vcmask 773816   ;;  %vm446_vm10 = vcmask 888616   ;;  %vm460_vm11 = vcmask 1003416  }
  0x82   : > { %s4658_s30 = smov 27   ;;  %s4664_s3 = smov 55   ;;  %vm537_vm12 = vcmask 1039360   ;;  %vm474_vm13 = vcmask 68616   ;;  %vm540_vm14 = vcmask 1044472   ;;  %vm541_vm15 = vcmask 56324  }
  0x83   : > { %s4665_s8 = smov 41  }
  0x85   : > { %s4977_s11 = smul.u32 6, %s7134_s25 }
  0x87   : > { %s347_s10 = sadd.s32 4294967293, %s4977_s11  ;;  %s490_s5 = sadd.s32 4294967294, %s4977_s11 }
  0x88   : > { %p348_p9 = scmp.ge.s32.totalorder %s347_s10, 0  ;;  %p349_p13 = scmp.lt.s32.totalorder %s347_s10, 8 }
  0x89   : > { %p4981_p7 = scmp.ge.s32.totalorder %s490_s5, 0  ;;  %p4985_p6 = scmp.lt.s32.totalorder %s490_s5, 8 }
  0x8a   : > { %p350_p3 = pnand %p349_p13, %p348_p9  ;;  %s632_s13 = sadd.s32 4294967295, %s4977_s11 }
  0x8b   : > { %p493_p0 = pnand %p4985_p6, %p4981_p7  ;;  %p5076_p10 = scmp.ge.s32.totalorder %s632_s13, 0 }
  0x8c   : > { %s3904_s9 = scalar_select %p350_p3, 0, 1 }
  0x8d   : > { %s3909_s21 = scalar_select %p493_p0, 0, 1 }
  0x8e   : > { %p4180_p11 = scmp.eq.s32.totalorder %s3904_s9, 1  ;;  %p5080_p4 = scmp.lt.s32.totalorder %s632_s13, 8 }
  0x8f   : > { %p4197_p12 = scmp.eq.s32.totalorder %s3909_s21, 1  ;;  %s4656_s10 = smov 127  }
  0x90   : > { %s4181_s29 = scalar_select %p4180_p11, 255, 0 }
  0x91   : > { %s4198_s6 = scalar_select %p4197_p12, 255, 0 }
  0x92   : > { %v4182_v0 = vld [vmem:[%s4963_s17 + $0x60] sm:%s4181_s29]  ;;  %v4185_v1 = vld [vmem:[%s4963_s17 + $0x68] sm:%s4181_s29]  ;;  %p635_p1 = pnand %p5080_p4, %p5076_p10  ;;  %s4657_s5 = smov 113  }
  0x93   : > { %v402_v2 = vrot.slane %v4182_v0, 2  ;;  %v416_v3 = vrot.slane %v4182_v0, 3  ;;  %v388_v4 = vrot.slane %v4182_v0, 1  ;;  %v4995_v5 = vcombine.high %v4182_v0, %v4182_v0  ;;  %v4188_v6 = vld [vmem:[%s4963_s17 + $0x70] sm:%s4181_s29]  ;;  %v5006_v11 = vld [vmem:[%s4963_s17 + $0x78] sm:%s4181_s29]  ;;  %s4659_s9 = smov 13  }
  0x94   : > { %v403_v7 = vrot.slane %v4185_v1, 1  ;;  %v368_v8 = vrot.slane %v4185_v1, 7  ;;  %v417_v9 = vrot.slane %v4185_v1, 2  ;;  %v5003_v10 = vcombine.high %v4185_v1, %v4185_v1  ;;  %v5031_v36 = vld [vmem:[%s4963_s17 + $0x80] sm:%s4198_s6]  ;;  %v5039_v41 = vld [vmem:[%s4963_s17 + $0x88] sm:%s4198_s6]  ;;  %s4660_s29 = smov 115  }
  0x95   : > { %v5008_v12 = vcombine.high %v4188_v6, %v4188_v6  ;;  %v373_v13 = vrot.slane %v4188_v6, 6  ;;  %v420_v14 = vrot.slane %v4188_v6, 1  ;;  %v389_v15 = vsel %vm369_vm0, %v4185_v1, %v388_v4  ;;  %v5048_v46 = vld [vmem:[%s4963_s17 + $0x90] sm:%s4198_s6]  ;;  %v5051_v47 = vld [vmem:[%s4963_s17 + $0x98] sm:%s4198_s6]  ;;  %s5127_s12 = scalar_select %p635_p1, 0, 1 }
  0x96   : > { %v404_v16 = vsel %vm369_vm0, %v403_v7, %v402_v2  ;;  %v408_v17 = vrot.slane %v5006_v11, 7  ;;  %v370_v18 = vsel %vm369_vm0, %v368_v8, %v4182_v0  ;;  %v378_v19 = vrot.slane %v5006_v11, 5  ;;  %s4661_s21 = smov 101   ;;  %p774_p5 = scmp.ge.s32.totalorder %s4977_s11, 0 }
  0x97   : > { %v405_v20 = vsel %vm371_vm1, %v403_v7, %v404_v16  ;;  %v372_v21 = vsel %vm371_vm1, %v368_v8, %v370_v18  ;;  %v418_v22 = vsel %vm369_vm0, %v417_v9, %v416_v3  ;;  %v390_v23 = vsel %vm371_vm1, %v4185_v1, %v389_v15  ;;  %p4244_p2 = scmp.eq.s32.totalorder %s5127_s12, 1  ;;  %p775_p9 = scmp.lt.s32.totalorder %s4977_s11, 8 }
  0x98   : > { %v406_v24 = vsel %vm374_vm2, %v4188_v6, %v405_v20  ;;  %v375_v25 = vsel %vm374_vm2, %v373_v13, %v372_v21  ;;  %v419_v26 = vsel %vm371_vm1, %v417_v9, %v418_v22  ;;  %v391_v27 = vrot.slane %v4188_v6, 7  ;;  %s914_s13 = sadd.s32 1, %s4977_s11 }
  0x99   : > { %v407_v28 = vsel %vm376_vm3, %v4188_v6, %v406_v24  ;;  %v377_v29 = vsel %vm376_vm3, %v373_v13, %v375_v25  ;;  %v421_v30 = vsel %vm374_vm2, %v420_v14, %v419_v26  ;;  %v394_v31 = vrot.slane %v5006_v11, 6  ;;  %s5174_s6 = scalar_select %p4244_p2, 255, 0 }
  0x9a   : > { %v409_v32 = vsel %vm7098_vm4, %v408_v17, %v407_v28  ;;  %v380_v33 = vsel %vm7098_vm4, %v378_v19, %v377_v29  ;;  %v422_v34 = vsel %vm376_vm3, %v420_v14, %v421_v30  ;;  %v392_v35 = vsel %vm374_vm2, %v391_v27, %v390_v23  ;;  %p5203_p13 = pnand %p775_p9, %p774_p5  ;;  %p5290_p7 = scmp.ge.s32.totalorder %s914_s13, 0 }
  0x9b   : > { %v410_v37 = vsel %vm7097_vm5, %v408_v17, %v409_v32  ;;  %v382_v38 = vsel %vm7097_vm5, %v378_v19, %v380_v33  ;;  %v423_v39 = vsel %vm7098_vm4, %v5006_v11, %v422_v34  ;;  %v393_v40 = vsel %vm376_vm3, %v391_v27, %v392_v35  ;;  %p5294_p6 = scmp.lt.s32.totalorder %s914_s13, 8  ;;  %s4674_s13 = smov 9  }
  0x9c   : > { %411 = vrot.lane.b32.xlu1 %v410_v37, %s4652_s4  ;;  %383 = vrot.lane.b32.xlu0 %v382_v38, %s7108_s2  ;;  %v424_v42 = vsel %vm7097_vm5, %v5006_v11, %v423_v39  ;;  %v395_v43 = vsel %vm7098_vm4, %v394_v31, %v393_v40  ;;  %v525_v44 = vrot.slane %v5031_v36, 1  ;;  %v511_v48 = vrot.slane %v5039_v41, 7  ;;  %s4662_s4 = smov 15  }
  0x9d   : > { %v396_v45 = vsel %vm7097_vm5, %v394_v31, %v395_v43  ;;  %v558_v49 = vrot.slane %v5031_v36, 3  ;;  %v528_v51 = vrot.slane %v5048_v46, 7  ;;  %v531_v52 = vrot.slane %v5051_v47, 6  ;;  %s3915_s12 = scalar_select %p5203_p13, 0, 1 }
  0x9e   : > { %v526_v50 = vsel %vm369_vm0, %v5039_v41, %v525_v44  ;;  %v514_v53 = vrot.slane %v5048_v46, 6  ;;  %v512_v55 = vsel %vm369_vm0, %v511_v48, %v5031_v36  ;;  %v517_v56 = vrot.slane %v5051_v47, 5  ;;  %p917_p0 = pnand %p5294_p6, %p5290_p7 }
  0x9f   : > { %v527_v54 = vsel %vm371_vm1, %v5039_v41, %v526_v50  ;;  %v559_v57 = vrot.slane %v5039_v41, 2  ;;  %v513_v59 = vsel %vm371_vm1, %v511_v48, %v512_v55  ;;  %v562_v60 = vrot.slane %v5048_v46, 1  ;;  %p5248_p3 = scmp.eq.s32.totalorder %s3915_s12, 1 }
  0xa0   : > { %425 = vrot.lane.b32.xlu1 %v424_v42, %s4654_s7  ;;  %397 = vrot.lane.b32.xlu0 %v396_v45, %s7106_s26  ;;  %v529_v58 = vsel %vm374_vm2, %v528_v51, %v527_v54  ;;  %v544_v61 = vrot.slane %v5031_v36, 2  ;;  %v515_v63 = vsel %vm374_vm2, %v514_v53, %v513_v59  ;;  %v545_v1 = vrot.slane %v5039_v41, 1  ;;  %s4663_s7 = smov 1  }
  0xa1   : > { %v530_v62 = vsel %vm376_vm3, %v528_v51, %v529_v58  ;;  %v560_v0 = vsel %vm369_vm0, %v559_v57, %v558_v49  ;;  %v516_v3 = vsel %vm376_vm3, %v514_v53, %v515_v63  ;;  %v550_v6 = vrot.slane %v5051_v47, 7 }
  0xa2   : > { %v532_v2 = vsel %vm7098_vm4, %v531_v52, %v530_v62  ;;  %v561_v4 = vsel %vm371_vm1, %v559_v57, %v560_v0  ;;  %v518_v8 = vsel %vm7098_vm4, %v517_v56, %v516_v3  ;;  %v546_v13 = vsel %vm369_vm0, %v545_v1, %v544_v61 }
  0xa3   : > { %v533_v7 = vsel %vm7097_vm5, %v531_v52, %v532_v2  ;;  %v563_v9 = vsel %vm374_vm2, %v562_v60, %v561_v4  ;;  %v519_v14 = vsel %vm7097_vm5, %v517_v56, %v518_v8  ;;  %v547_v16 = vsel %vm371_vm1, %v545_v1, %v546_v13 }
  0xa4   : > { %534 = vrot.lane.b32.xlu1 %v533_v7, %s4656_s10  ;;  %v564_v15 = vsel %vm376_vm3, %v562_v60, %v563_v9  ;;  %v5102_v17 = vcombine.high %v5006_v11, %v5006_v11  ;;  %520 = vrot.lane.b32.xlu0 %v519_v14, %s4657_s5  ;;  %v548_v19 = vsel %vm374_vm2, %v5048_v46, %v547_v16  ;;  %v448_v20 = vrot.slane %v4995_v5, 1 }
  0xa5   : > { %v565_v18 = vsel %vm7098_vm4, %v5051_v47, %v564_v15  ;;  %v451_v21 = vrot.slane %v5008_v12, 7  ;;  %v549_v11 = vsel %vm376_vm3, %v5048_v46, %v548_v19  ;;  %v434_v24 = vrot.slane %v5003_v10, 7 }
  0xa6   : > { %v566_v22 = vsel %vm7097_vm5, %v5051_v47, %v565_v18  ;;  %v454_v23 = vrot.slane %v5102_v17, 6  ;;  %v551_v25 = vsel %vm7098_vm4, %v550_v6, %v549_v11  ;;  %v449_v26 = vsel %vm369_vm0, %v5003_v10, %v448_v20 }
  0xa7   : > { %v437_v27 = vrot.slane %v5008_v12, 6  ;;  %v440_v28 = vrot.slane %v5102_v17, 5  ;;  %v552_v29 = vsel %vm7097_vm5, %v550_v6, %v551_v25  ;;  %v450_v30 = vsel %vm371_vm1, %v5003_v10, %v449_v26  ;;  %v5213_v26 = vld [vmem:[%s4963_s17 + $0xb0] sm:%s5174_s6] }
  0xa8   : > { %567 = vrot.lane.b32.xlu1 %v566_v22, %s4658_s30  ;;  %v435_v31 = vsel %vm369_vm0, %v434_v24, %v4995_v5  ;;  %v476_v32 = vrot.slane %v4995_v5, 3  ;;  %553 = vrot.lane.b32.xlu0 %v552_v29, %s4659_s9  ;;  %v452_v33 = vsel %vm374_vm2, %v451_v21, %v450_v30  ;;  %v477_v35 = vrot.slane %v5003_v10, 2  ;;  %v4246_v22 = vld [vmem:[%s4963_s17 + $0xa0] sm:%s5174_s6]  ;;  %s4667_s30 = smov 69   ;;  %s4671_s9 = smov 81  }
  0xa9   : > { %v436_v34 = vsel %vm371_vm1, %v434_v24, %v435_v31  ;;  %v480_v37 = vrot.slane %v5008_v12, 1  ;;  %v453_v38 = vsel %vm376_vm3, %v451_v21, %v452_v33  ;;  %v462_v40 = vrot.slane %v4995_v5, 2  ;;  %v4249_v31 = vld [vmem:[%s4963_s17 + $0xa8] sm:%s5174_s6] }
  0xaa   : > { %v438_v39 = vsel %vm374_vm2, %v437_v27, %v436_v34  ;;  %v463_v42 = vrot.slane %v5003_v10, 1  ;;  %v455_v43 = vsel %vm7098_vm4, %v454_v23, %v453_v38  ;;  %v478_v45 = vsel %vm369_vm0, %v477_v35, %v476_v32 }
  0xab   : > { %v439_v44 = vsel %vm376_vm3, %v437_v27, %v438_v39  ;;  %v468_v48 = vrot.slane %v5102_v17, 7  ;;  %v456_v49 = vsel %vm7097_vm5, %v454_v23, %v455_v43  ;;  %v479_v51 = vsel %vm371_vm1, %v477_v35, %v478_v45  ;;  %v5217_v27 = vld [vmem:[%s4963_s17 + $0xb8] sm:%s5174_s6]  ;;  %s4666_s17 = smov 83   ;;  %s4669_s6 = smov 53  }
  0xac   : > { %v441_v50 = vsel %vm7098_vm4, %v440_v28, %v439_v44  ;;  %v464_v52 = vsel %vm369_vm0, %v463_v42, %v462_v40  ;;  %457 = vrot.lane.b32.xlu1 %v456_v49, %s4660_s29  ;;  %v481_v10 = vsel %vm374_vm2, %v480_v37, %v479_v51  ;;  %v572_v54 = vcombine.high %v5031_v36, %v5031_v36  ;;  %s4668_s29 = smov 67  }
  0xad   : > { %v442_v5 = vsel %vm7097_vm5, %v440_v28, %v441_v50  ;;  %v465_v53 = vsel %vm371_vm1, %v463_v42, %v464_v52  ;;  %v482_v55 = vsel %vm376_vm3, %v480_v37, %v481_v10  ;;  %v573_v57 = vcombine.high %v5039_v41, %v5039_v41 }
  0xae   : > { %443 = vrot.lane.b32.xlu0 %v442_v5, %s4661_s21  ;;  %v466_v56 = vsel %vm374_vm2, %v5008_v12, %v465_v53  ;;  %v574_v58 = vcombine.high %v5048_v46, %v5048_v46  ;;  %v483_v59 = vsel %vm7098_vm4, %v5102_v17, %v482_v55  ;;  %v5170_v60 = vcombine.high %v5051_v47, %v5051_v47  ;;  %s5267_s21 = scalar_select %p5248_p3, 255, 0 }
  0xaf   : > { %v467_v36 = vsel %vm376_vm3, %v5008_v12, %v466_v56  ;;  %v590_v61 = vrot.slane %v572_v54, 1  ;;  %v484_v41 = vsel %vm7097_vm5, %v5102_v17, %v483_v59  ;;  %v576_v63 = vrot.slane %v573_v57, 7 }
  0xb0   : > { %v469_v46 = vsel %vm7098_vm4, %v468_v48, %v467_v36  ;;  %v593_v62 = vrot.slane %v574_v58, 7  ;;  %485 = vrot.lane.b32.xlu1 %v484_v41, %s4662_s4  ;;  %v596_v47 = vrot.slane %v5170_v60, 6  ;;  %v579_v1 = vrot.slane %v574_v58, 6 }
  0xb1   : > { %v470_v12 = vsel %vm7097_vm5, %v468_v48, %v469_v46  ;;  %v591_v0 = vsel %vm369_vm0, %v573_v57, %v590_v61  ;;  %v577_v3 = vsel %vm369_vm0, %v576_v63, %v572_v54  ;;  %v582_v4 = vrot.slane %v5170_v60, 5 }
  0xb2   : > { %471 = vrot.lane.b32.xlu0 %v470_v12, %s4663_s7  ;;  %v592_v2 = vsel %vm371_vm1, %v573_v57, %v591_v0  ;;  %v618_v6 = vrot.slane %v572_v54, 3  ;;  %v578_v8 = vsel %vm371_vm1, %v576_v63, %v577_v3  ;;  %v619_v9 = vrot.slane %v573_v57, 2 }
  0xb3   : > { %v594_v7 = vsel %vm374_vm2, %v593_v62, %v592_v2  ;;  %v622_v13 = vrot.slane %v574_v58, 1  ;;  %v580_v15 = vsel %vm374_vm2, %v579_v1, %v578_v8  ;;  %v604_v16 = vrot.slane %v572_v54, 2 }
  0xb4   : > { %v595_v14 = vsel %vm376_vm3, %v593_v62, %v594_v7  ;;  %v605_v17 = vrot.slane %v573_v57, 1  ;;  %v581_v19 = vsel %vm376_vm3, %v579_v1, %v580_v15  ;;  %v620_v20 = vsel %vm369_vm0, %v619_v9, %v618_v6 }
  0xb5   : > { %v597_v18 = vsel %vm7098_vm4, %v596_v47, %v595_v14  ;;  %v610_v21 = vrot.slane %v5170_v60, 7  ;;  %v583_v23 = vsel %vm7098_vm4, %v582_v4, %v581_v19  ;;  %v621_v24 = vsel %vm371_vm1, %v619_v9, %v620_v20 }
  0xb6   : > { %v598_v11 = vsel %vm7097_vm5, %v596_v47, %v597_v18  ;;  %v606_v25 = vsel %vm369_vm0, %v605_v17, %v604_v16  ;;  %v584_v28 = vsel %vm7097_vm5, %v582_v4, %v583_v23  ;;  %v623_v29 = vsel %vm374_vm2, %v622_v13, %v621_v24 }
  0xb7   : > { %599 = vrot.lane.b32.xlu1 %v598_v11, %s4664_s3  ;;  %v607_v30 = vsel %vm371_vm1, %v605_v17, %v606_v25  ;;  %585 = vrot.lane.b32.xlu0 %v584_v28, %s4665_s8  ;;  %v624_v32 = vsel %vm376_vm3, %v622_v13, %v623_v29  ;;  %v667_v34 = vrot.slane %v4246_v22, 1  ;;  %v670_v38 = vrot.slane %v5213_v26, 7  ;;  %s4670_s3 = smov 95   ;;  %s4676_s8 = smov 121  }
  0xb8   : > { %v608_v33 = vsel %vm374_vm2, %v574_v58, %v607_v30  ;;  %v625_v35 = vsel %vm7098_vm4, %v5170_v60, %v624_v32  ;;  %v673_v39 = vrot.slane %v5217_v27, 6  ;;  %v653_v44 = vrot.slane %v4249_v31, 7 }
  0xb9   : > { %v609_v37 = vsel %vm376_vm3, %v574_v58, %v608_v33  ;;  %v626_v40 = vsel %vm7097_vm5, %v5170_v60, %v625_v35  ;;  %v668_v43 = vsel %vm369_vm0, %v4249_v31, %v667_v34  ;;  %v656_v49 = vrot.slane %v5213_v26, 6  ;;  %v5308_v35 = vld [vmem:[%s4970_s18 + $0x8] sm:%s5267_s21] }
  0xba   : > { %v611_v42 = vsel %vm7098_vm4, %v610_v21, %v609_v37  ;;  %v669_v48 = vsel %vm371_vm1, %v4249_v31, %v668_v43  ;;  %v659_v50 = vrot.slane %v5217_v27, 5  ;;  %v654_v52 = vsel %vm369_vm0, %v653_v44, %v4246_v22 }
  0xbb   : > { %627 = vrot.lane.b32.xlu1 %v626_v40, %s4666_s17  ;;  %v612_v45 = vsel %vm7097_vm5, %v610_v21, %v611_v42  ;;  %v671_v51 = vsel %vm374_vm2, %v670_v38, %v669_v48  ;;  %v695_v5 = vrot.slane %v4246_v22, 3  ;;  %v696_v10 = vrot.slane %v4249_v31, 2  ;;  %v5315_v42 = vld [vmem:[%s4970_s18 + $0x10] sm:%s5267_s21] }
  0xbc   : > { %613 = vrot.lane.b32.xlu0 %v612_v45, %s4667_s30  ;;  %v672_v53 = vsel %vm376_vm3, %v670_v38, %v671_v51  ;;  %v655_v54 = vsel %vm371_vm1, %v653_v44, %v654_v52  ;;  %v699_v55 = vrot.slane %v5213_v26, 1  ;;  %v681_v56 = vrot.slane %v4246_v22, 2 }
  0xbd   : > { %v674_v57 = vsel %vm7098_vm4, %v673_v39, %v672_v53  ;;  %v657_v58 = vsel %vm374_vm2, %v656_v49, %v655_v54  ;;  %v697_v59 = vsel %vm369_vm0, %v696_v10, %v695_v5  ;;  %v682_v36 = vrot.slane %v4249_v31, 1 }
  0xbe   : > { %v675_v60 = vsel %vm7097_vm5, %v673_v39, %v674_v57  ;;  %v658_v61 = vsel %vm376_vm3, %v656_v49, %v657_v58  ;;  %v698_v41 = vsel %vm371_vm1, %v696_v10, %v697_v59  ;;  %v687_v46 = vrot.slane %v5217_v27, 7  ;;  %v4278_v49 = vld [vmem:[%s4970_s18] sm:%s5267_s21] }
  0xbf   : > { %676 = vrot.lane.b32.xlu1 %v675_v60, %s4668_s29  ;;  %v660_v62 = vsel %vm7098_vm4, %v659_v50, %v658_v61  ;;  %v700_v63 = vsel %vm374_vm2, %v699_v55, %v698_v41  ;;  %v683_v12 = vsel %vm369_vm0, %v682_v36, %v681_v56  ;;  %v709_v0 = vcombine.high %v4246_v22, %v4246_v22  ;;  %s4672_s29 = smov 123  }
  0xc0   : > { %v661_v47 = vsel %vm7097_vm5, %v659_v50, %v660_v62  ;;  %v701_v1 = vsel %vm376_vm3, %v699_v55, %v700_v63  ;;  %v684_v2 = vsel %vm371_vm1, %v682_v36, %v683_v12  ;;  %v710_v3 = vcombine.high %v4249_v31, %v4249_v31  ;;  %v5329_v50 = vld [vmem:[%s4970_s18 + $0x18] sm:%s5267_s21]  ;;  %s5346_s21 = scalar_select %p917_p0, 0, 1 }
  0xc1   : > { %662 = vrot.lane.b32.xlu0 %v661_v47, %s4669_s6  ;;  %v702_v4 = vsel %vm7098_vm4, %v5217_v27, %v701_v1  ;;  %v685_v6 = vsel %vm374_vm2, %v5213_v26, %v684_v2  ;;  %v711_v7 = vcombine.high %v5213_v26, %v5213_v26  ;;  %v5277_v8 = vcombine.high %v5217_v27, %v5217_v27  ;;  %s4673_s6 = smov 109  }
  0xc2   : > { %v703_v9 = vsel %vm7097_vm5, %v5217_v27, %v702_v4  ;;  %v686_v13 = vsel %vm376_vm3, %v5213_v26, %v685_v6  ;;  %v727_v14 = vrot.slane %v709_v0, 1  ;;  %v713_v15 = vrot.slane %v710_v3, 7  ;;  %p4308_p11 = scmp.eq.s32.totalorder %s5346_s21, 1  ;;  %s4679_s21 = smov 35  }
  0xc3   : > { %704 = vrot.lane.b32.xlu1 %v703_v9, %s4670_s3  ;;  %v688_v16 = vsel %vm7098_vm4, %v687_v46, %v686_v13  ;;  %v730_v17 = vrot.slane %v711_v7, 7  ;;  %v733_v18 = vrot.slane %v5277_v8, 6  ;;  %v716_v19 = vrot.slane %v711_v7, 6  ;;  %s4675_s3 = smov 23  }
  0xc4   : > { %v689_v20 = vsel %vm7097_vm5, %v687_v46, %v688_v16  ;;  %v728_v21 = vsel %vm369_vm0, %v710_v3, %v727_v14  ;;  %v714_v22 = vsel %vm369_vm0, %v713_v15, %v709_v0  ;;  %v719_v11 = vrot.slane %v5277_v8, 5  ;;  %s5389_s12 = scalar_select %p4308_p11, 255, 0 }
  0xc5   : > { %690 = vrot.lane.b32.xlu0 %v689_v20, %s4671_s9  ;;  %v729_v23 = vsel %vm371_vm1, %v710_v3, %v728_v21  ;;  %v715_v24 = vsel %vm371_vm1, %v713_v15, %v714_v22  ;;  %v746_v25 = vrot.slane %v709_v0, 2  ;;  %v747_v26 = vrot.slane %v710_v3, 1  ;;  %s4677_s9 = smov 7  }
  0xc6   : > { %v731_v27 = vsel %vm374_vm2, %v730_v17, %v729_v23  ;;  %v717_v28 = vsel %vm374_vm2, %v716_v19, %v715_v24  ;;  %v752_v29 = vrot.slane %v5277_v8, 7  ;;  %v760_v30 = vrot.slane %v709_v0, 3 }
  0xc7   : > { %v732_v31 = vsel %vm376_vm3, %v730_v17, %v731_v27  ;;  %v718_v32 = vsel %vm376_vm3, %v716_v19, %v717_v28  ;;  %v748_v33 = vsel %vm369_vm0, %v747_v26, %v746_v25  ;;  %v761_v34 = vrot.slane %v710_v3, 2 }
  0xc8   : > { %v734_v37 = vsel %vm7098_vm4, %v733_v18, %v732_v31  ;;  %v720_v38 = vsel %vm7098_vm4, %v719_v11, %v718_v32  ;;  %v749_v39 = vsel %vm371_vm1, %v747_v26, %v748_v33  ;;  %v764_v40 = vrot.slane %v711_v7, 1 }
  0xc9   : > { %v735_v43 = vsel %vm7097_vm5, %v733_v18, %v734_v37  ;;  %v721_v44 = vsel %vm7097_vm5, %v719_v11, %v720_v38  ;;  %v750_v45 = vsel %vm374_vm2, %v711_v7, %v749_v39  ;;  %v762_v48 = vsel %vm369_vm0, %v761_v34, %v760_v30 }
  0xca   : > { %736 = vrot.lane.b32.xlu1 %v735_v43, %s4672_s29  ;;  %722 = vrot.lane.b32.xlu0 %v721_v44, %s4673_s6  ;;  %v751_v51 = vsel %vm376_vm3, %v711_v7, %v750_v45  ;;  %v763_v52 = vsel %vm371_vm1, %v761_v34, %v762_v48  ;;  %v793_v5 = vrot.slane %v5308_v35, 7  ;;  %v796_v54 = vrot.slane %v5315_v42, 6  ;;  %s1051_s29 = sadd.s32 2, %s4977_s11  ;;  %s4678_s6 = smov 21  }
  0xcb   : > { %v753_v10 = vsel %vm7098_vm4, %v752_v29, %v751_v51  ;;  %v765_v53 = vsel %vm374_vm2, %v764_v40, %v763_v52  ;;  %v799_v58 = vrot.slane %v5329_v50, 5  ;;  %v812_v60 = vrot.slane %v4278_v49, 1  ;;  %p5411_p12 = scmp.ge.s32.totalorder %s1051_s29, 0  ;;  %p5415_p10 = scmp.lt.s32.totalorder %s1051_s29, 8 }
  0xcc   : > { %v754_v55 = vsel %vm7097_vm5, %v752_v29, %v753_v10  ;;  %v766_v56 = vsel %vm376_vm3, %v764_v40, %v765_v53  ;;  %v794_v57 = vsel %vm369_vm0, %v793_v5, %v4278_v49  ;;  %v815_v61 = vrot.slane %v5315_v42, 7  ;;  %s4680_s29 = smov 49  }
  0xcd   : > { %v767_v59 = vsel %vm7098_vm4, %v5277_v8, %v766_v56  ;;  %v795_v36 = vsel %vm371_vm1, %v793_v5, %v794_v57  ;;  %v818_v62 = vrot.slane %v5329_v50, 6  ;;  %v826_v63 = vrot.slane %v4278_v49, 2  ;;  %p1054_p4 = pnand %p5415_p10, %p5411_p12 }
  0xce   : > { %755 = vrot.lane.b32.xlu0 %v754_v55, %s4674_s13  ;;  %v768_v41 = vsel %vm7097_vm5, %v5277_v8, %v767_v59  ;;  %v797_v46 = vsel %vm374_vm2, %v796_v54, %v795_v36  ;;  %v813_v0 = vsel %vm369_vm0, %v5308_v35, %v812_v60  ;;  %v827_v47 = vrot.slane %v5308_v35, 1  ;;  %v5426_v55 = vld [vmem:[%s4970_s18 + $0x28] sm:%s5389_s12] }
  0xcf   : > { %769 = vrot.lane.b32.xlu1 %v768_v41, %s4675_s3  ;;  %v798_v12 = vsel %vm376_vm3, %v796_v54, %v797_v46  ;;  %v832_v1 = vrot.slane %v5329_v50, 7  ;;  %v814_v3 = vsel %vm371_vm1, %v5308_v35, %v813_v0  ;;  %v840_v4 = vrot.slane %v4278_v49, 3  ;;  %v5434_v36 = vld [vmem:[%s4970_s18 + $0x30] sm:%s5389_s12] }
  0xd0   : > { %v800_v2 = vsel %vm7098_vm4, %v799_v58, %v798_v12  ;;  %v841_v6 = vrot.slane %v5308_v35, 2  ;;  %v816_v8 = vsel %vm374_vm2, %v815_v61, %v814_v3  ;;  %v828_v9 = vsel %vm369_vm0, %v827_v47, %v826_v63  ;;  %v5438_v60 = vld [vmem:[%s4970_s18 + $0x38] sm:%s5389_s12] }
  0xd1   : > { %v801_v7 = vsel %vm7097_vm5, %v799_v58, %v800_v2  ;;  %v844_v13 = vrot.slane %v5315_v42, 1  ;;  %v817_v14 = vsel %vm376_vm3, %v815_v61, %v816_v8  ;;  %v829_v15 = vsel %vm371_vm1, %v827_v47, %v828_v9 }
  0xd2   : > { %802 = vrot.lane.b32.xlu0 %v801_v7, %s4676_s8  ;;  %v842_v16 = vsel %vm369_vm0, %v841_v6, %v840_v4  ;;  %v854_v17 = vcombine.high %v4278_v49, %v4278_v49  ;;  %v819_v18 = vsel %vm7098_vm4, %v818_v62, %v817_v14  ;;  %v830_v19 = vsel %vm374_vm2, %v5315_v42, %v829_v15  ;;  %s4684_s8 = smov 61  }
  0xd3   : > { %v843_v20 = vsel %vm371_vm1, %v841_v6, %v842_v16  ;;  %v855_v21 = vcombine.high %v5308_v35, %v5308_v35  ;;  %v820_v22 = vsel %vm7097_vm5, %v818_v62, %v819_v18  ;;  %v831_v11 = vsel %vm376_vm3, %v5315_v42, %v830_v19  ;;  %v4310_v62 = vld [vmem:[%s4970_s18 + $0x20] sm:%s5389_s12]  ;;  %s4682_s12 = smov 77  }
  0xd4   : > { %v845_v23 = vsel %vm374_vm2, %v844_v13, %v843_v20  ;;  %v856_v24 = vcombine.high %v5315_v42, %v5315_v42  ;;  %821 = vrot.lane.b32.xlu1 %v820_v22, %s4677_s9  ;;  %v833_v25 = vsel %vm7098_vm4, %v832_v1, %v831_v11  ;;  %v5395_v27 = vcombine.high %v5329_v50, %v5329_v50  ;;  %s4685_s9 = smov 75  }
  0xd5   : > { %v846_v26 = vsel %vm376_vm3, %v844_v13, %v845_v23  ;;  %v858_v28 = vrot.slane %v855_v21, 7  ;;  %v834_v29 = vsel %vm7097_vm5, %v832_v1, %v833_v25  ;;  %v872_v32 = vrot.slane %v854_v17, 1 }
  0xd6   : > { %v847_v30 = vsel %vm7098_vm4, %v5329_v50, %v846_v26  ;;  %v861_v31 = vrot.slane %v856_v24, 6  ;;  %835 = vrot.lane.b32.xlu0 %v834_v29, %s4678_s6  ;;  %v864_v35 = vrot.slane %v5395_v27, 5  ;;  %v875_v37 = vrot.slane %v856_v24, 7  ;;  %s4681_s6 = smov 63  }
  0xd7   : > { %v848_v33 = vsel %vm7097_vm5, %v5329_v50, %v847_v30  ;;  %v859_v34 = vsel %vm369_vm0, %v858_v28, %v854_v17  ;;  %v873_v39 = vsel %vm369_vm0, %v855_v21, %v872_v32  ;;  %v878_v40 = vrot.slane %v5395_v27, 6 }
  0xd8   : > { %v860_v38 = vsel %vm371_vm1, %v858_v28, %v859_v34  ;;  %v886_v42 = vrot.slane %v854_v17, 2  ;;  %849 = vrot.lane.b32.xlu1 %v848_v33, %s4679_s21  ;;  %v874_v44 = vsel %vm371_vm1, %v855_v21, %v873_v39  ;;  %v887_v45 = vrot.slane %v855_v21, 1  ;;  %s5470_s21 = scalar_select %p1054_p4, 0, 1 }
  0xd9   : > { %v862_v43 = vsel %vm374_vm2, %v861_v31, %v860_v38  ;;  %v892_v48 = vrot.slane %v5395_v27, 7  ;;  %v876_v50 = vsel %vm374_vm2, %v875_v37, %v874_v44  ;;  %v900_v51 = vrot.slane %v854_v17, 3 }
  0xda   : > { %v863_v49 = vsel %vm376_vm3, %v861_v31, %v862_v43  ;;  %v901_v52 = vrot.slane %v855_v21, 2  ;;  %v877_v10 = vsel %vm376_vm3, %v875_v37, %v876_v50  ;;  %v888_v53 = vsel %vm369_vm0, %v887_v45, %v886_v42  ;;  %p4340_p1 = scmp.eq.s32.totalorder %s5470_s21, 1  ;;  %s4687_s21 = smov 103  }
  0xdb   : > { %v865_v5 = vsel %vm7098_vm4, %v864_v35, %v863_v49  ;;  %v904_v54 = vrot.slane %v856_v24, 1  ;;  %v879_v57 = vsel %vm7098_vm4, %v878_v40, %v877_v10  ;;  %v889_v58 = vsel %vm371_vm1, %v887_v45, %v888_v53 }
  0xdc   : > { %v866_v56 = vsel %vm7097_vm5, %v864_v35, %v865_v5  ;;  %v902_v59 = vsel %vm369_vm0, %v901_v52, %v900_v51  ;;  %v880_v61 = vsel %vm7097_vm5, %v878_v40, %v879_v57  ;;  %v890_v41 = vsel %vm374_vm2, %v856_v24, %v889_v58 }
  0xdd   : > { %867 = vrot.lane.b32.xlu0 %v866_v56, %s4680_s29  ;;  %v903_v46 = vsel %vm371_vm1, %v901_v52, %v902_v59  ;;  %881 = vrot.lane.b32.xlu1 %v880_v61, %s4681_s6  ;;  %v891_v63 = vsel %vm376_vm3, %v856_v24, %v890_v41  ;;  %v935_v0 = vrot.slane %v5426_v55, 7  ;;  %v938_v2 = vrot.slane %v5434_v36, 6  ;;  %s4683_s29 = smov 91   ;;  %s1186_s6 = sadd.s32 3, %s4977_s11 }
  0xde   : > { %v905_v12 = vsel %vm374_vm2, %v904_v54, %v903_v46  ;;  %v893_v47 = vsel %vm7098_vm4, %v892_v48, %v891_v63  ;;  %v941_v3 = vrot.slane %v5438_v60, 5  ;;  %v949_v8 = vrot.slane %v4310_v62, 1  ;;  %p5528_p2 = scmp.ge.s32.totalorder %s1186_s6, 0  ;;  %p5532_p5 = scmp.lt.s32.totalorder %s1186_s6, 8 }
  0xdf   : > { %v906_v1 = vsel %vm376_vm3, %v904_v54, %v905_v12  ;;  %v894_v4 = vsel %vm7097_vm5, %v892_v48, %v893_v47  ;;  %v936_v7 = vsel %vm369_vm0, %v935_v0, %v4310_v62  ;;  %v952_v14 = vrot.slane %v5434_v36, 7  ;;  %s4688_s6 = smov 117  }
  0xe0   : > { %v907_v6 = vsel %vm7098_vm4, %v5395_v27, %v906_v1  ;;  %v937_v13 = vsel %vm371_vm1, %v935_v0, %v936_v7  ;;  %v955_v15 = vrot.slane %v5438_v60, 6  ;;  %v950_v17 = vsel %vm369_vm0, %v5426_v55, %v949_v8  ;;  %p1189_p9 = pnand %p5532_p5, %p5528_p2 }
  0xe1   : > { %895 = vrot.lane.b32.xlu0 %v894_v4, %s4682_s12  ;;  %v908_v9 = vsel %vm7097_vm5, %v5395_v27, %v907_v6  ;;  %v939_v16 = vsel %vm374_vm2, %v938_v2, %v937_v13  ;;  %v963_v18 = vrot.slane %v4310_v62, 2  ;;  %v964_v19 = vrot.slane %v5426_v55, 1  ;;  %s5513_s12 = scalar_select %p4340_p1, 255, 0 }
  0xe2   : > { %909 = vrot.lane.b32.xlu1 %v908_v9, %s4683_s29  ;;  %v940_v20 = vsel %vm376_vm3, %v938_v2, %v939_v16  ;;  %v951_v21 = vsel %vm371_vm1, %v5426_v55, %v950_v17  ;;  %v969_v22 = vrot.slane %v5438_v60, 7  ;;  %v977_v11 = vrot.slane %v4310_v62, 3 }
  0xe3   : > { %v942_v23 = vsel %vm7098_vm4, %v941_v3, %v940_v20  ;;  %v953_v24 = vsel %vm374_vm2, %v952_v14, %v951_v21  ;;  %v965_v25 = vsel %vm369_vm0, %v964_v19, %v963_v18  ;;  %v978_v26 = vrot.slane %v5426_v55, 2  ;;  %v4345_v47 = vld [vmem:[%s4970_s18 + $0x48] sm:%s5513_s12]  ;;  %v5546_v6 = vld [vmem:[%s4970_s18 + $0x50] sm:%s5513_s12] }
  0xe4   : > { %v943_v27 = vsel %vm7097_vm5, %v941_v3, %v942_v23  ;;  %v954_v28 = vsel %vm376_vm3, %v952_v14, %v953_v24  ;;  %v966_v29 = vsel %vm371_vm1, %v964_v19, %v965_v25  ;;  %v981_v30 = vrot.slane %v5434_v36, 1  ;;  %v4342_v14 = vld [vmem:[%s4970_s18 + $0x40] sm:%s5513_s12] }
  0xe5   : > { %944 = vrot.lane.b32.xlu0 %v943_v27, %s4684_s8  ;;  %v956_v31 = vsel %vm7098_vm4, %v955_v15, %v954_v28  ;;  %v967_v32 = vsel %vm374_vm2, %v5434_v36, %v966_v29  ;;  %v979_v33 = vsel %vm369_vm0, %v978_v26, %v977_v11  ;;  %v991_v34 = vcombine.high %v4310_v62, %v4310_v62  ;;  %s4686_s8 = smov 89  }
  0xe6   : > { %v957_v35 = vsel %vm7097_vm5, %v955_v15, %v956_v31  ;;  %v968_v37 = vsel %vm376_vm3, %v5434_v36, %v967_v32  ;;  %v980_v38 = vsel %vm371_vm1, %v978_v26, %v979_v33  ;;  %v992_v39 = vcombine.high %v5426_v55, %v5426_v55  ;;  %v5556_v15 = vld [vmem:[%s4970_s18 + $0x58] sm:%s5513_s12]  ;;  %s4690_s12 = smov 17  }
  0xe7   : > { %958 = vrot.lane.b32.xlu1 %v957_v35, %s4685_s9  ;;  %v970_v40 = vsel %vm7098_vm4, %v969_v22, %v968_v37  ;;  %v982_v42 = vsel %vm374_vm2, %v981_v30, %v980_v38  ;;  %v993_v43 = vcombine.high %v5434_v36, %v5434_v36  ;;  %v5506_v44 = vcombine.high %v5438_v60, %v5438_v60  ;;  %s4692_s9 = smov 29  }
  0xe8   : > { %v971_v45 = vsel %vm7097_vm5, %v969_v22, %v970_v40  ;;  %v983_v48 = vsel %vm376_vm3, %v981_v30, %v982_v42  ;;  %v995_v49 = vrot.slane %v992_v39, 7  ;;  %v1009_v50 = vrot.slane %v991_v34, 1 }
  0xe9   : > { %972 = vrot.lane.b32.xlu0 %v971_v45, %s4686_s8  ;;  %v984_v51 = vsel %vm7098_vm4, %v5438_v60, %v983_v48  ;;  %v998_v52 = vrot.slane %v993_v43, 6  ;;  %v1001_v5 = vrot.slane %v5506_v44, 5  ;;  %v1012_v10 = vrot.slane %v993_v43, 7  ;;  %s4694_s8 = smov 57  }
  0xea   : > { %v985_v53 = vsel %vm7097_vm5, %v5438_v60, %v984_v51  ;;  %v996_v54 = vsel %vm369_vm0, %v995_v49, %v991_v34  ;;  %v1010_v55 = vsel %vm369_vm0, %v992_v39, %v1009_v50  ;;  %v1015_v56 = vrot.slane %v5506_v44, 6 }
  0xeb   : > { %986 = vrot.lane.b32.xlu1 %v985_v53, %s4687_s21  ;;  %v997_v57 = vsel %vm371_vm1, %v995_v49, %v996_v54  ;;  %v1011_v58 = vsel %vm371_vm1, %v992_v39, %v1010_v55  ;;  %v1023_v59 = vrot.slane %v991_v34, 2  ;;  %v1024_v36 = vrot.slane %v992_v39, 1  ;;  %s4689_s21 = smov 3  }
  0xec   : > { %v999_v60 = vsel %vm374_vm2, %v998_v52, %v997_v57  ;;  %v1013_v61 = vsel %vm374_vm2, %v1012_v10, %v1011_v58  ;;  %v1029_v41 = vrot.slane %v5506_v44, 7  ;;  %v1037_v46 = vrot.slane %v991_v34, 3 }
  0xed   : > { %v1000_v62 = vsel %vm376_vm3, %v998_v52, %v999_v60  ;;  %v1014_v63 = vsel %vm376_vm3, %v1012_v10, %v1013_v61  ;;  %v1025_v12 = vsel %vm369_vm0, %v1024_v36, %v1023_v59  ;;  %v1038_v0 = vrot.slane %v992_v39, 2 }
  0xee   : > { %v1002_v1 = vsel %vm7098_vm4, %v1001_v5, %v1000_v62  ;;  %v1016_v2 = vsel %vm7098_vm4, %v1015_v56, %v1014_v63  ;;  %v1026_v3 = vsel %vm371_vm1, %v1024_v36, %v1025_v12  ;;  %v1041_v4 = vrot.slane %v993_v43, 1 }
  0xef   : > { %v1003_v7 = vsel %vm7097_vm5, %v1001_v5, %v1002_v1  ;;  %v1017_v8 = vsel %vm7097_vm5, %v1015_v56, %v1016_v2  ;;  %v1027_v9 = vsel %vm374_vm2, %v993_v43, %v1026_v3  ;;  %v1039_v13 = vsel %vm369_vm0, %v1038_v0, %v1037_v46 }
  0xf0   : > { %1004 = vrot.lane.b32.xlu0 %v1003_v7, %s4688_s6  ;;  %1018 = vrot.lane.b32.xlu1 %v1017_v8, %s4689_s21  ;;  %v1028_v16 = vsel %vm376_vm3, %v993_v43, %v1027_v9  ;;  %v1040_v17 = vsel %vm371_vm1, %v1038_v0, %v1039_v13  ;;  %v1072_v18 = vrot.slane %v4345_v47, 7  ;;  %v1075_v21 = vrot.slane %v5546_v6, 6  ;;  %s5584_s6 = scalar_select %p1189_p9, 0, 1 }
  0xf1   : > { %v1030_v19 = vsel %vm7098_vm4, %v1029_v41, %v1028_v16  ;;  %v1042_v20 = vsel %vm374_vm2, %v1041_v4, %v1040_v17  ;;  %v1078_v24 = vrot.slane %v5556_v15, 5  ;;  %v1085_v27 = vrot.slane %v4342_v14, 1  ;;  %s4691_s21 = smov 31  }
  0xf2   : > { %v1031_v22 = vsel %vm7097_vm5, %v1029_v41, %v1030_v19  ;;  %v1043_v11 = vsel %vm376_vm3, %v1041_v4, %v1042_v20  ;;  %v1073_v23 = vsel %vm369_vm0, %v1072_v18, %v4342_v14  ;;  %v1088_v28 = vrot.slane %v5546_v6, 7  ;;  %p4375_p13 = scmp.eq.s32.totalorder %s5584_s6, 1  ;;  %s4696_s6 = smov 85  }
  0xf3   : > { %v1044_v25 = vsel %vm7098_vm4, %v5506_v44, %v1043_v11  ;;  %v1074_v26 = vsel %vm371_vm1, %v1072_v18, %v1073_v23  ;;  %v1091_v31 = vrot.slane %v5556_v15, 6  ;;  %v1098_v32 = vrot.slane %v4342_v14, 2 }
  0xf4   : > { %1032 = vrot.lane.b32.xlu0 %v1031_v22, %s4690_s12  ;;  %v1045_v29 = vsel %vm7097_vm5, %v5506_v44, %v1044_v25  ;;  %v1076_v30 = vsel %vm374_vm2, %v1075_v21, %v1074_v26  ;;  %v1086_v34 = vsel %vm369_vm0, %v4345_v47, %v1085_v27  ;;  %v1099_v35 = vrot.slane %v4345_v47, 1  ;;  %s4695_s12 = smov 71  }
  0xf5   : > { %1046 = vrot.lane.b32.xlu1 %v1045_v29, %s4691_s21  ;;  %v1077_v33 = vsel %vm376_vm3, %v1075_v21, %v1076_v30  ;;  %v1104_v37 = vrot.slane %v5556_v15, 7  ;;  %v1087_v39 = vsel %vm371_vm1, %v4345_v47, %v1086_v34  ;;  %v1112_v40 = vrot.slane %v4342_v14, 3 }
  0xf6   : > { %v1079_v38 = vsel %vm7098_vm4, %v1078_v24, %v1077_v33  ;;  %v1113_v42 = vrot.slane %v4345_v47, 2  ;;  %v1089_v44 = vsel %vm374_vm2, %v1088_v28, %v1087_v39  ;;  %v1100_v45 = vsel %vm369_vm0, %v1099_v35, %v1098_v32 }
  0xf7   : > { %v1080_v43 = vsel %vm7097_vm5, %v1078_v24, %v1079_v38  ;;  %v1116_v48 = vrot.slane %v5546_v6, 1  ;;  %v1090_v49 = vsel %vm376_vm3, %v1088_v28, %v1089_v44  ;;  %v1101_v50 = vsel %vm371_vm1, %v1099_v35, %v1100_v45 }
  0xf8   : > { %1081 = vrot.lane.b32.xlu0 %v1080_v43, %s4663_s7  ;;  %v1114_v51 = vsel %vm369_vm0, %v1113_v42, %v1112_v40  ;;  %v1126_v52 = vcombine.high %v4342_v14, %v4342_v14  ;;  %v1092_v5 = vsel %vm7098_vm4, %v1091_v31, %v1090_v49  ;;  %v1102_v10 = vsel %vm374_vm2, %v5546_v6, %v1101_v50  ;;  %s5621_s7 = scalar_select %p4375_p13, 255, 0 }
  0xf9   : > { %v1115_v53 = vsel %vm371_vm1, %v1113_v42, %v1114_v51  ;;  %v1127_v54 = vcombine.high %v4345_v47, %v4345_v47  ;;  %v1093_v55 = vsel %vm7097_vm5, %v1091_v31, %v1092_v5  ;;  %v1103_v56 = vsel %vm376_vm3, %v5546_v6, %v1102_v10 }
  0xfa   : > { %v1117_v57 = vsel %vm374_vm2, %v1116_v48, %v1115_v53  ;;  %v1128_v58 = vcombine.high %v5546_v6, %v5546_v6  ;;  %1094 = vrot.lane.b32.xlu1 %v1093_v55, %s4662_s4  ;;  %v1105_v59 = vsel %vm7098_vm4, %v1104_v37, %v1103_v56  ;;  %v1129_v60 = vcombine.high %v5556_v15, %v5556_v15  ;;  %s4693_s4 = smov 43   ;;  %v5637_v22 = vld [vmem:[%s4970_s18 + $0x68] sm:%s5621_s7] }
  0xfb   : > { %v1118_v36 = vsel %vm376_vm3, %v1116_v48, %v1117_v57  ;;  %v1130_v61 = vrot.slane %v1127_v54, 7  ;;  %v1106_v41 = vsel %vm7097_vm5, %v1104_v37, %v1105_v59  ;;  %v1144_v63 = vrot.slane %v1126_v52, 1  ;;  %v5645_v26 = vld [vmem:[%s4970_s18 + $0x70] sm:%s5621_s7]  ;;  %v5649_v27 = vld [vmem:[%s4970_s18 + $0x78] sm:%s5621_s7] }
  0xfc   : > { %v1119_v46 = vsel %vm7098_vm4, %v5556_v15, %v1118_v36  ;;  %v1133_v62 = vrot.slane %v1128_v58, 6  ;;  %1107 = vrot.lane.b32.xlu0 %v1106_v41, %s4692_s9  ;;  %v1136_v47 = vrot.slane %v1129_v60, 5  ;;  %v1147_v1 = vrot.slane %v1128_v58, 7  ;;  %v4374_v31 = vld [vmem:[%s4970_s18 + $0x60] sm:%s5621_s7]  ;;  %s4697_s7 = smov 99   ;;  %s1326_s9 = sadd.s32 4, %s4977_s11 }
  0xfd   : > { %v1120_v12 = vsel %vm7097_vm5, %v5556_v15, %v1119_v46  ;;  %v1131_v0 = vsel %vm369_vm0, %v1130_v61, %v1126_v52  ;;  %v1145_v3 = vsel %vm369_vm0, %v1127_v54, %v1144_v63  ;;  %v1150_v4 = vrot.slane %v1129_v60, 6  ;;  %p5697_p3 = scmp.ge.s32.totalorder %s1326_s9, 0  ;;  %p5701_p7 = scmp.lt.s32.totalorder %s1326_s9, 8 }
  0xfe   : > { %v1132_v2 = vsel %vm371_vm1, %v1130_v61, %v1131_v0  ;;  %v1158_v6 = vrot.slane %v1126_v52, 2  ;;  %1121 = vrot.lane.b32.xlu1 %v1120_v12, %s4693_s4  ;;  %v1146_v8 = vsel %vm371_vm1, %v1127_v54, %v1145_v3  ;;  %v1159_v9 = vrot.slane %v1127_v54, 1  ;;  %s4703_s9 = smov 25   ;;  %s4704_s11 = smov 39  }
  0xff   : > { %v1134_v7 = vsel %vm374_vm2, %v1133_v62, %v1132_v2  ;;  %v1164_v13 = vrot.slane %v1129_v60, 7  ;;  %v1148_v15 = vsel %vm374_vm2, %v1147_v1, %v1146_v8  ;;  %v1172_v16 = vrot.slane %v1126_v52, 3  ;;  %p1329_p6 = pnand %p5701_p7, %p5697_p3 }
 0x100   : > { %v1135_v14 = vsel %vm376_vm3, %v1133_v62, %v1134_v7  ;;  %v1173_v17 = vrot.slane %v1127_v54, 2  ;;  %v1149_v19 = vsel %vm376_vm3, %v1147_v1, %v1148_v15  ;;  %v1160_v20 = vsel %vm369_vm0, %v1159_v9, %v1158_v6 }
 0x101   : > { %v1137_v18 = vsel %vm7098_vm4, %v1136_v47, %v1135_v14  ;;  %v1176_v21 = vrot.slane %v1128_v58, 1  ;;  %v1151_v23 = vsel %vm7098_vm4, %v1150_v4, %v1149_v19  ;;  %v1161_v24 = vsel %vm371_vm1, %v1159_v9, %v1160_v20 }
 0x102   : > { %v1138_v11 = vsel %vm7097_vm5, %v1136_v47, %v1137_v18  ;;  %v1174_v25 = vsel %vm369_vm0, %v1173_v17, %v1172_v16  ;;  %v1152_v28 = vsel %vm7097_vm5, %v1150_v4, %v1151_v23  ;;  %v1162_v29 = vsel %vm374_vm2, %v1128_v58, %v1161_v24 }
 0x103   : > { %1139 = vrot.lane.b32.xlu0 %v1138_v11, %s4694_s8  ;;  %v1175_v30 = vsel %vm371_vm1, %v1173_v17, %v1174_v25  ;;  %1153 = vrot.lane.b32.xlu1 %v1152_v28, %s4695_s12  ;;  %v1163_v32 = vsel %vm376_vm3, %v1128_v58, %v1162_v29  ;;  %v1207_v34 = vrot.slane %v5637_v22, 7  ;;  %v1210_v38 = vrot.slane %v5645_v26, 6  ;;  %s5755_s8 = scalar_select %p1329_p6, 0, 1 }
 0x104   : > { %v1177_v33 = vsel %vm374_vm2, %v1176_v21, %v1175_v30  ;;  %v1165_v35 = vsel %vm7098_vm4, %v1164_v13, %v1163_v32  ;;  %v1213_v39 = vrot.slane %v5649_v27, 5  ;;  %v1220_v44 = vrot.slane %v4374_v31, 1  ;;  %s4700_s12 = smov 125  }
 0x105   : > { %v1178_v37 = vsel %vm376_vm3, %v1176_v21, %v1177_v33  ;;  %v1166_v40 = vsel %vm7097_vm5, %v1164_v13, %v1165_v35  ;;  %v1208_v43 = vsel %vm369_vm0, %v1207_v34, %v4374_v31  ;;  %v1223_v49 = vrot.slane %v5645_v26, 7  ;;  %p4404_p0 = scmp.eq.s32.totalorder %s5755_s8, 1  ;;  %s4710_s8 = smov 93  }
 0x106   : > { %v1179_v42 = vsel %vm7098_vm4, %v1129_v60, %v1178_v37  ;;  %v1209_v48 = vsel %vm371_vm1, %v1207_v34, %v1208_v43  ;;  %v1226_v50 = vrot.slane %v5649_v27, 6  ;;  %v1221_v52 = vsel %vm369_vm0, %v5637_v22, %v1220_v44 }
 0x107   : > { %1167 = vrot.lane.b32.xlu0 %v1166_v40, %s4696_s6  ;;  %v1180_v45 = vsel %vm7097_vm5, %v1129_v60, %v1179_v42  ;;  %v1211_v51 = vsel %vm374_vm2, %v1210_v38, %v1209_v48  ;;  %v1233_v5 = vrot.slane %v4374_v31, 2  ;;  %v1234_v10 = vrot.slane %v5637_v22, 1  ;;  %s4701_s6 = smov 11  }
 0x108   : > { %1181 = vrot.lane.b32.xlu1 %v1180_v45, %s4697_s7  ;;  %v1212_v53 = vsel %vm376_vm3, %v1210_v38, %v1211_v51  ;;  %v1222_v54 = vsel %vm371_vm1, %v5637_v22, %v1221_v52  ;;  %v1239_v55 = vrot.slane %v5649_v27, 7  ;;  %v1247_v56 = vrot.slane %v4374_v31, 3  ;;  %s4405_s4 = scalar_select %p4404_p0, 255, 0 }
 0x109   : > { %v1214_v57 = vsel %vm7098_vm4, %v1213_v39, %v1212_v53  ;;  %v1224_v58 = vsel %vm374_vm2, %v1223_v49, %v1222_v54  ;;  %v1235_v59 = vsel %vm369_vm0, %v1234_v10, %v1233_v5  ;;  %v1248_v36 = vrot.slane %v5637_v22, 2 }
 0x10a   : > { %v1215_v60 = vsel %vm7097_vm5, %v1213_v39, %v1214_v57  ;;  %v1225_v61 = vsel %vm376_vm3, %v1223_v49, %v1224_v58  ;;  %v1236_v41 = vsel %vm371_vm1, %v1234_v10, %v1235_v59  ;;  %v1251_v46 = vrot.slane %v5645_v26, 1 }
 0x10b   : > { %1216 = vrot.lane.b32.xlu0 %v1215_v60, %s4667_s30  ;;  %v1227_v62 = vsel %vm7098_vm4, %v1226_v50, %v1225_v61  ;;  %v1237_v63 = vsel %vm374_vm2, %v5645_v26, %v1236_v41  ;;  %v1249_v12 = vsel %vm369_vm0, %v1248_v36, %v1247_v56  ;;  %v1261_v0 = vcombine.high %v4374_v31, %v4374_v31  ;;  %s4699_s30 = smov 111  }
 0x10c   : > { %v1228_v2 = vsel %vm7097_vm5, %v1226_v50, %v1227_v62  ;;  %v1238_v3 = vsel %vm376_vm3, %v5645_v26, %v1237_v63  ;;  %v1250_v4 = vsel %vm371_vm1, %v1248_v36, %v1249_v12  ;;  %v1262_v6 = vcombine.high %v5637_v22, %v5637_v22  ;;  %v5798_v63 = vld [vmem:[%s4970_s18 + $0x80] sm:%s4405_s4]  ;;  %v5801_v12 = vld [vmem:[%s4970_s18 + $0x90] sm:%s4405_s4] }
 0x10d   : > { %1229 = vrot.lane.b32.xlu1 %v1228_v2, %s4666_s17  ;;  %v1240_v7 = vsel %vm7098_vm4, %v1239_v55, %v1238_v3  ;;  %v1252_v8 = vsel %vm374_vm2, %v1251_v46, %v1250_v4  ;;  %v5716_v9 = vcombine.high %v5645_v26, %v5645_v26  ;;  %v5720_v13 = vcombine.high %v5649_v27, %v5649_v27  ;;  %s4698_s17 = smov 97   ;;  %v5810_v2 = vld [vmem:[%s4970_s18 + $0x98] sm:%s4405_s4] }
 0x10e   : > { %v5693_v47 = vpop.permute.xlu1 %411  ;;  %v5695_v1 = vpop.permute.xlu0 %383  ;;  %v1241_v14 = vsel %vm7097_vm5, %v1239_v55, %v1240_v7  ;;  %v1253_v15 = vsel %vm376_vm3, %v1251_v46, %v1252_v8  ;;  %v1265_v16 = vrot.slane %v1262_v6, 7  ;;  %v1284_v17 = vrot.slane %v1261_v0, 1 }
 0x10f   : > { %1242 = vrot.lane.b32.xlu0 %v1241_v14, %s4698_s17  ;;  %v1254_v18 = vsel %vm7098_vm4, %v5649_v27, %v1253_v15  ;;  %v1268_v19 = vrot.slane %v5716_v9, 6  ;;  %v1271_v20 = vrot.slane %v5720_v13, 5  ;;  %v1287_v21 = vrot.slane %v5716_v9, 7  ;;  %s4708_s17 = smov 65  }
 0x110   : > { %v1255_v23 = vsel %vm7097_vm5, %v5649_v27, %v1254_v18  ;;  %v1266_v24 = vsel %vm369_vm0, %v1265_v16, %v1261_v0  ;;  %v1285_v25 = vsel %vm369_vm0, %v1262_v6, %v1284_v17  ;;  %v1290_v26 = vrot.slane %v5720_v13, 6 }
 0x111   : > { %1256 = vrot.lane.b32.xlu1 %v1255_v23, %s4699_s30  ;;  %v1267_v28 = vsel %vm371_vm1, %v1265_v16, %v1266_v24  ;;  %v1286_v29 = vsel %vm371_vm1, %v1262_v6, %v1285_v25  ;;  %v1298_v30 = vrot.slane %v1261_v0, 2  ;;  %v1299_v31 = vrot.slane %v1262_v6, 1  ;;  %s4709_s30 = smov 107  }
 0x112   : > { %v5729_v22 = vpop.permute.xlu1 %425  ;;  %v398_v11 = vpop.permute.xlu0 %397  ;;  %v1269_v32 = vsel %vm374_vm2, %v1268_v19, %v1267_v28  ;;  %v1288_v27 = vsel %vm374_vm2, %v1287_v21, %v1286_v29  ;;  %v1304_v33 = vrot.slane %v5720_v13, 7  ;;  %v1312_v34 = vrot.slane %v1261_v0, 3 }
 0x113   : > { %v1270_v35 = vsel %vm376_vm3, %v1268_v19, %v1269_v32  ;;  %v1289_v37 = vsel %vm376_vm3, %v1287_v21, %v1288_v27  ;;  %v1300_v38 = vsel %vm369_vm0, %v1299_v31, %v1298_v30  ;;  %v1313_v39 = vrot.slane %v1262_v6, 2 }
 0x114   : > { %v1272_v42 = vsel %vm7098_vm4, %v1271_v20, %v1270_v35  ;;  %v1291_v43 = vsel %vm7098_vm4, %v1290_v26, %v1289_v37  ;;  %v1301_v44 = vsel %vm371_vm1, %v1299_v31, %v1300_v38  ;;  %v1316_v45 = vrot.slane %v5716_v9, 1 }
 0x115   : > { %v1273_v49 = vsel %vm7097_vm5, %v1271_v20, %v1272_v42  ;;  %v1292_v50 = vsel %vm7097_vm5, %v1290_v26, %v1291_v43  ;;  %v1302_v51 = vsel %vm374_vm2, %v5716_v9, %v1301_v44  ;;  %v1314_v52 = vsel %vm369_vm0, %v1313_v39, %v1312_v34 }
 0x116   : > { %v5748_v40 = vpop.permute.xlu1 %534  ;;  %v5761_v48 = vpop.permute.xlu0 %520  ;;  %1274 = vrot.lane.b32.xlu0 %v1273_v49, %s4700_s12  ;;  %1293 = vrot.lane.b32.xlu1 %v1292_v50, %s4701_s6  ;;  %v1303_v5 = vsel %vm376_vm3, %v5716_v9, %v1302_v51  ;;  %v1315_v10 = vsel %vm371_vm1, %v1313_v39, %v1314_v52  ;;  %v4702_v55 = vmov 0.0   ;;  %v1360_v3 = vrot.slane %v5798_v63, 1  ;;  %s4711_s12 = smov 126   ;;  %s4713_s6 = smov 112  }
 0x117   : > { %v1305_v53 = vsel %vm7098_vm4, %v1304_v33, %v1303_v5  ;;  %v1317_v54 = vsel %vm374_vm2, %v1316_v45, %v1315_v10  ;;  %336 = vst [vmem:[#allocation2] sm:$0xff] %v4702_v55  ;;  %337 = vst [vmem:[#allocation2 + $0x8] sm:$0xff] %v4702_v55  ;;  %3427 = vmatprep.mubr.f32.mxu0 %v4702_v55  ;;  %3498 = vmatprep.mubr.f32.mxu1 %v4702_v55  ;;  %v536_v46 = vrot.slane %v5748_v40, 4 }
 0x118   : > { %338 = vst [vmem:[#allocation2 + $0x10] sm:$0xff] %v4702_v55  ;;  %339 = vst [vmem:[#allocation2 + $0x18] sm:$0xff] %v4702_v55  ;;  %v1306_v57 = vsel %vm7097_vm5, %v1304_v33, %v1305_v53  ;;  %v1318_v58 = vsel %vm376_vm3, %v1316_v45, %v1317_v54  ;;  %v1363_v4 = vrot.slane %v5801_v12, 7  ;;  %v1350_v7 = vrot.slane %v5801_v12, 6 }
 0x119   : > { %340 = vst [vmem:[#allocation2 + $0x20] sm:$0xff] %v4702_v55  ;;  %341 = vst [vmem:[#allocation2 + $0x28] sm:$0xff] %v4702_v55  ;;  %v1319_v36 = vsel %vm7098_vm4, %v5720_v13, %v1318_v58  ;;  %vm616_vm4 = vcmask 626216   ;;  %v1366_v9 = vrot.slane %v5810_v2, 6  ;;  %v1387_v17 = vrot.slane %v5798_v63, 3 }
 0x11a   : > { %v5779_v56 = vpop.permute.xlu1 %567  ;;  %387 = vst.msk [vmem:[#allocation2] sm:$0xf] %vm386_vm6, %v5695_v1  ;;  %v554_v59 = vpop.permute.xlu0 %553  ;;  %1307 = vrot.lane.b32.xlu0 %v1306_v57, %s4703_s9  ;;  %v1320_v60 = vsel %vm7097_vm5, %v5720_v13, %v1319_v36  ;;  %vm488_vm6 = vcmask 183416   ;;  %v538_v1 = vsel %vm537_vm12, %v536_v46, %v5748_v40  ;;  %vm602_vm5 = vcmask 511416   ;;  %s4715_s9 = smov 98  }
 0x11b   : > { %401 = vst.msk [vmem:[#allocation2] sm:$0xf] %vm400_vm7, %v398_v11  ;;  %1321 = vrot.lane.b32.xlu1 %v1320_v60, %s4704_s11  ;;  %vm523_vm7 = vcmask 987016   ;;  %v1353_v13 = vrot.slane %v5810_v2, 5  ;;  %v1373_v11 = vrot.slane %v5798_v63, 2  ;;  %v1379_v31 = vrot.slane %v5810_v2, 7 }
 0x11c   : > { %415 = vst.msk [vmem:[#allocation2] sm:$0xf] %vm414_vm8, %v5693_v47  ;;  %v5804_v47 = vld [vmem:[%s4970_s18 + $0x88] sm:%s4405_s4]  ;;  %vm542_vm8 = vmor %vm541_vm15, %vm540_vm14  ;;  %vm630_vm14 = vcmask 741016   ;;  %vm665_vm15 = vcmask 495016   ;;  %v1401_v44 = vcombine.high %v5798_v63, %v5798_v63  ;;  %v1403_v51 = vcombine.high %v5801_v12, %v5801_v12  ;;  %s4705_s18 = smov 51  }
 0x11d   : > { %429 = vst.msk [vmem:[#allocation2] sm:$0xf] %vm428_vm9, %v5729_v22  ;;  %vm556_vm9 = vcmask 167016   ;;  %v1347_v6 = vrot.slane %v5804_v47, 7  ;;  %v1361_v8 = vsel %vm369_vm0, %v5804_v47, %v1360_v3  ;;  %v1388_v18 = vrot.slane %v5804_v47, 2  ;;  %s4717_s11 = smov 90  }
 0x11e   : > { %v458_v61 = vpop.permute.xlu1 %457  ;;  %v1362_v15 = vsel %vm371_vm1, %v5804_v47, %v1361_v8  ;;  %v1391_v22 = vrot.slane %v5801_v12, 1  ;;  %v1374_v26 = vrot.slane %v5804_v47, 1  ;;  %v1402_v50 = vcombine.high %v5804_v47, %v5804_v47  ;;  %s4718_s4 = smov 92  }
 0x11f   : > { %v1348_v16 = vsel %vm369_vm0, %v1347_v6, %v5798_v63  ;;  %v1364_v20 = vsel %vm374_vm2, %v1363_v4, %v1362_v15  ;;  %v1389_v25 = vsel %vm369_vm0, %v1388_v18, %v1387_v17  ;;  %v1404_v5 = vcombine.high %v5810_v2, %v5810_v2 }
 0x120   : > { %v444_v41 = vpop.permute.xlu0 %443  ;;  %v1349_v21 = vsel %vm371_vm1, %v1347_v6, %v1348_v16  ;;  %v1365_v23 = vsel %vm376_vm3, %v1363_v4, %v1364_v20  ;;  %v1390_v30 = vsel %vm371_vm1, %v1388_v18, %v1389_v25  ;;  %v1375_v35 = vsel %vm369_vm0, %v1374_v26, %v1373_v11 }
 0x121   : > { %447 = vst.msk [vmem:[#allocation2] sm:$0xf] %vm446_vm10, %v444_v41  ;;  %vm570_vm10 = vcmask 281816   ;;  %v1351_v24 = vsel %vm374_vm2, %v1350_v7, %v1349_v21  ;;  %v1392_v34 = vsel %vm374_vm2, %v1391_v22, %v1390_v30  ;;  %v1376_v40 = vsel %vm371_vm1, %v1374_v26, %v1375_v35 }
 0x122   : > { %461 = vst.msk [vmem:[#allocation2] sm:$0xf] %vm460_vm11, %v458_v61  ;;  %v486_v62 = vpop.permute.xlu1 %485  ;;  %vm588_vm11 = vcmask 396616   ;;  %v1352_v29 = vsel %vm376_vm3, %v1350_v7, %v1351_v24  ;;  %v1393_v39 = vsel %vm376_vm3, %v1391_v22, %v1392_v34  ;;  %v1377_v43 = vsel %vm374_vm2, %v5801_v12, %v1376_v40 }
 0x123   : > { %v1378_v49 = vsel %vm376_vm3, %v5801_v12, %v1377_v43  ;;  %v1419_v10 = vrot.slane %v1401_v44, 1  ;;  %v1447_v53 = vrot.slane %v1401_v44, 3  ;;  %v1422_v57 = vrot.slane %v1403_v51, 7 }
 0x124   : > { %v472_v0 = vpop.permute.xlu0 %471  ;;  %v1405_v58 = vrot.slane %v1402_v50, 7  ;;  %v1425_v60 = vrot.slane %v1404_v5, 6  ;;  %v1411_v61 = vrot.slane %v1404_v5, 5  ;;  %v1448_v41 = vrot.slane %v1402_v50, 2 }
 0x125   : > { %475 = vst.msk [vmem:[#allocation2 + $0x4] sm:$0xf] %vm474_vm13, %v472_v0  ;;  %v1420_v36 = vsel %vm369_vm0, %v1402_v50, %v1419_v10  ;;  %v1451_v12 = vrot.slane %v1403_v51, 1  ;;  %v1433_v0 = vrot.slane %v1401_v44, 2  ;;  %v1434_v3 = vrot.slane %v1402_v50, 1 }
 0x126   : > { %489 = vst.msk [vmem:[#allocation2 + $0x4] sm:$0xf] %vm488_vm6, %v486_v62  ;;  %v1421_v62 = vsel %vm371_vm1, %v1402_v50, %v1420_v36  ;;  %v1406_v63 = vsel %vm369_vm0, %v1405_v58, %v1401_v44  ;;  %v1439_v8 = vrot.slane %v1404_v5, 7 }
 0x127   : > { %524 = vst.msk [vmem:[#allocation2 + $0x4] sm:$0xf] %vm523_vm7, %v5761_v48  ;;  %vm679_vm7 = vcmask 609816   ;;  %v1423_v47 = vsel %vm374_vm2, %v1422_v57, %v1421_v62  ;;  %v1435_v16 = vsel %vm369_vm0, %v1434_v3, %v1433_v0 }
 0x128   : > { %543 = vst.msk [vmem:[#allocation2 + $0x4] sm:$0xff] %vm542_vm8, %v538_v1  ;;  %vm7149_vm8 = vcmask 1043459   ;;  %v1407_v1 = vsel %vm371_vm1, %v1405_v58, %v1406_v63  ;;  %v1424_v4 = vsel %vm376_vm3, %v1422_v57, %v1423_v47  ;;  %v1436_v21 = vsel %vm371_vm1, %v1434_v3, %v1435_v16 }
 0x129   : > { %v600_v14 = vpop.permute.xlu1 %599  ;;  %557 = vst.msk [vmem:[#allocation2 + $0x8] sm:$0xf] %vm556_vm9, %v554_v59  ;;  %v586_v19 = vpop.permute.xlu0 %585  ;;  %v1367_v28 = vsel %vm7149_vm8, %v1366_v9, %v1365_v23  ;;  %vm7150_vm9 = vcmask 1047559   ;;  %v1408_v59 = vrot.slane %v1403_v51, 6  ;;  %v1437_v23 = vsel %vm374_vm2, %v1403_v51, %v1436_v21 }
 0x12a   : > { %571 = vst.msk [vmem:[#allocation2 + $0x8] sm:$0xf] %vm570_vm10, %v5779_v56  ;;  %v1368_v27 = vsel %vm7150_vm9, %v1366_v9, %v1367_v28  ;;  %vm7151_vm10 = vmmov %vm7149_vm8  ;;  %vm707_vm8 = vcmask 839416   ;;  %v1438_v25 = vsel %vm376_vm3, %v1403_v51, %v1437_v23 }
 0x12b   : > { %589 = vst.msk [vmem:[#allocation2 + $0x8] sm:$0xf] %vm588_vm11, %v586_v19  ;;  %v1354_v33 = vsel %vm7151_vm10, %v1353_v13, %v1352_v29  ;;  %vm693_vm11 = vcmask 724616   ;;  %1369 = vrot.lane.b32.xlu1 %v1368_v27, %s4675_s3  ;;  %v1409_v6 = vsel %vm374_vm2, %v1408_v59, %v1407_v1  ;;  %s4707_s3 = smov 79  }
 0x12c   : > { %603 = vst.msk [vmem:[#allocation2 + $0x8] sm:$0xf] %vm602_vm5, %v600_v14  ;;  %vm7152_vm5 = vmmov %vm7150_vm9  ;;  %v1410_v14 = vsel %vm376_vm3, %v1408_v59, %v1409_v6 }
 0x12d   : > { %v628_v32 = vpop.permute.xlu1 %627  ;;  %v1355_v38 = vsel %vm7152_vm5, %v1353_v13, %v1354_v33  ;;  %vm7153_vm9 = vmmov %vm7151_vm10 }
 0x12e   : > { %v614_v37 = vpop.permute.xlu0 %613  ;;  %1356 = vrot.lane.b32.xlu0 %v1355_v38, %s4674_s13  ;;  %v1394_v42 = vsel %vm7153_vm9, %v5810_v2, %v1393_v39  ;;  %vm7154_vm10 = vmmov %vm7152_vm5  ;;  %s4706_s13 = smov 37  }
 0x12f   : > { %617 = vst.msk [vmem:[#allocation2 + $0x8] sm:$0xf] %vm616_vm4, %v614_v37  ;;  %v5861_v45 = vld [vmem:[#allocation2] sm:$0xff]  ;;  %v1395_v48 = vsel %vm7154_vm10, %v5810_v2, %v1394_v42  ;;  %vm7155_vm5 = vmmov %vm7153_vm9  ;;  %v1449_v2 = vsel %vm369_vm0, %v1448_v41, %v1447_v53 }
 0x130   : > { %631 = vst.msk [vmem:[#allocation2 + $0x8] sm:$0xf] %vm630_vm14, %v628_v32  ;;  %1481 = vst [vmem:[#allocation3] sm:$0xf] %v5861_v45  ;;  %v1380_v52 = vsel %vm7155_vm5, %v1379_v31, %v1378_v49  ;;  %1396 = vrot.lane.b32.xlu1 %v1395_v48, %s4705_s18  ;;  %v1450_v7 = vsel %vm371_vm1, %v1448_v41, %v1449_v2  ;;  %vm742_vm1 = vcmask 1044440   ;;  %v1471_v32 = vcombine.high %v5861_v45, %v5861_v45  ;;  %v5931_v63 = vld [vmem:[#allocation2] sm:$0xff] }
 0x131   : > { %v677_v54 = vpop.permute.xlu1 %676  ;;  %vm7156_vm9 = vmmov %vm7154_vm10  ;;  %v1452_v15 = vsel %vm374_vm2, %v1451_v12, %v1450_v7  ;;  %v5948_v2 = vcombine.low %v5931_v63, %v5931_v63  ;;  %s4719_s18 = smov 105  }
 0x132   : > { %v1381_v56 = vsel %vm7156_vm9, %v1379_v31, %v1380_v52  ;;  %vm7157_vm10 = vmmov %vm7155_vm5  ;;  %v1453_v20 = vsel %vm376_vm3, %v1451_v12, %v1452_v15  ;;  %vm772_vm3 = vcmask 249016   ;;  %1482 = vst [vmem:[#allocation3 + $0x8] sm:$0xf] %v1471_v32 }
 0x133   : > { %1382 = vrot.lane.b32.xlu0 %v1381_v56, %s4706_s13  ;;  %v663_v46 = vpop.permute.xlu0 %662  ;;  %v1426_v13 = vsel %vm7157_vm10, %v1425_v60, %v1424_v4  ;;  %vm725_vm10 = vcmask 954216   ;;  %s4720_s13 = smov 104  }
 0x134   : > { %666 = vst.msk [vmem:[#allocation2 + $0xc] sm:$0xf] %vm665_vm15, %v663_v46  ;;  %vm7158_vm15 = vmmov %vm7156_vm9 }
 0x135   : > { %680 = vst.msk [vmem:[#allocation2 + $0xc] sm:$0xf] %vm679_vm7, %v677_v54  ;;  %v705_v9 = vpop.permute.xlu1 %704  ;;  %v1427_v18 = vsel %vm7158_vm15, %v1425_v60, %v1426_v13  ;;  %vm7159_vm7 = vmmov %vm7155_vm5  ;;  %vm743_vm15 = vcmask 23556  }
 0x136   : > { %v1412_v19 = vsel %vm7159_vm7, %v1411_v61, %v1410_v14  ;;  %1428 = vrot.lane.b32.xlu1 %v1427_v18, %s4707_s3  ;;  %vm7160_vm5 = vmmov %vm7156_vm9  ;;  %s4721_s3 = smov 118  }
 0x137   : > { %v691_v17 = vpop.permute.xlu0 %690  ;;  %v1413_v22 = vsel %vm7160_vm5, %v1411_v61, %v1412_v19  ;;  %vm7161_vm9 = vmmov %vm7159_vm7 }
 0x138   : > { %694 = vst.msk [vmem:[#allocation2 + $0xc] sm:$0xf] %vm693_vm11, %v691_v17  ;;  %v1454_v11 = vsel %vm7161_vm9, %v1404_v5, %v1453_v20  ;;  %1414 = vrot.lane.b32.xlu0 %v1413_v22, %s4708_s17  ;;  %vm7162_vm0 = vmmov %vm7160_vm5  ;;  %vm739_vm5 = vcmask 1006592   ;;  %vm808_vm9 = vcmask 1044424   ;;  %v5965_v22 = vcombine.high %v5931_v63, %v5931_v63  ;;  %s4722_s17 = smov 106  }
 0x139   : > { %708 = vst.msk [vmem:[#allocation2 + $0xc] sm:$0xf] %vm707_vm8, %v705_v9  ;;  %v1455_v24 = vsel %vm7162_vm0, %v1404_v5, %v1454_v11  ;;  %vm7163_vm11 = vmmov %vm7159_vm7  ;;  %vm758_vm8 = vcmask 134216  }
 0x13a   : > { %v1440_v26 = vsel %vm7163_vm11, %v1439_v8, %v1438_v25  ;;  %vm7164_vm7 = vmmov %vm7162_vm0  ;;  %1456 = vrot.lane.b32.xlu1 %v1455_v24, %s4709_s30  ;;  %vm809_vm0 = vcmask 7172   ;;  %vm838_vm11 = vcmask 232616   ;;  %s4723_s30 = smov 120  }
 0x13b   : > { %v1441_v28 = vsel %vm7164_vm7, %v1439_v8, %v1440_v26  ;;  %vm744_vm2 = vmor %vm743_vm15, %vm742_vm1  ;;  %vm805_vm1 = vcmask 990208   ;;  %vm824_vm15 = vcmask 117816   ;;  %vm852_vm7 = vcmask 347416  }
 0x13c   : > { %v737_v29 = vpop.permute.xlu1 %736  ;;  %v723_v30 = vpop.permute.xlu0 %722  ;;  %1442 = vrot.lane.b32.xlu0 %v1441_v28, %s4710_s8  ;;  %s4724_s8 = smov 119  }
 0x13d   : > { %v738_v31 = vrot.slane %v737_v29, 4  ;;  %726 = vst.msk [vmem:[#allocation2 + $0xc] sm:$0xf] %vm725_vm10, %v723_v30  ;;  %vm810_vm10 = vmor %vm809_vm0, %vm808_vm9  ;;  %vm898_vm9 = vcmask 691816   ;;  %vm912_vm0 = vcmask 806616  }
 0x13f   : > { %v740_v27 = vsel %vm739_vm5, %v738_v31, %v737_v29  ;;  %vm870_vm5 = vcmask 462216  }
 0x140   : > { %745 = vst.msk [vmem:[#allocation2 + $0xc] sm:$0xff] %vm744_vm2, %v740_v27  ;;  %v756_v33 = vpop.permute.xlu0 %755  ;;  %vm884_vm2 = vcmask 577016  }
 0x141   : > { %759 = vst.msk [vmem:[#allocation2 + $0x10] sm:$0xf] %vm758_vm8, %v756_v33  ;;  %v770_v34 = vpop.permute.xlu1 %769 }
 0x142   : > { %773 = vst.msk [vmem:[#allocation2 + $0x10] sm:$0xf] %vm772_vm3, %v770_v34 }
 0x144   : > { %v803_v35 = vpop.permute.xlu0 %802 }
 0x145   : > { %v804_v37 = vrot.slane %v803_v35, 4 }
 0x146   : > { %v822_v39 = vpop.permute.xlu1 %821 }
 0x147   : > { %v806_v38 = vsel %vm805_vm1, %v804_v37, %v803_v35  ;;  %v1462_v40 = vld [vmem:[#allocation2 + $0x8] sm:$0xff]  ;;  %vm947_vm1 = vcmask 560616  }
 0x148   : > { %811 = vst.msk [vmem:[#allocation2 + $0x10] sm:$0xff] %vm810_vm10, %v806_v38  ;;  %v1472_v42 = vcombine.high %v1462_v40, %v1462_v40  ;;  %1483 = vst [vmem:[#allocation3 + $0x10] sm:$0xf] %v1462_v40  ;;  %v836_v43 = vpop.permute.xlu0 %835  ;;  %vm961_vm10 = vcmask 675416   ;;  %v5972_v11 = vld [vmem:[#allocation2 + $0x8] sm:$0xff] }
 0x149   : > { %825 = vst.msk [vmem:[#allocation2 + $0x14] sm:$0xf] %vm824_vm15, %v822_v39  ;;  %vm975_vm15 = vcmask 790216   ;;  %v5978_v23 = vcombine.low %v5972_v11, %v5972_v11  ;;  %v5984_v25 = vcombine.high %v5972_v11, %v5972_v11 }
 0x14a   : > { %839 = vst.msk [vmem:[#allocation2 + $0x14] sm:$0xf] %vm838_vm11, %v836_v43  ;;  %1484 = vst [vmem:[#allocation3 + $0x18] sm:$0xf] %v1472_v42  ;;  %v850_v44 = vpop.permute.xlu1 %849  ;;  %vm989_vm11 = vcmask 905016  }
 0x14b   : > { %853 = vst.msk [vmem:[#allocation2 + $0x14] sm:$0xf] %vm852_vm7, %v850_v44  ;;  %vm1007_vm7 = vcmask 1019816  }
 0x14f   : > { %v868_v45 = vpop.permute.xlu0 %867  ;;  %v882_v48 = vpop.permute.xlu1 %881 }
 0x150   : > { %871 = vst.msk [vmem:[#allocation2 + $0x14] sm:$0xf] %vm870_vm5, %v868_v45  ;;  %vm1021_vm5 = vcmask 85016  }
 0x151   : > { %885 = vst.msk [vmem:[#allocation2 + $0x14] sm:$0xf] %vm884_vm2, %v882_v48  ;;  %vm1035_vm2 = vcmask 199816  }
 0x153   : > { %v896_v49 = vpop.permute.xlu0 %895 }
 0x154   : > { %899 = vst.msk [vmem:[#allocation2 + $0x14] sm:$0xf] %vm898_vm9, %v896_v49  ;;  %v910_v50 = vpop.permute.xlu1 %909  ;;  %vm1049_vm9 = vcmask 314616  }
 0x155   : > { %913 = vst.msk [vmem:[#allocation2 + $0x14] sm:$0xf] %vm912_vm0, %v910_v50  ;;  %vm1110_vm0 = vcmask 298216  }
 0x157   : > { %v945_v51 = vpop.permute.xlu0 %944 }
 0x158   : > { %948 = vst.msk [vmem:[#allocation2 + $0x18] sm:$0xf] %vm947_vm1, %v945_v51  ;;  %vm1124_vm1 = vcmask 413016  }
 0x159   : > { %v959_v52 = vpop.permute.xlu1 %958 }
 0x15a   : > { %962 = vst.msk [vmem:[#allocation2 + $0x18] sm:$0xf] %vm961_vm10, %v959_v52  ;;  %vm342_vm10 = vcmask 1043456  }
 0x15b   : > { %v973_v10 = vpop.permute.xlu0 %972 }
 0x15c   : > { %v5909_v5 = vld [vmem:[#allocation2 + $0x10] sm:$0xff]  ;;  %976 = vst.msk [vmem:[#allocation2 + $0x18] sm:$0xf] %vm975_vm15, %v973_v10  ;;  %vm1170_vm15 = vcmask 757416  }
 0x15d   : > { %1485 = vst [vmem:[#allocation3 + $0x20] sm:$0xf] %v5909_v5  ;;  %v5914_v53 = vcombine.high %v5909_v5, %v5909_v5  ;;  %v987_v54 = vpop.permute.xlu1 %986  ;;  %v5996_v30 = vcombine.low %v5909_v5, %v5909_v5 }
 0x15e   : > { %990 = vst.msk [vmem:[#allocation2 + $0x18] sm:$0xf] %vm989_vm11, %v987_v54  ;;  %vm1184_vm11 = vcmask 872216  }
 0x15f   : > { %1486 = vst [vmem:[#allocation3 + $0x28] sm:$0xf] %v5914_v53 }
 0x162   : > { %v1005_v56 = vpop.permute.xlu0 %1004  ;;  %v1019_v57 = vpop.permute.xlu1 %1018 }
 0x163   : > { %1008 = vst.msk [vmem:[#allocation2 + $0x18] sm:$0xf] %vm1007_vm7, %v1005_v56  ;;  %vm343_vm7 = vcmask 818180  }
 0x164   : > { %1022 = vst.msk [vmem:[#allocation2 + $0x1c] sm:$0xf] %vm1021_vm5, %v1019_v57  ;;  %vm344_vm5 = vmor %vm343_vm7, %vm342_vm10  ;;  %vm1385_vm7 = vcmask 363816  }
 0x165   : > { %345 = vst.msk [vmem:[#allocation2 + $0x30] sm:$0xff] %vm344_vm5, %v4702_v55  ;;  %vm1399_vm5 = vcmask 478616  }
 0x166   : > { %v1033_v58 = vpop.permute.xlu0 %1032 }
 0x167   : > { %1036 = vst.msk [vmem:[#allocation2 + $0x1c] sm:$0xf] %vm1035_vm2, %v1033_v58  ;;  %v1047_v59 = vpop.permute.xlu1 %1046  ;;  %vm1245_vm2 = vcmask 855816  }
 0x168   : > { %1050 = vst.msk [vmem:[#allocation2 + $0x1c] sm:$0xf] %vm1049_vm9, %v1047_v59  ;;  %vm1259_vm9 = vcmask 970616  }
 0x16a   : > { %v1082_v36 = vpop.permute.xlu0 %1081 }
 0x16b   : > { %1084 = vst.msk [vmem:[#allocation2 + $0x20] sm:$0xf] %vm474_vm13, %v1082_v36  ;;  %vm1142_vm13 = vcmask 527816  }
 0x16c   : > { %v1095_v60 = vpop.permute.xlu1 %1094 }
 0x16d   : > { %1097 = vst.msk [vmem:[#allocation2 + $0x20] sm:$0xf] %vm488_vm6, %v1095_v60  ;;  %vm1156_vm6 = vcmask 642616  }
 0x16e   : > { %v1108_v41 = vpop.permute.xlu0 %1107 }
 0x16f   : > { %v5919_v61 = vld [vmem:[#allocation2 + $0x18] sm:$0xff]  ;;  %1111 = vst.msk [vmem:[#allocation2 + $0x20] sm:$0xf] %vm1110_vm0, %v1108_v41  ;;  %vm1280_vm0 = vcmask 1044456  }
 0x170   : > { %1487 = vst [vmem:[#allocation3 + $0x30] sm:$0xf] %v5919_v61  ;;  %1584 = vrot.lane.b32.xlu0 %v5919_v61, %s4711_s12  ;;  %1521 = vrot.lane.b32.xlu1 %v5919_v61, %s4656_s10  ;;  %v5928_v46 = vcombine.high %v5919_v61, %v5919_v61  ;;  %v1122_v62 = vpop.permute.xlu1 %1121  ;;  %v5939_v0 = vcombine.low %v5919_v61, %v5919_v61 }
 0x171   : > { %1125 = vst.msk [vmem:[#allocation2 + $0x20] sm:$0xf] %vm1124_vm1, %v1122_v62  ;;  %vm1281_vm1 = vcmask 39940  }
 0x172   : > { %1488 = vst [vmem:[#allocation3 + $0x38] sm:$0xf] %v5928_v46 }
 0x174   : > { %1572 = vrot.lane.b32.xlu0 %v5931_v63, %s4711_s12  ;;  %1509 = vrot.lane.b32.xlu1 %v5931_v63, %s4656_s10 }
 0x175   : > { %v1140_v12 = vpop.permute.xlu0 %1139  ;;  %v1154_v47 = vpop.permute.xlu1 %1153 }
 0x176   : > { %1143 = vst.msk [vmem:[#allocation2 + $0x20] sm:$0xf] %vm1142_vm13, %v1140_v12  ;;  %vm1277_vm13 = vcmask 1022976  }
 0x177   : > { %1157 = vst.msk [vmem:[#allocation2 + $0x20] sm:$0xf] %vm1156_vm6, %v1154_v47  ;;  %vm1282_vm6 = vmor %vm1281_vm1, %vm1280_vm0  ;;  %vm1592_vm0 = vcmask 1031168   ;;  %vm7100_vm1 = vcmask 195588  }
 0x178   : > { %1519 = vrot.lane.b32.xlu0 %v5939_v0, %s4656_s10  ;;  %1586 = vrot.lane.b32.xlu1 %v5928_v46, %s4711_s12 }
 0x179   : > { %v1168_v1 = vpop.permute.xlu0 %1167 }
 0x17a   : > { %1171 = vst.msk [vmem:[#allocation2 + $0x20] sm:$0xf] %vm1170_vm15, %v1168_v1  ;;  %v1182_v3 = vpop.permute.xlu1 %1181  ;;  %vm1296_vm15 = vcmask 150616  }
 0x17b   : > { %1185 = vst.msk [vmem:[#allocation2 + $0x20] sm:$0xf] %vm1184_vm11, %v1182_v3  ;;  %vm1310_vm11 = vcmask 265416  }
 0x17c   : > { %1507 = vrot.lane.b32.xlu0 %v5948_v2, %s4656_s10 }
 0x17d   : > { %v1217_v4 = vpop.permute.xlu0 %1216 }
 0x17e   : > { %1219 = vst.msk [vmem:[#allocation2 + $0x24] sm:$0xf] %vm616_vm4, %v1217_v4  ;;  %vm1324_vm4 = vcmask 380216  }
 0x17f   : > { %v1230_v6 = vpop.permute.xlu1 %1229 }
 0x180   : > { %1232 = vst.msk [vmem:[#allocation2 + $0x24] sm:$0xf] %vm630_vm14, %v1230_v6  ;;  %vm7101_vm14 = vcmask 191488  }
 0x181   : > { %v1243_v7 = vpop.permute.xlu0 %1242 }
 0x182   : > { %1246 = vst.msk [vmem:[#allocation2 + $0x24] sm:$0xf] %vm1245_vm2, %v1243_v7  ;;  %vm1445_vm2 = vcmask 823016  }
 0x183   : > { %v1257_v8 = vpop.permute.xlu1 %1256 }
 0x184   : > { %1260 = vst.msk [vmem:[#allocation2 + $0x24] sm:$0xf] %vm1259_vm9, %v1257_v8  ;;  %vm1459_vm9 = vcmask 937816  }
 0x188   : > { %v1275_v9 = vpop.permute.xlu0 %1274  ;;  %v1294_v13 = vpop.permute.xlu1 %1293 }
 0x189   : > { %v1276_v14 = vrot.slane %v1275_v9, 4 }
 0x18b   : > { %v1278_v15 = vsel %vm1277_vm13, %v1276_v14, %v1275_v9  ;;  %vm1722_vm13 = vcmask 924672  }
 0x18c   : > { %1283 = vst.msk [vmem:[#allocation2 + $0x24] sm:$0xff] %vm1282_vm6, %v1278_v15  ;;  %v1308_v16 = vpop.permute.xlu0 %1307  ;;  %vm1787_vm6 = vcmask 916480  }
 0x18d   : > { %1297 = vst.msk [vmem:[#allocation2 + $0x28] sm:$0xf] %vm1296_vm15, %v1294_v13  ;;  %v1322_v17 = vpop.permute.xlu1 %1321  ;;  %vm1852_vm15 = vcmask 818176  }
 0x18e   : > { %1311 = vst.msk [vmem:[#allocation2 + $0x28] sm:$0xf] %vm1310_vm11, %v1308_v16  ;;  %vm1917_vm11 = vcmask 809984  }
 0x18f   : > { %1325 = vst.msk [vmem:[#allocation2 + $0x28] sm:$0xf] %vm1324_vm4, %v1322_v17  ;;  %vm1982_vm4 = vcmask 801792  }
 0x193   : > { %v5955_v18 = vld [vmem:[#allocation2 + $0x20] sm:$0xff] }
 0x194   : > { %v1465_v19 = vld [vmem:[#allocation2 + $0x20] sm:$0xff]  ;;  %v5959_v20 = vcombine.low %v5955_v18, %v5955_v18  ;;  %1525 = vrot.lane.b32.xlu1 %v5955_v18, %s4656_s10  ;;  %v6006_v27 = vcombine.high %v5955_v18, %v5955_v18 }
 0x195   : > { %v1475_v21 = vcombine.high %v1465_v19, %v1465_v19  ;;  %1489 = vst [vmem:[#allocation3 + $0x40] sm:$0xf] %v1465_v19  ;;  %v6138_v19 = vld [vmem:[#allocation2 + $0xc] sm:$0xff] }
 0x196   : > { %1523 = vrot.lane.b32.xlu0 %v5959_v20, %s4656_s10 }
 0x197   : > { %1491 = vst.msk [vmem:[#allocation3 + $0x48] sm:$0xf] %vm7101_vm14, %v1475_v21 }
 0x198   : > { %1574 = vrot.lane.b32.xlu1 %v5965_v22, %s4711_s12 }
 0x19a   : > { %1576 = vrot.lane.b32.xlu0 %v5972_v11, %s4711_s12 }
 0x19c   : > { %1513 = vrot.lane.b32.xlu1 %v5972_v11, %s4656_s10 }
 0x19d   : > { %v1370_v24 = vpop.permute.xlu1 %1369 }
 0x19e   : > { %1511 = vrot.lane.b32.xlu0 %v5978_v23, %s4656_s10 }
 0x1a0   : > { %v1357_v26 = vpop.permute.xlu0 %1356  ;;  %1578 = vrot.lane.b32.xlu1 %v5984_v25, %s4711_s12 }
 0x1a1   : > { %1359 = vst.msk [vmem:[#allocation2 + $0x2c] sm:$0xf] %vm758_vm8, %v1357_v26  ;;  %vm1417_vm8 = vcmask 593416  }
 0x1a2   : > { %1372 = vst.msk [vmem:[#allocation2 + $0x2c] sm:$0xf] %vm772_vm3, %v1370_v24  ;;  %1580 = vrot.lane.b32.xlu0 %v5909_v5, %s4711_s12  ;;  %v1397_v28 = vpop.permute.xlu1 %1396  ;;  %vm1431_vm3 = vcmask 708216  }
 0x1a4   : > { %1517 = vrot.lane.b32.xlu1 %v5909_v5, %s4656_s10 }
 0x1a5   : > { %v1383_v29 = vpop.permute.xlu0 %1382 }
 0x1a6   : > { %1386 = vst.msk [vmem:[#allocation2 + $0x2c] sm:$0xf] %vm1385_vm7, %v1383_v29  ;;  %1515 = vrot.lane.b32.xlu0 %v5996_v30, %s4656_s10  ;;  %s4712_s10 = smov 114   ;;  %vm7099_vm7 = vcmask 490496  }
 0x1a7   : > { %1400 = vst.msk [vmem:[#allocation2 + $0x2c] sm:$0xf] %vm1399_vm5, %v1397_v28  ;;  %vm3152_vm5 = vcmask 736256  }
 0x1a8   : > { %1582 = vrot.lane.b32.xlu1 %v5914_v53, %s4711_s12  ;;  %v1429_v31 = vpop.permute.xlu1 %1428 }
 0x1aa   : > { %v1415_v32 = vpop.permute.xlu0 %1414  ;;  %1588 = vrot.lane.b32.xlu0 %v5955_v18, %s4711_s12 }
 0x1ab   : > { %1418 = vst.msk [vmem:[#allocation2 + $0x2c] sm:$0xf] %vm1417_vm8, %v1415_v32  ;;  %vm7110_vm8 = vcmask 752640  }
 0x1ac   : > { %1432 = vst.msk [vmem:[#allocation2 + $0x2c] sm:$0xf] %vm1431_vm3, %v1429_v31  ;;  %1590 = vrot.lane.b32.xlu1 %v6006_v27, %s4711_s12  ;;  %v1457_v34 = vpop.permute.xlu1 %1456  ;;  %s4725_s12 = smov 30   ;;  %vm3087_vm3 = vcmask 744448  }
 0x1ae   : > { %v1443_v33 = vpop.permute.xlu0 %1442  ;;  %1637 = vrot.lane.b32.xlu0 %v5948_v2, %s4712_s10 }
 0x1af   : > { %1446 = vst.msk [vmem:[#allocation2 + $0x2c] sm:$0xf] %vm1445_vm2, %v1443_v33  ;;  %vm2892_vm2 = vcmask 859136  }
 0x1b0   : > { %1460 = vst.msk [vmem:[#allocation2 + $0x2c] sm:$0xf] %vm1459_vm9, %v1457_v34  ;;  %1639 = vrot.lane.b32.xlu1 %v5931_v63, %s4712_s10  ;;  %vm2957_vm9 = vcmask 850944  }
 0x1b2   : > { %1641 = vrot.lane.b32.xlu0 %v5978_v23, %s4712_s10 }
 0x1b4   : > { %1643 = vrot.lane.b32.xlu1 %v5972_v11, %s4712_s10 }
 0x1b6   : > { %1645 = vrot.lane.b32.xlu0 %v5996_v30, %s4712_s10 }
 0x1b8   : > { %1647 = vrot.lane.b32.xlu1 %v5909_v5, %s4712_s10 }
 0x1ba   : > { %1649 = vrot.lane.b32.xlu0 %v5939_v0, %s4712_s10 }
 0x1bc   : > { %1651 = vrot.lane.b32.xlu1 %v5919_v61, %s4712_s10 }
 0x1be   : > { %1653 = vrot.lane.b32.xlu0 %v5959_v20, %s4712_s10 }
 0x1c0   : > { %1655 = vrot.lane.b32.xlu1 %v5955_v18, %s4712_s10  ;;  %s4726_s10 = smov 44  }
 0x1c2   : > { %1702 = vrot.lane.b32.xlu0 %v5931_v63, %s4657_s5 }
 0x1c4   : > { %1704 = vrot.lane.b32.xlu1 %v5965_v22, %s4657_s5 }
 0x1c6   : > { %1706 = vrot.lane.b32.xlu0 %v5972_v11, %s4657_s5 }
 0x1c8   : > { %1708 = vrot.lane.b32.xlu1 %v5984_v25, %s4657_s5 }
 0x1ca   : > { %1710 = vrot.lane.b32.xlu0 %v5909_v5, %s4657_s5 }
 0x1cc   : > { %1712 = vrot.lane.b32.xlu1 %v5914_v53, %s4657_s5 }
 0x1ce   : > { %1714 = vrot.lane.b32.xlu0 %v5919_v61, %s4657_s5 }
 0x1d0   : > { %1716 = vrot.lane.b32.xlu1 %v5928_v46, %s4657_s5 }
 0x1d2   : > { %1718 = vrot.lane.b32.xlu0 %v5955_v18, %s4657_s5 }
 0x1d4   : > { %1720 = vrot.lane.b32.xlu1 %v6006_v27, %s4657_s5  ;;  %s4714_s5 = smov 100  }
 0x1d6   : > { %1767 = vrot.lane.b32.xlu0 %v5948_v2, %s4713_s6 }
 0x1d8   : > { %1769 = vrot.lane.b32.xlu1 %v5931_v63, %s4713_s6 }
 0x1da   : > { %1771 = vrot.lane.b32.xlu0 %v5978_v23, %s4713_s6 }
 0x1dc   : > { %1773 = vrot.lane.b32.xlu1 %v5972_v11, %s4713_s6 }
 0x1de   : > { %1775 = vrot.lane.b32.xlu0 %v5996_v30, %s4713_s6 }
 0x1e0   : > { %1777 = vrot.lane.b32.xlu1 %v5909_v5, %s4713_s6 }
 0x1e2   : > { %v6048_v35 = vpop.permute.xlu0 %1584  ;;  %v1522_v37 = vpop.permute.xlu1 %1521  ;;  %1779 = vrot.lane.b32.xlu0 %v5939_v0, %s4713_s6 }
 0x1e4   : > { %1781 = vrot.lane.b32.xlu1 %v5919_v61, %s4713_s6 }
 0x1e6   : > { %v1573_v38 = vpop.permute.xlu0 %1572  ;;  %v1510_v39 = vpop.permute.xlu1 %1509  ;;  %1783 = vrot.lane.b32.xlu0 %v5959_v20, %s4713_s6 }
 0x1e8   : > { %1785 = vrot.lane.b32.xlu1 %v5955_v18, %s4713_s6  ;;  %s4727_s6 = smov 32  }
 0x1ea   : > { %v1520_v40 = vpop.permute.xlu0 %1519  ;;  %v6054_v42 = vpop.permute.xlu1 %1586  ;;  %1832 = vrot.lane.b32.xlu0 %v5931_v63, %s4714_s5 }
 0x1eb   : > { %v1533_v43 = vsel %vm537_vm12, %v1520_v40, %v1522_v37  ;;  %v1599_v44 = vsel %vm1592_vm0, %v6048_v35, %v6054_v42 }
 0x1ec   : > { %1552 = vst [vmem:[#allocation3 + $0x30] sm:$0xf0] %v1533_v43  ;;  %1618 = vst [vmem:[#allocation3 + $0x80] sm:$0xf] %v1599_v44  ;;  %1834 = vrot.lane.b32.xlu1 %v5965_v22, %s4714_s5 }
 0x1ee   : > { %v1508_v45 = vpop.permute.xlu0 %1507  ;;  %1836 = vrot.lane.b32.xlu0 %v5972_v11, %s4714_s5 }
 0x1ef   : > { %v1527_v48 = vsel %vm537_vm12, %v1508_v45, %v1510_v39 }
 0x1f0   : > { %1546 = vst [vmem:[#allocation3] sm:$0xf0] %v1527_v48  ;;  %1838 = vrot.lane.b32.xlu1 %v5984_v25, %s4714_s5 }
 0x1f2   : > { %1840 = vrot.lane.b32.xlu0 %v5909_v5, %s4714_s5 }
 0x1f4   : > { %1842 = vrot.lane.b32.xlu1 %v5914_v53, %s4714_s5 }
 0x1f6   : > { %1844 = vrot.lane.b32.xlu0 %v5919_v61, %s4714_s5 }
 0x1f8   : > { %1846 = vrot.lane.b32.xlu1 %v5928_v46, %s4714_s5 }
 0x1fa   : > { %1848 = vrot.lane.b32.xlu0 %v5955_v18, %s4714_s5 }
 0x1fc   : > { %1850 = vrot.lane.b32.xlu1 %v6006_v27, %s4714_s5  ;;  %s4728_s5 = smov 46  }
 0x1fe   : > { %1897 = vrot.lane.b32.xlu0 %v5948_v2, %s4697_s7 }
 0x200   : > { %1899 = vrot.lane.b32.xlu1 %v5931_v63, %s4697_s7 }
 0x202   : > { %1901 = vrot.lane.b32.xlu0 %v5978_v23, %s4697_s7  ;;  %v6150_v23 = vld [vmem:[#allocation2 + $0x14] sm:$0xff] }
 0x203   : > { %v6159_v28 = vcombine.low %v6150_v23, %v6150_v23 }
 0x204   : > { %1903 = vrot.lane.b32.xlu1 %v5972_v11, %s4697_s7 }
 0x206   : > { %v1526_v49 = vpop.permute.xlu1 %1525  ;;  %1905 = vrot.lane.b32.xlu0 %v5996_v30, %s4697_s7  ;;  %v6162_v30 = vld [vmem:[#allocation2 + $0x1c] sm:$0xff] }
 0x207   : > { %1556 = vst.msk [vmem:[#allocation3 + $0x48] sm:$0xf0] %vm7100_vm1, %v1526_v49  ;;  %v6171_v33 = vcombine.low %v6162_v30, %v6162_v30 }
 0x208   : > { %1907 = vrot.lane.b32.xlu1 %v5909_v5, %s4697_s7  ;;  %v1524_v50 = vpop.permute.xlu0 %1523 }
 0x209   : > { %v1534_v51 = vsel %vm537_vm12, %v1522_v37, %v1524_v50  ;;  %v1535_v52 = vsel %vm537_vm12, %v1524_v50, %v1526_v49 }
 0x20a   : > { %1553 = vst [vmem:[#allocation3 + $0x38] sm:$0xf0] %v1534_v51  ;;  %1554 = vst [vmem:[#allocation3 + $0x40] sm:$0xf0] %v1535_v52  ;;  %v1575_v10 = vpop.permute.xlu1 %1574  ;;  %1909 = vrot.lane.b32.xlu0 %v5939_v0, %s4697_s7 }
 0x20b   : > { %v1593_v54 = vsel %vm1592_vm0, %v1573_v38, %v1575_v10 }
 0x20c   : > { %1612 = vst [vmem:[#allocation3 + $0x50] sm:$0xf] %v1593_v54  ;;  %1911 = vrot.lane.b32.xlu1 %v5919_v61, %s4697_s7  ;;  %v1577_v56 = vpop.permute.xlu0 %1576 }
 0x20d   : > { %v1594_v57 = vsel %vm1592_vm0, %v1575_v10, %v1577_v56 }
 0x20e   : > { %1613 = vst [vmem:[#allocation3 + $0x58] sm:$0xf] %v1594_v57  ;;  %v1514_v58 = vpop.permute.xlu1 %1513  ;;  %1913 = vrot.lane.b32.xlu0 %v5959_v20, %s4697_s7 }
 0x210   : > { %1915 = vrot.lane.b32.xlu1 %v5955_v18, %s4697_s7  ;;  %v1512_v59 = vpop.permute.xlu0 %1511  ;;  %s7104_s7 = smov 60  }
 0x211   : > { %v1528_v36 = vsel %vm537_vm12, %v1510_v39, %v1512_v59  ;;  %v1529_v60 = vsel %vm537_vm12, %v1512_v59, %v1514_v58  ;;  %v6182_v39 = vcombine.high %v6138_v19, %v6138_v19 }
 0x212   : > { %1547 = vst [vmem:[#allocation3 + $0x8] sm:$0xf0] %v1528_v36  ;;  %1548 = vst [vmem:[#allocation3 + $0x10] sm:$0xf0] %v1529_v60  ;;  %v1579_v41 = vpop.permute.xlu1 %1578  ;;  %1962 = vrot.lane.b32.xlu0 %v5931_v63, %s4715_s9 }
 0x213   : > { %v1595_v62 = vsel %vm1592_vm0, %v1577_v56, %v1579_v41 }
 0x214   : > { %1614 = vst [vmem:[#allocation3 + $0x60] sm:$0xf] %v1595_v62  ;;  %1964 = vrot.lane.b32.xlu1 %v5965_v22, %s4715_s9  ;;  %v1581_v12 = vpop.permute.xlu0 %1580  ;;  %v6147_v22 = vcombine.low %v6138_v19, %v6138_v19 }
 0x215   : > { %v1596_v0 = vsel %vm1592_vm0, %v1579_v41, %v1581_v12 }
 0x216   : > { %1615 = vst [vmem:[#allocation3 + $0x68] sm:$0xf] %v1596_v0  ;;  %v1518_v47 = vpop.permute.xlu1 %1517  ;;  %1966 = vrot.lane.b32.xlu0 %v5972_v11, %s4715_s9 }
 0x217   : > { %v1532_v1 = vsel %vm537_vm12, %v1518_v47, %v1520_v40 }
 0x218   : > { %1551 = vst [vmem:[#allocation3 + $0x28] sm:$0xf0] %v1532_v1  ;;  %1968 = vrot.lane.b32.xlu1 %v5984_v25, %s4715_s9  ;;  %v1516_v63 = vpop.permute.xlu0 %1515 }
 0x219   : > { %v1530_v2 = vsel %vm537_vm12, %v1514_v58, %v1516_v63  ;;  %v1531_v3 = vsel %vm537_vm12, %v1516_v63, %v1518_v47  ;;  %vm1657_vm12 = vcmask 932864  }
 0x21a   : > { %1549 = vst [vmem:[#allocation3 + $0x18] sm:$0xf0] %v1530_v2  ;;  %1550 = vst [vmem:[#allocation3 + $0x20] sm:$0xf0] %v1531_v3  ;;  %v1583_v4 = vpop.permute.xlu1 %1582  ;;  %1970 = vrot.lane.b32.xlu0 %v5909_v5, %s4715_s9 }
 0x21b   : > { %v1597_v6 = vsel %vm1592_vm0, %v1581_v12, %v1583_v4  ;;  %v1598_v7 = vsel %vm1592_vm0, %v1583_v4, %v6048_v35 }
 0x21c   : > { %1616 = vst [vmem:[#allocation3 + $0x70] sm:$0xf] %v1597_v6  ;;  %1617 = vst [vmem:[#allocation3 + $0x78] sm:$0xf] %v1598_v7  ;;  %1972 = vrot.lane.b32.xlu1 %v5914_v53, %s4715_s9  ;;  %v1589_v8 = vpop.permute.xlu0 %1588  ;;  %v6126_v53 = vld [vmem:[#allocation2 + $0x4] sm:$0xff] }
 0x21d   : > { %v1600_v9 = vsel %vm1592_vm0, %v6054_v42, %v1589_v8  ;;  %v6135_v17 = vcombine.low %v6126_v53, %v6126_v53 }
 0x21e   : > { %1619 = vst [vmem:[#allocation3 + $0x88] sm:$0xf] %v1600_v9  ;;  %v1591_v13 = vpop.permute.xlu1 %1590  ;;  %1974 = vrot.lane.b32.xlu0 %v5919_v61, %s4715_s9 }
 0x21f   : > { %v1601_v5 = vsel %vm1592_vm0, %v1589_v8, %v1591_v13  ;;  %1621 = vst.msk [vmem:[#allocation3 + $0x98] sm:$0xf] %vm7101_vm14, %v1591_v13  ;;  %vm2762_vm0 = vcmask 965632  }
 0x220   : > { %1620 = vst [vmem:[#allocation3 + $0x90] sm:$0xf] %v1601_v5  ;;  %1976 = vrot.lane.b32.xlu1 %v5928_v46, %s4715_s9  ;;  %v1638_v14 = vpop.permute.xlu0 %1637 }
 0x222   : > { %v1640_v15 = vpop.permute.xlu1 %1639  ;;  %1978 = vrot.lane.b32.xlu0 %v5955_v18, %s4715_s9 }
 0x223   : > { %v1658_v16 = vsel %vm1657_vm12, %v1638_v14, %v1640_v15 }
 0x224   : > { %1677 = vst [vmem:[#allocation3 + $0x50] sm:$0xf0] %v1658_v16  ;;  %1980 = vrot.lane.b32.xlu1 %v6006_v27, %s4715_s9  ;;  %v1642_v61 = vpop.permute.xlu0 %1641  ;;  %s4729_s9 = smov 58  }
 0x225   : > { %v1659_v46 = vsel %vm1657_vm12, %v1640_v15, %v1642_v61 }
 0x226   : > { %1678 = vst [vmem:[#allocation3 + $0x58] sm:$0xf0] %v1659_v46  ;;  %v1644_v20 = vpop.permute.xlu1 %1643  ;;  %2027 = vrot.lane.b32.xlu0 %v6135_v17, %s7104_s7 }
 0x227   : > { %v1660_v18 = vsel %vm1657_vm12, %v1642_v61, %v1644_v20 }
 0x228   : > { %1679 = vst [vmem:[#allocation3 + $0x60] sm:$0xf0] %v1660_v18  ;;  %2029 = vrot.lane.b32.xlu1 %v6126_v53, %s7104_s7  ;;  %v1646_v21 = vpop.permute.xlu0 %1645 }
 0x229   : > { %v1661_v11 = vsel %vm1657_vm12, %v1644_v20, %v1646_v21 }
 0x22a   : > { %1680 = vst [vmem:[#allocation3 + $0x68] sm:$0xf0] %v1661_v11  ;;  %v1648_v24 = vpop.permute.xlu1 %1647  ;;  %2031 = vrot.lane.b32.xlu0 %v6147_v22, %s7104_s7 }
 0x22b   : > { %v1662_v25 = vsel %vm1657_vm12, %v1646_v21, %v1648_v24 }
 0x22c   : > { %1681 = vst [vmem:[#allocation3 + $0x70] sm:$0xf0] %v1662_v25  ;;  %2033 = vrot.lane.b32.xlu1 %v6138_v19, %s7104_s7  ;;  %v1650_v26 = vpop.permute.xlu0 %1649 }
 0x22d   : > { %v1663_v29 = vsel %vm1657_vm12, %v1648_v24, %v1650_v26 }
 0x22e   : > { %1682 = vst [vmem:[#allocation3 + $0x78] sm:$0xf0] %v1663_v29  ;;  %v1652_v31 = vpop.permute.xlu1 %1651  ;;  %2035 = vrot.lane.b32.xlu0 %v6159_v28, %s7104_s7 }
 0x22f   : > { %v1664_v32 = vsel %vm1657_vm12, %v1650_v26, %v1652_v31 }
 0x230   : > { %1683 = vst [vmem:[#allocation3 + $0x80] sm:$0xf0] %v1664_v32  ;;  %2037 = vrot.lane.b32.xlu1 %v6150_v23, %s7104_s7  ;;  %v1654_v27 = vpop.permute.xlu0 %1653 }
 0x231   : > { %v1665_v34 = vsel %vm1657_vm12, %v1652_v31, %v1654_v27 }
 0x232   : > { %1684 = vst [vmem:[#allocation3 + $0x88] sm:$0xf0] %v1665_v34  ;;  %v1656_v35 = vpop.permute.xlu1 %1655  ;;  %2039 = vrot.lane.b32.xlu0 %v6171_v33, %s7104_s7 }
 0x233   : > { %v1666_v37 = vsel %vm1657_vm12, %v1654_v27, %v1656_v35  ;;  %1686 = vst.msk [vmem:[#allocation3 + $0x98] sm:$0xf0] %vm7100_vm1, %v1656_v35  ;;  %v6266_v35 = vcombine.high %v6126_v53, %v6126_v53  ;;  %vm2827_vm12 = vcmask 867328  }
 0x234   : > { %1685 = vst [vmem:[#allocation3 + $0x90] sm:$0xf0] %v1666_v37  ;;  %2041 = vrot.lane.b32.xlu1 %v6162_v30, %s7104_s7  ;;  %v1703_v38 = vpop.permute.xlu0 %1702 }
 0x236   : > { %v1705_v40 = vpop.permute.xlu1 %1704  ;;  %3134 = vrot.lane.b32.xlu0 %v6182_v39, %s4717_s11 }
 0x237   : > { %v1723_v42 = vsel %vm1722_vm13, %v1703_v38, %v1705_v40 }
 0x238   : > { %1742 = vst [vmem:[#allocation3 + $0xa0] sm:$0xf] %v1723_v42  ;;  %3136 = vrot.lane.b32.xlu1 %v6150_v23, %s4717_s11  ;;  %v1707_v43 = vpop.permute.xlu0 %1706 }
 0x239   : > { %v1724_v44 = vsel %vm1722_vm13, %v1705_v40, %v1707_v43 }
 0x23a   : > { %1743 = vst [vmem:[#allocation3 + $0xa8] sm:$0xf] %v1724_v44  ;;  %v1709_v45 = vpop.permute.xlu1 %1708  ;;  %3132 = vrot.lane.b32.xlu0 %v6138_v19, %s4717_s11 }
 0x23b   : > { %v1725_v48 = vsel %vm1722_vm13, %v1707_v43, %v1709_v45 }
 0x23c   : > { %1744 = vst [vmem:[#allocation3 + $0xb0] sm:$0xf] %v1725_v48  ;;  %3004 = vrot.lane.b32.xlu1 %v6182_v39, %s4718_s4  ;;  %v1711_v49 = vpop.permute.xlu0 %1710 }
 0x23d   : > { %v1726_v50 = vsel %vm1722_vm13, %v1709_v45, %v1711_v49 }
 0x23e   : > { %1745 = vst [vmem:[#allocation3 + $0xb8] sm:$0xf] %v1726_v50  ;;  %v1713_v51 = vpop.permute.xlu1 %1712  ;;  %3006 = vrot.lane.b32.xlu0 %v6150_v23, %s4718_s4 }
 0x23f   : > { %v1727_v52 = vsel %vm1722_vm13, %v1711_v49, %v1713_v51 }
 0x240   : > { %1746 = vst [vmem:[#allocation3 + $0xc0] sm:$0xf] %v1727_v52  ;;  %3069 = vrot.lane.b32.xlu1 %v6138_v19, %s4683_s29  ;;  %v1715_v10 = vpop.permute.xlu0 %1714 }
 0x241   : > { %v1728_v54 = vsel %vm1722_vm13, %v1713_v51, %v1715_v10 }
 0x242   : > { %1747 = vst [vmem:[#allocation3 + $0xc8] sm:$0xf] %v1728_v54  ;;  %v1717_v56 = vpop.permute.xlu1 %1716  ;;  %3071 = vrot.lane.b32.xlu0 %v6159_v28, %s4683_s29 }
 0x243   : > { %v1729_v57 = vsel %vm1722_vm13, %v1715_v10, %v1717_v56 }
 0x244   : > { %1748 = vst [vmem:[#allocation3 + $0xd0] sm:$0xf] %v1729_v57  ;;  %3002 = vrot.lane.b32.xlu1 %v6138_v19, %s4718_s4  ;;  %v1719_v58 = vpop.permute.xlu0 %1718 }
 0x245   : > { %v1730_v59 = vsel %vm1722_vm13, %v1717_v56, %v1719_v58 }
 0x246   : > { %1749 = vst [vmem:[#allocation3 + $0xd8] sm:$0xf] %v1730_v59  ;;  %v1721_v36 = vpop.permute.xlu1 %1720  ;;  %3067 = vrot.lane.b32.xlu0 %v6147_v22, %s4683_s29 }
 0x247   : > { %v1731_v60 = vsel %vm1722_vm13, %v1719_v58, %v1721_v36  ;;  %1751 = vst.msk [vmem:[#allocation3 + $0xe8] sm:$0xf] %vm7101_vm14, %v1721_v36  ;;  %vm2632_vm13 = vcmask 982016  }
 0x248   : > { %1750 = vst [vmem:[#allocation3 + $0xe0] sm:$0xf] %v1731_v60  ;;  %2874 = vrot.lane.b32.xlu1 %v6182_v39, %s4719_s18  ;;  %v1768_v41 = vpop.permute.xlu0 %1767 }
 0x24a   : > { %v1770_v62 = vpop.permute.xlu1 %1769  ;;  %2876 = vrot.lane.b32.xlu0 %v6150_v23, %s4719_s18 }
 0x24b   : > { %v1788_v12 = vsel %vm1787_vm6, %v1768_v41, %v1770_v62 }
 0x24c   : > { %1807 = vst [vmem:[#allocation3 + $0xa0] sm:$0xf0] %v1788_v12  ;;  %2939 = vrot.lane.b32.xlu1 %v6138_v19, %s4720_s13  ;;  %v1772_v0 = vpop.permute.xlu0 %1771 }
 0x24d   : > { %v1789_v47 = vsel %vm1787_vm6, %v1770_v62, %v1772_v0 }
 0x24e   : > { %1808 = vst [vmem:[#allocation3 + $0xa8] sm:$0xf0] %v1789_v47  ;;  %v1774_v1 = vpop.permute.xlu1 %1773  ;;  %2941 = vrot.lane.b32.xlu0 %v6159_v28, %s4720_s13 }
 0x24f   : > { %v1790_v63 = vsel %vm1787_vm6, %v1772_v0, %v1774_v1 }
 0x250   : > { %1809 = vst [vmem:[#allocation3 + $0xb0] sm:$0xf0] %v1790_v63  ;;  %2872 = vrot.lane.b32.xlu1 %v6138_v19, %s4719_s18  ;;  %v1776_v2 = vpop.permute.xlu0 %1775 }
 0x251   : > { %v1791_v3 = vsel %vm1787_vm6, %v1774_v1, %v1776_v2 }
 0x252   : > { %1810 = vst [vmem:[#allocation3 + $0xb8] sm:$0xf0] %v1791_v3  ;;  %v1778_v4 = vpop.permute.xlu1 %1777  ;;  %2937 = vrot.lane.b32.xlu0 %v6147_v22, %s4720_s13 }
 0x253   : > { %v1792_v6 = vsel %vm1787_vm6, %v1776_v2, %v1778_v4 }
 0x254   : > { %1811 = vst [vmem:[#allocation3 + $0xc0] sm:$0xf0] %v1792_v6  ;;  %2744 = vrot.lane.b32.xlu1 %v6182_v39, %s4721_s3  ;;  %v1780_v7 = vpop.permute.xlu0 %1779 }
 0x255   : > { %v1793_v8 = vsel %vm1787_vm6, %v1778_v4, %v1780_v7 }
 0x256   : > { %1812 = vst [vmem:[#allocation3 + $0xc8] sm:$0xf0] %v1793_v8  ;;  %v1782_v9 = vpop.permute.xlu1 %1781  ;;  %2746 = vrot.lane.b32.xlu0 %v6150_v23, %s4721_s3 }
 0x257   : > { %v1794_v13 = vsel %vm1787_vm6, %v1780_v7, %v1782_v9 }
 0x258   : > { %1813 = vst [vmem:[#allocation3 + $0xd0] sm:$0xf0] %v1794_v13  ;;  %2809 = vrot.lane.b32.xlu1 %v6138_v19, %s4722_s17  ;;  %v1784_v5 = vpop.permute.xlu0 %1783 }
 0x259   : > { %v1795_v14 = vsel %vm1787_vm6, %v1782_v9, %v1784_v5 }
 0x25a   : > { %1814 = vst [vmem:[#allocation3 + $0xd8] sm:$0xf0] %v1795_v14  ;;  %v1786_v15 = vpop.permute.xlu1 %1785  ;;  %2811 = vrot.lane.b32.xlu0 %v6159_v28, %s4722_s17 }
 0x25b   : > { %v1796_v16 = vsel %vm1787_vm6, %v1784_v5, %v1786_v15  ;;  %1816 = vst.msk [vmem:[#allocation3 + $0xe8] sm:$0xf0] %vm7100_vm1, %v1786_v15  ;;  %vm2697_vm6 = vcmask 973824  }
 0x25c   : > { %1815 = vst [vmem:[#allocation3 + $0xe0] sm:$0xf0] %v1796_v16  ;;  %2742 = vrot.lane.b32.xlu1 %v6138_v19, %s4721_s3  ;;  %v1833_v61 = vpop.permute.xlu0 %1832 }
 0x25e   : > { %v1835_v46 = vpop.permute.xlu1 %1834  ;;  %2807 = vrot.lane.b32.xlu0 %v6147_v22, %s4722_s17 }
 0x25f   : > { %v1853_v20 = vsel %vm1852_vm15, %v1833_v61, %v1835_v46 }
 0x260   : > { %1872 = vst [vmem:[#allocation3 + $0xf0] sm:$0xf] %v1853_v20  ;;  %2614 = vrot.lane.b32.xlu1 %v6182_v39, %s4723_s30  ;;  %v1837_v18 = vpop.permute.xlu0 %1836 }
 0x261   : > { %v1854_v21 = vsel %vm1852_vm15, %v1835_v46, %v1837_v18 }
 0x262   : > { %1873 = vst [vmem:[#allocation3 + $0xf8] sm:$0xf] %v1854_v21  ;;  %v1839_v11 = vpop.permute.xlu1 %1838  ;;  %2616 = vrot.lane.b32.xlu0 %v6150_v23, %s4723_s30  ;;  %v6340_v21 = vcombine.high %v6150_v23, %v6150_v23 }
 0x263   : > { %v1855_v24 = vsel %vm1852_vm15, %v1837_v18, %v1839_v11 }
 0x264   : > { %1874 = vst [vmem:[#allocation3 + $0x100] sm:$0xf] %v1855_v24  ;;  %2679 = vrot.lane.b32.xlu1 %v6138_v19, %s4724_s8  ;;  %v1841_v25 = vpop.permute.xlu0 %1840 }
 0x265   : > { %v1856_v26 = vsel %vm1852_vm15, %v1839_v11, %v1841_v25 }
 0x266   : > { %1875 = vst [vmem:[#allocation3 + $0x108] sm:$0xf] %v1856_v26  ;;  %v1843_v29 = vpop.permute.xlu1 %1842  ;;  %2681 = vrot.lane.b32.xlu0 %v6159_v28, %s4724_s8  ;;  %v6350_v26 = vcombine.high %v6162_v30, %v6162_v30 }
 0x267   : > { %v1857_v31 = vsel %vm1852_vm15, %v1841_v25, %v1843_v29 }
 0x268   : > { %1876 = vst [vmem:[#allocation3 + $0x110] sm:$0xf] %v1857_v31  ;;  %2612 = vrot.lane.b32.xlu1 %v6138_v19, %s4723_s30  ;;  %v1845_v32 = vpop.permute.xlu0 %1844 }
 0x269   : > { %v1858_v27 = vsel %vm1852_vm15, %v1843_v29, %v1845_v32 }
 0x26a   : > { %1877 = vst [vmem:[#allocation3 + $0x118] sm:$0xf] %v1858_v27  ;;  %v1847_v34 = vpop.permute.xlu1 %1846  ;;  %2677 = vrot.lane.b32.xlu0 %v6147_v22, %s4724_s8 }
 0x26b   : > { %v1859_v28 = vsel %vm1852_vm15, %v1845_v32, %v1847_v34  ;;  %v6358_v32 = vld [vmem:[#allocation2 + $0x24] sm:$0xff] }
 0x26c   : > { %1878 = vst [vmem:[#allocation3 + $0x120] sm:$0xf] %v1859_v28  ;;  %2484 = vrot.lane.b32.xlu1 %v6266_v35, %s4691_s21  ;;  %v1849_v37 = vpop.permute.xlu0 %1848 }
 0x26d   : > { %v1860_v38 = vsel %vm1852_vm15, %v1847_v34, %v1849_v37 }
 0x26e   : > { %1879 = vst [vmem:[#allocation3 + $0x128] sm:$0xf] %v1860_v38  ;;  %v1851_v40 = vpop.permute.xlu1 %1850  ;;  %2486 = vrot.lane.b32.xlu0 %v6138_v19, %s4691_s21 }
 0x26f   : > { %v1861_v42 = vsel %vm1852_vm15, %v1849_v37, %v1851_v40  ;;  %1881 = vst.msk [vmem:[#allocation3 + $0x138] sm:$0xf] %vm7101_vm14, %v1851_v40  ;;  %vm7112_vm15 = vcmask 252928  }
 0x270   : > { %1880 = vst [vmem:[#allocation3 + $0x130] sm:$0xf] %v1861_v42  ;;  %2549 = vrot.lane.b32.xlu1 %v6126_v53, %s4725_s12  ;;  %v1898_v43 = vpop.permute.xlu0 %1897 }
 0x272   : > { %v1900_v44 = vpop.permute.xlu1 %1899  ;;  %2551 = vrot.lane.b32.xlu0 %v6147_v22, %s4725_s12 }
 0x273   : > { %v1918_v45 = vsel %vm1917_vm11, %v1898_v43, %v1900_v44 }
 0x274   : > { %1937 = vst [vmem:[#allocation3 + $0xf0] sm:$0xf0] %v1918_v45  ;;  %2482 = vrot.lane.b32.xlu1 %v6126_v53, %s4691_s21  ;;  %v1902_v48 = vpop.permute.xlu0 %1901 }
 0x275   : > { %v1919_v49 = vsel %vm1917_vm11, %v1900_v44, %v1902_v48 }
 0x276   : > { %1938 = vst [vmem:[#allocation3 + $0xf8] sm:$0xf0] %v1919_v49  ;;  %v1904_v50 = vpop.permute.xlu1 %1903  ;;  %2547 = vrot.lane.b32.xlu0 %v6135_v17, %s4725_s12 }
 0x277   : > { %v1920_v51 = vsel %vm1917_vm11, %v1902_v48, %v1904_v50 }
 0x278   : > { %1939 = vst [vmem:[#allocation3 + $0x100] sm:$0xf0] %v1920_v51  ;;  %2354 = vrot.lane.b32.xlu1 %v6266_v35, %s4726_s10  ;;  %v1906_v52 = vpop.permute.xlu0 %1905 }
 0x279   : > { %v1921_v10 = vsel %vm1917_vm11, %v1904_v50, %v1906_v52  ;;  %v6391_v50 = vcombine.low %v6358_v32, %v6358_v32 }
 0x27a   : > { %1940 = vst [vmem:[#allocation3 + $0x108] sm:$0xf0] %v1921_v10  ;;  %v1908_v54 = vpop.permute.xlu1 %1907  ;;  %2356 = vrot.lane.b32.xlu0 %v6138_v19, %s4726_s10 }
 0x27b   : > { %v1922_v56 = vsel %vm1917_vm11, %v1906_v52, %v1908_v54 }
 0x27c   : > { %1941 = vst [vmem:[#allocation3 + $0x110] sm:$0xf0] %v1922_v56  ;;  %2419 = vrot.lane.b32.xlu1 %v6126_v53, %s4727_s6  ;;  %v1910_v57 = vpop.permute.xlu0 %1909 }
 0x27d   : > { %v1923_v58 = vsel %vm1917_vm11, %v1908_v54, %v1910_v57 }
 0x27e   : > { %1942 = vst [vmem:[#allocation3 + $0x118] sm:$0xf0] %v1923_v58  ;;  %v1912_v59 = vpop.permute.xlu1 %1911  ;;  %2421 = vrot.lane.b32.xlu0 %v6147_v22, %s4727_s6 }
 0x27f   : > { %v1924_v36 = vsel %vm1917_vm11, %v1910_v57, %v1912_v59 }
 0x280   : > { %1943 = vst [vmem:[#allocation3 + $0x120] sm:$0xf0] %v1924_v36  ;;  %2352 = vrot.lane.b32.xlu1 %v6126_v53, %s4726_s10  ;;  %v1914_v60 = vpop.permute.xlu0 %1913 }
 0x281   : > { %v1925_v41 = vsel %vm1917_vm11, %v1912_v59, %v1914_v60 }
 0x282   : > { %1944 = vst [vmem:[#allocation3 + $0x128] sm:$0xf0] %v1925_v41  ;;  %v1916_v62 = vpop.permute.xlu1 %1915  ;;  %2417 = vrot.lane.b32.xlu0 %v6135_v17, %s4727_s6 }
 0x283   : > { %v1926_v12 = vsel %vm1917_vm11, %v1914_v60, %v1916_v62  ;;  %1946 = vst.msk [vmem:[#allocation3 + $0x138] sm:$0xf0] %vm7100_vm1, %v1916_v62  ;;  %vm7111_vm11 = vcmask 244736   ;;  %vm2242_vm1 = vcmask 375808  }
 0x284   : > { %1945 = vst [vmem:[#allocation3 + $0x130] sm:$0xf0] %v1926_v12  ;;  %2224 = vrot.lane.b32.xlu1 %v6266_v35, %s4728_s5  ;;  %v1963_v0 = vpop.permute.xlu0 %1962 }
 0x286   : > { %v1965_v47 = vpop.permute.xlu1 %1964  ;;  %2226 = vrot.lane.b32.xlu0 %v6138_v19, %s4728_s5 }
 0x287   : > { %v1983_v1 = vsel %vm1982_vm4, %v1963_v0, %v1965_v47 }
 0x288   : > { %2002 = vst [vmem:[#allocation3 + $0x140] sm:$0xf] %v1983_v1  ;;  %2289 = vrot.lane.b32.xlu1 %v6126_v53, %s7108_s2  ;;  %v1967_v63 = vpop.permute.xlu0 %1966 }
 0x289   : > { %v1984_v2 = vsel %vm1982_vm4, %v1965_v47, %v1967_v63 }
 0x28a   : > { %2003 = vst [vmem:[#allocation3 + $0x148] sm:$0xf] %v1984_v2  ;;  %v1969_v3 = vpop.permute.xlu1 %1968  ;;  %2291 = vrot.lane.b32.xlu0 %v6147_v22, %s7108_s2 }
 0x28b   : > { %v1985_v4 = vsel %vm1982_vm4, %v1967_v63, %v1969_v3 }
 0x28c   : > { %2004 = vst [vmem:[#allocation3 + $0x150] sm:$0xf] %v1985_v4  ;;  %2222 = vrot.lane.b32.xlu1 %v6126_v53, %s4728_s5  ;;  %v1971_v6 = vpop.permute.xlu0 %1970 }
 0x28d   : > { %v1986_v7 = vsel %vm1982_vm4, %v1969_v3, %v1971_v6 }
 0x28e   : > { %2005 = vst [vmem:[#allocation3 + $0x158] sm:$0xf] %v1986_v7  ;;  %v1973_v8 = vpop.permute.xlu1 %1972  ;;  %2287 = vrot.lane.b32.xlu0 %v6135_v17, %s7108_s2 }
 0x28f   : > { %v1987_v9 = vsel %vm1982_vm4, %v1971_v6, %v1973_v8 }
 0x290   : > { %2006 = vst [vmem:[#allocation3 + $0x160] sm:$0xf] %v1987_v9  ;;  %2094 = vrot.lane.b32.xlu1 %v6266_v35, %s7106_s26  ;;  %v1975_v13 = vpop.permute.xlu0 %1974 }
 0x291   : > { %v1988_v5 = vsel %vm1982_vm4, %v1973_v8, %v1975_v13 }
 0x292   : > { %2007 = vst [vmem:[#allocation3 + $0x168] sm:$0xf] %v1988_v5  ;;  %v1977_v14 = vpop.permute.xlu1 %1976  ;;  %2096 = vrot.lane.b32.xlu0 %v6138_v19, %s7106_s26 }
 0x293   : > { %v1989_v15 = vsel %vm1982_vm4, %v1975_v13, %v1977_v14 }
 0x294   : > { %2008 = vst [vmem:[#allocation3 + $0x170] sm:$0xf] %v1989_v15  ;;  %2159 = vrot.lane.b32.xlu1 %v6126_v53, %s4729_s9  ;;  %v1979_v16 = vpop.permute.xlu0 %1978 }
 0x295   : > { %v1990_v61 = vsel %vm1982_vm4, %v1977_v14, %v1979_v16 }
 0x296   : > { %2009 = vst [vmem:[#allocation3 + $0x178] sm:$0xf] %v1990_v61  ;;  %v1981_v46 = vpop.permute.xlu1 %1980  ;;  %2161 = vrot.lane.b32.xlu0 %v6147_v22, %s4729_s9 }
 0x297   : > { %v1991_v20 = vsel %vm1982_vm4, %v1979_v16, %v1981_v46  ;;  %2011 = vst.msk [vmem:[#allocation3 + $0x188] sm:$0xf] %vm7101_vm14, %v1981_v46  ;;  %vm7113_vm4 = vcmask 359424   ;;  %vm7103_vm14 = vcmask 367616  }
 0x298   : > { %2010 = vst [vmem:[#allocation3 + $0x180] sm:$0xf] %v1991_v20  ;;  %2092 = vrot.lane.b32.xlu1 %v6126_v53, %s7106_s26  ;;  %v2028_v18 = vpop.permute.xlu0 %2027 }
 0x29a   : > { %v2030_v11 = vpop.permute.xlu1 %2029  ;;  %2157 = vrot.lane.b32.xlu0 %v6135_v17, %s4729_s9 }
 0x29b   : > { %v2048_v22 = vsel %vm7099_vm7, %v2028_v18, %v2030_v11 }
 0x29c   : > { %2067 = vst [vmem:[#allocation3 + $0x140] sm:$0xf0] %v2048_v22  ;;  %3138 = vrot.lane.b32.xlu1 %v6340_v21, %s4717_s11  ;;  %v2032_v24 = vpop.permute.xlu0 %2031 }
 0x29d   : > { %v2049_v25 = vsel %vm7099_vm7, %v2030_v11, %v2032_v24 }
 0x29e   : > { %2068 = vst [vmem:[#allocation3 + $0x148] sm:$0xf0] %v2049_v25  ;;  %v2034_v53 = vpop.permute.xlu1 %2033  ;;  %3140 = vrot.lane.b32.xlu0 %v6162_v30, %s4717_s11 }
 0x29f   : > { %v2050_v17 = vsel %vm7099_vm7, %v2032_v24, %v2034_v53 }
 0x2a0   : > { %2069 = vst [vmem:[#allocation3 + $0x150] sm:$0xf0] %v2050_v17  ;;  %3142 = vrot.lane.b32.xlu1 %v6350_v26, %s4717_s11  ;;  %v2036_v29 = vpop.permute.xlu0 %2035 }
 0x2a1   : > { %v2051_v31 = vsel %vm7099_vm7, %v2034_v53, %v2036_v29 }
 0x2a2   : > { %2070 = vst [vmem:[#allocation3 + $0x158] sm:$0xf0] %v2051_v31  ;;  %v2038_v27 = vpop.permute.xlu1 %2037  ;;  %3144 = vrot.lane.b32.xlu0 %v6358_v32, %s4717_s11 }
 0x2a3   : > { %v2052_v34 = vsel %vm7099_vm7, %v2036_v29, %v2038_v27 }
 0x2a4   : > { %2071 = vst [vmem:[#allocation3 + $0x160] sm:$0xf0] %v2052_v34  ;;  %3008 = vrot.lane.b32.xlu1 %v6340_v21, %s4718_s4  ;;  %v2040_v35 = vpop.permute.xlu0 %2039 }
 0x2a5   : > { %v2053_v28 = vsel %vm7099_vm7, %v2038_v27, %v2040_v35 }
 0x2a6   : > { %2072 = vst [vmem:[#allocation3 + $0x168] sm:$0xf0] %v2053_v28  ;;  %v6366_v37 = vpop.permute.xlu1 %2041  ;;  %3010 = vrot.lane.b32.xlu0 %v6162_v30, %s4718_s4 }
 0x2a7   : > { %v2054_v38 = vsel %vm7099_vm7, %v2040_v35, %v6366_v37  ;;  %vm7102_vm7 = vcmask 261120  }
 0x2a8   : > { %2073 = vst [vmem:[#allocation3 + $0x170] sm:$0xf0] %v2054_v38  ;;  %3012 = vrot.lane.b32.xlu1 %v6350_v26, %s4718_s4  ;;  %v3135_v40 = vpop.permute.xlu0 %3134 }
 0x2aa   : > { %v6374_v42 = vpop.permute.xlu1 %3136  ;;  %3014 = vrot.lane.b32.xlu0 %v6358_v32, %s4718_s4 }
 0x2ab   : > { %v3154_v43 = vsel %vm3152_vm5, %v3135_v40, %v6374_v42 }
 0x2ac   : > { %3173 = vst [vmem:[#allocation3 + $0x418] sm:$0xf] %v3154_v43  ;;  %3073 = vrot.lane.b32.xlu1 %v6150_v23, %s4683_s29  ;;  %v3133_v44 = vpop.permute.xlu0 %3132 }
 0x2ad   : > { %v3153_v45 = vsel %vm3152_vm5, %v3133_v44, %v3135_v40 }
 0x2ae   : > { %3172 = vst [vmem:[#allocation3 + $0x410] sm:$0xf] %v3153_v45  ;;  %v3005_v48 = vpop.permute.xlu1 %3004  ;;  %3075 = vrot.lane.b32.xlu0 %v6171_v33, %s4683_s29 }
 0x2b0   : > { %3077 = vrot.lane.b32.xlu1 %v6162_v30, %s4683_s29  ;;  %v6387_v49 = vpop.permute.xlu0 %3006 }
 0x2b1   : > { %v3024_v51 = vsel %vm7110_vm8, %v3005_v48, %v6387_v49 }
 0x2b2   : > { %3043 = vst [vmem:[#allocation3 + $0x3c8] sm:$0xf] %v3024_v51  ;;  %v3070_v52 = vpop.permute.xlu1 %3069  ;;  %3079 = vrot.lane.b32.xlu0 %v6391_v50, %s4683_s29 }
 0x2b3   : > { %v3314_v10 = vld [vmem:[#allocation3 + $0x418] sm:$0xf] }
 0x2b4   : > { %2878 = vrot.lane.b32.xlu1 %v6340_v21, %s4719_s18  ;;  %3936 = vmatprep.subr.msk.mxu0 %vm342_vm10, %v3314_v10  ;;  %v6400_v54 = vpop.permute.xlu0 %3071 }
 0x2b5   : > { %v3089_v56 = vsel %vm3087_vm3, %v3070_v52, %v6400_v54  ;;  %v3313_v57 = vld [vmem:[#allocation3 + $0x410] sm:$0xf] }
 0x2b6   : > { %3108 = vst [vmem:[#allocation3 + $0x3c8] sm:$0xf0] %v3089_v56  ;;  %v3003_v58 = vpop.permute.xlu1 %3002  ;;  %2880 = vrot.lane.b32.xlu0 %v6162_v30, %s4719_s18  ;;  %3937 = vmatpush1.msk.msra.mxu0 %vm342_vm10, %v3313_v57 }
 0x2b7   : > { %v3023_v59 = vsel %vm7110_vm8, %v3003_v58, %v3005_v48  ;;  %v6499_v58 = vld [vmem:[#allocation2 + $0x14] sm:$0xff] }
 0x2b8   : > { %3042 = vst [vmem:[#allocation3 + $0x3c0] sm:$0xf] %v3023_v59  ;;  %2882 = vrot.lane.b32.xlu1 %v6350_v26, %s4719_s18  ;;  %v3068_v36 = vpop.permute.xlu0 %3067 }
 0x2b9   : > { %v3088_v60 = vsel %vm3087_vm3, %v3068_v36, %v3070_v52  ;;  %v6509_v36 = vcombine.low %v6499_v58, %v6499_v58 }
 0x2ba   : > { %3107 = vst [vmem:[#allocation3 + $0x3c0] sm:$0xf0] %v3088_v60  ;;  %v2875_v41 = vpop.permute.xlu1 %2874  ;;  %2884 = vrot.lane.b32.xlu0 %v6358_v32, %s4719_s18 }
 0x2bc   : > { %2943 = vrot.lane.b32.xlu1 %v6150_v23, %s4720_s13  ;;  %v6415_v62 = vpop.permute.xlu0 %2876 }
 0x2bd   : > { %v2894_v12 = vsel %vm2892_vm2, %v2875_v41, %v6415_v62  ;;  %v3304_v0 = vld [vmem:[#allocation3 + $0x3c8] sm:$0xff] }
 0x2be   : > { %2913 = vst [vmem:[#allocation3 + $0x378] sm:$0xf] %v2894_v12  ;;  %v2940_v47 = vpop.permute.xlu1 %2939  ;;  %2945 = vrot.lane.b32.xlu0 %v6171_v33, %s4720_s13  ;;  %3369 = vmatprep.subr.mxu0 %v3304_v0 }
 0x2c0   : > { %2947 = vrot.lane.b32.xlu1 %v6162_v30, %s4720_s13  ;;  %v6423_v1 = vpop.permute.xlu0 %2941 }
 0x2c1   : > { %v2959_v63 = vsel %vm2957_vm9, %v2940_v47, %v6423_v1  ;;  %v3303_v2 = vld [vmem:[#allocation3 + $0x3c0] sm:$0xff] }
 0x2c2   : > { %2978 = vst [vmem:[#allocation3 + $0x378] sm:$0xf0] %v2959_v63  ;;  %v2873_v3 = vpop.permute.xlu1 %2872  ;;  %2949 = vrot.lane.b32.xlu0 %v6391_v50, %s4720_s13  ;;  %3370 = vmatpush1.msra.mxu0 %v3303_v2 }
 0x2c3   : > { %v2893_v4 = vsel %vm2892_vm2, %v2873_v3, %v2875_v41  ;;  %v6513_v41 = vld [vmem:[#allocation2 + $0x1c] sm:$0xff] }
 0x2c4   : > { %2912 = vst [vmem:[#allocation3 + $0x370] sm:$0xf] %v2893_v4  ;;  %2748 = vrot.lane.b32.xlu1 %v6340_v21, %s4721_s3  ;;  %v2938_v6 = vpop.permute.xlu0 %2937  ;;  %v6523_v0 = vcombine.low %v6513_v41, %v6513_v41 }
 0x2c5   : > { %v2958_v7 = vsel %vm2957_vm9, %v2938_v6, %v2940_v47 }
 0x2c6   : > { %2977 = vst [vmem:[#allocation3 + $0x370] sm:$0xf0] %v2958_v7  ;;  %v2745_v8 = vpop.permute.xlu1 %2744  ;;  %2750 = vrot.lane.b32.xlu0 %v6162_v30, %s4721_s3 }
 0x2c8   : > { %2752 = vrot.lane.b32.xlu1 %v6350_v26, %s4721_s3  ;;  %v6437_v9 = vpop.permute.xlu0 %2746 }
 0x2c9   : > { %v2764_v13 = vsel %vm2762_vm0, %v2745_v8, %v6437_v9  ;;  %v3294_v5 = vld [vmem:[#allocation3 + $0x378] sm:$0xff] }
 0x2ca   : > { %2783 = vst [vmem:[#allocation3 + $0x328] sm:$0xf] %v2764_v13  ;;  %v2810_v14 = vpop.permute.xlu1 %2809  ;;  %2754 = vrot.lane.b32.xlu0 %v6358_v32, %s4721_s3  ;;  %3371 = vmatprep.subr.mxu0 %v3294_v5 }
 0x2cc   : > { %2813 = vrot.lane.b32.xlu1 %v6150_v23, %s4722_s17  ;;  %v6445_v15 = vpop.permute.xlu0 %2811 }
 0x2cd   : > { %v2829_v16 = vsel %vm2827_vm12, %v2810_v14, %v6445_v15  ;;  %v3293_v61 = vld [vmem:[#allocation3 + $0x370] sm:$0xff] }
 0x2ce   : > { %2848 = vst [vmem:[#allocation3 + $0x328] sm:$0xf0] %v2829_v16  ;;  %v2743_v46 = vpop.permute.xlu1 %2742  ;;  %2815 = vrot.lane.b32.xlu0 %v6171_v33, %s4722_s17  ;;  %3372 = vmatpush1.msra.mxu0 %v3293_v61 }
 0x2cf   : > { %v2763_v20 = vsel %vm2762_vm0, %v2743_v46, %v2745_v8  ;;  %v6535_v8 = vcombine.high %v6499_v58, %v6499_v58 }
 0x2d0   : > { %2782 = vst [vmem:[#allocation3 + $0x320] sm:$0xf] %v2763_v20  ;;  %2817 = vrot.lane.b32.xlu1 %v6162_v30, %s4722_s17  ;;  %v2808_v18 = vpop.permute.xlu0 %2807 }
 0x2d1   : > { %v2828_v11 = vsel %vm2827_vm12, %v2808_v18, %v2810_v14 }
 0x2d2   : > { %2847 = vst [vmem:[#allocation3 + $0x320] sm:$0xf0] %v2828_v11  ;;  %v2615_v22 = vpop.permute.xlu1 %2614  ;;  %2819 = vrot.lane.b32.xlu0 %v6391_v50, %s4722_s17 }
 0x2d4   : > { %2618 = vrot.lane.b32.xlu1 %v6340_v21, %s4723_s30  ;;  %v6459_v24 = vpop.permute.xlu0 %2616 }
 0x2d5   : > { %v2634_v25 = vsel %vm2632_vm13, %v2615_v22, %v6459_v24  ;;  %v3284_v53 = vld [vmem:[#allocation3 + $0x328] sm:$0xff] }
 0x2d6   : > { %2653 = vst [vmem:[#allocation3 + $0x2d8] sm:$0xf] %v2634_v25  ;;  %v2680_v17 = vpop.permute.xlu1 %2679  ;;  %2620 = vrot.lane.b32.xlu0 %v6162_v30, %s4723_s30  ;;  %3373 = vmatprep.subr.mxu0 %v3284_v53 }
 0x2d8   : > { %2622 = vrot.lane.b32.xlu1 %v6350_v26, %s4723_s30  ;;  %v6467_v29 = vpop.permute.xlu0 %2681 }
 0x2d9   : > { %v2699_v31 = vsel %vm2697_vm6, %v2680_v17, %v6467_v29  ;;  %v3283_v27 = vld [vmem:[#allocation3 + $0x320] sm:$0xff] }
 0x2da   : > { %2718 = vst [vmem:[#allocation3 + $0x2d8] sm:$0xf0] %v2699_v31  ;;  %v2613_v34 = vpop.permute.xlu1 %2612  ;;  %2624 = vrot.lane.b32.xlu0 %v6358_v32, %s4723_s30  ;;  %3374 = vmatpush1.msra.mxu0 %v3283_v27 }
 0x2db   : > { %v2633_v35 = vsel %vm2632_vm13, %v2613_v34, %v2615_v22 }
 0x2dc   : > { %2652 = vst [vmem:[#allocation3 + $0x2d0] sm:$0xf] %v2633_v35  ;;  %2683 = vrot.lane.b32.xlu1 %v6150_v23, %s4724_s8  ;;  %v2678_v28 = vpop.permute.xlu0 %2677 }
 0x2dd   : > { %v2698_v38 = vsel %vm2697_vm6, %v2678_v28, %v2680_v17 }
 0x2de   : > { %2717 = vst [vmem:[#allocation3 + $0x2d0] sm:$0xf0] %v2698_v38  ;;  %v2485_v40 = vpop.permute.xlu1 %2484  ;;  %2685 = vrot.lane.b32.xlu0 %v6171_v33, %s4724_s8 }
 0x2e0   : > { %2687 = vrot.lane.b32.xlu1 %v6162_v30, %s4724_s8  ;;  %v6481_v43 = vpop.permute.xlu0 %2486 }
 0x2e1   : > { %v2504_v44 = vsel %vm7112_vm15, %v2485_v40, %v6481_v43  ;;  %v3274_v45 = vld [vmem:[#allocation3 + $0x2d8] sm:$0xff] }
 0x2e2   : > { %2523 = vst [vmem:[#allocation3 + $0x288] sm:$0xf] %v2504_v44  ;;  %v2550_v48 = vpop.permute.xlu1 %2549  ;;  %2689 = vrot.lane.b32.xlu0 %v6391_v50, %s4724_s8  ;;  %3375 = vmatprep.subr.mxu0 %v3274_v45 }
 0x2e4   : > { %2488 = vrot.lane.b32.xlu1 %v6182_v39, %s4691_s21  ;;  %v6489_v33 = vpop.permute.xlu0 %2551 }
 0x2e5   : > { %v2569_v51 = vsel %vm7111_vm11, %v2550_v48, %v6489_v33  ;;  %v3273_v52 = vld [vmem:[#allocation3 + $0x2d0] sm:$0xff] }
 0x2e6   : > { %2588 = vst [vmem:[#allocation3 + $0x288] sm:$0xf0] %v2569_v51  ;;  %v2483_v10 = vpop.permute.xlu1 %2482  ;;  %2490 = vrot.lane.b32.xlu0 %v6150_v23, %s4691_s21  ;;  %3376 = vmatpush1.msra.mxu0 %v3273_v52 }
 0x2e7   : > { %v2503_v56 = vsel %vm7112_vm15, %v2483_v10, %v2485_v40 }
 0x2e8   : > { %2522 = vst [vmem:[#allocation3 + $0x280] sm:$0xf] %v2503_v56  ;;  %2492 = vrot.lane.b32.xlu1 %v6340_v21, %s4691_s21  ;;  %v2548_v50 = vpop.permute.xlu0 %2547 }
 0x2e9   : > { %v2568_v57 = vsel %vm7111_vm11, %v2548_v50, %v2550_v48 }
 0x2ea   : > { %2587 = vst [vmem:[#allocation3 + $0x280] sm:$0xf0] %v2568_v57  ;;  %v2355_v59 = vpop.permute.xlu1 %2354  ;;  %2494 = vrot.lane.b32.xlu0 %v6162_v30, %s4691_s21 }
 0x2ec   : > { %2553 = vrot.lane.b32.xlu1 %v6138_v19, %s4725_s12  ;;  %v6505_v23 = vpop.permute.xlu0 %2356 }
 0x2ed   : > { %v2374_v21 = vsel %vm7113_vm4, %v2355_v59, %v6505_v23  ;;  %v3264_v60 = vld [vmem:[#allocation3 + $0x288] sm:$0xff] }
 0x2ee   : > { %2393 = vst [vmem:[#allocation3 + $0x238] sm:$0xf] %v2374_v21  ;;  %v2420_v12 = vpop.permute.xlu1 %2419  ;;  %2555 = vrot.lane.b32.xlu0 %v6509_v36, %s4725_s12  ;;  %3377 = vmatprep.subr.mxu0 %v3264_v60 }
 0x2f0   : > { %2557 = vrot.lane.b32.xlu1 %v6499_v58, %s4725_s12  ;;  %v6519_v30 = vpop.permute.xlu0 %2421 }
 0x2f1   : > { %v2439_v47 = vsel %vm7102_vm7, %v2420_v12, %v6519_v30  ;;  %v3263_v63 = vld [vmem:[#allocation3 + $0x280] sm:$0xff] }
 0x2f2   : > { %2458 = vst [vmem:[#allocation3 + $0x238] sm:$0xf0] %v2439_v47  ;;  %v2353_v2 = vpop.permute.xlu1 %2352  ;;  %2559 = vrot.lane.b32.xlu0 %v6523_v0, %s4725_s12  ;;  %3378 = vmatpush1.msra.mxu0 %v3263_v63  ;;  %v3223_v63 = vld [vmem:[#allocation3 + $0x140] sm:$0xff] }
 0x2f3   : > { %v2373_v3 = vsel %vm7113_vm4, %v2353_v2, %v2355_v59  ;;  %v3214_v2 = vld [vmem:[#allocation3 + $0xf8] sm:$0xff] }
 0x2f4   : > { %2392 = vst [vmem:[#allocation3 + $0x230] sm:$0xf] %v2373_v3  ;;  %2358 = vrot.lane.b32.xlu1 %v6182_v39, %s4726_s10  ;;  %v2418_v4 = vpop.permute.xlu0 %2417 }
 0x2f5   : > { %v2438_v6 = vsel %vm7102_vm7, %v2418_v4, %v2420_v12  ;;  %vm2112_vm7 = vcmask 482304   ;;  %v3224_v12 = vld [vmem:[#allocation3 + $0x148] sm:$0xff]  ;;  %v3213_v4 = vld [vmem:[#allocation3 + $0xf0] sm:$0xff] }
 0x2f6   : > { %2457 = vst [vmem:[#allocation3 + $0x230] sm:$0xf0] %v2438_v6  ;;  %v2225_v7 = vpop.permute.xlu1 %2224  ;;  %2360 = vrot.lane.b32.xlu0 %v6499_v58, %s4726_s10 }
 0x2f8   : > { %2362 = vrot.lane.b32.xlu1 %v6535_v8, %s4726_s10  ;;  %v6541_v13 = vpop.permute.xlu0 %2226 }
 0x2f9   : > { %v2244_v5 = vsel %vm2242_vm1, %v2225_v7, %v6541_v13  ;;  %v3254_v14 = vld [vmem:[#allocation3 + $0x238] sm:$0xff] }
 0x2fa   : > { %2263 = vst [vmem:[#allocation3 + $0x1e8] sm:$0xf] %v2244_v5  ;;  %v2290_v16 = vpop.permute.xlu1 %2289  ;;  %2364 = vrot.lane.b32.xlu0 %v6513_v41, %s4726_s10  ;;  %3379 = vmatprep.subr.mxu0 %v3254_v14  ;;  %v4439_v14 = vld [vmem:[#allocation2 + $0xc] sm:$0xff] }
 0x2fc   : > { %2423 = vrot.lane.b32.xlu1 %v6138_v19, %s4727_s6  ;;  %v6549_v61 = vpop.permute.xlu0 %2291 }
 0x2fd   : > { %v2309_v46 = vsel %vm7103_vm14, %v2290_v16, %v6549_v61  ;;  %v3253_v20 = vld [vmem:[#allocation3 + $0x230] sm:$0xff] }
 0x2fe   : > { %2328 = vst [vmem:[#allocation3 + $0x1e8] sm:$0xf0] %v2309_v46  ;;  %v2223_v18 = vpop.permute.xlu1 %2222  ;;  %2425 = vrot.lane.b32.xlu0 %v6509_v36, %s4727_s6  ;;  %3380 = vmatpush1.msra.mxu0 %v3253_v20 }
 0x2ff   : > { %v2243_v11 = vsel %vm2242_vm1, %v2223_v18, %v2225_v7  ;;  %v3194_v18 = vld [vmem:[#allocation3 + $0x58] sm:$0xff] }
 0x300   : > { %2262 = vst [vmem:[#allocation3 + $0x1e0] sm:$0xf] %v2243_v11  ;;  %2427 = vrot.lane.b32.xlu1 %v6499_v58, %s4727_s6  ;;  %v2288_v22 = vpop.permute.xlu0 %2287 }
 0x301   : > { %v2308_v25 = vsel %vm7103_vm14, %v2288_v22, %v2290_v16  ;;  %vm2177_vm14 = vcmask 474112   ;;  %v3203_v16 = vld [vmem:[#allocation3 + $0xa0] sm:$0xff]  ;;  %v3193_v22 = vld [vmem:[#allocation3 + $0x50] sm:$0xff] }
 0x302   : > { %2327 = vst [vmem:[#allocation3 + $0x1e0] sm:$0xf0] %v2308_v25  ;;  %v2095_v53 = vpop.permute.xlu1 %2094  ;;  %2429 = vrot.lane.b32.xlu0 %v6523_v0, %s4727_s6 }
 0x304   : > { %2228 = vrot.lane.b32.xlu1 %v6182_v39, %s4728_s5  ;;  %v6563_v17 = vpop.permute.xlu0 %2096 }
 0x305   : > { %v2114_v31 = vsel %vm2112_vm7, %v2095_v53, %v6563_v17  ;;  %v3244_v27 = vld [vmem:[#allocation3 + $0x1e8] sm:$0xff] }
 0x306   : > { %2133 = vst [vmem:[#allocation3 + $0x198] sm:$0xf] %v2114_v31  ;;  %v2160_v34 = vpop.permute.xlu1 %2159  ;;  %2230 = vrot.lane.b32.xlu0 %v6499_v58, %s4728_s5  ;;  %3381 = vmatprep.subr.mxu0 %v3244_v27  ;;  %v3183_v27 = vld [vmem:[#allocation3] sm:$0xff] }
 0x308   : > { %2232 = vrot.lane.b32.xlu1 %v6535_v8, %s4728_s5  ;;  %v6571_v35 = vpop.permute.xlu0 %2161 }
 0x309   : > { %v2179_v28 = vsel %vm2177_vm14, %v2160_v34, %v6571_v35  ;;  %v3243_v38 = vld [vmem:[#allocation3 + $0x1e0] sm:$0xff] }
 0x30a   : > { %2198 = vst [vmem:[#allocation3 + $0x198] sm:$0xf0] %v2179_v28  ;;  %v2093_v40 = vpop.permute.xlu1 %2092  ;;  %2234 = vrot.lane.b32.xlu0 %v6513_v41, %s4728_s5  ;;  %3382 = vmatpush1.msra.mxu0 %v3243_v38 }
 0x30b   : > { %v2113_v44 = vsel %vm2112_vm7, %v2093_v40, %v2095_v53  ;;  %v3184_v53 = vld [vmem:[#allocation3 + $0x8] sm:$0xff] }
 0x30c   : > { %2132 = vst [vmem:[#allocation3 + $0x190] sm:$0xf] %v2113_v44  ;;  %2293 = vrot.lane.b32.xlu1 %v6138_v19, %s7108_s2  ;;  %v2158_v45 = vpop.permute.xlu0 %2157  ;;  %v6636_v44 = vld [vmem:[#allocation2 + $0x2c] sm:$0xff] }
 0x30d   : > { %v2178_v48 = vsel %vm2177_vm14, %v2158_v45, %v2160_v34 }
 0x30e   : > { %2197 = vst [vmem:[#allocation3 + $0x190] sm:$0xf0] %v2178_v48  ;;  %v3139_v51 = vpop.permute.xlu1 %3138  ;;  %2295 = vrot.lane.b32.xlu0 %v6509_v36, %s7108_s2 }
 0x30f   : > { %v3155_v52 = vsel %vm3152_vm5, %v6374_v42, %v3139_v51 }
 0x310   : > { %3174 = vst [vmem:[#allocation3 + $0x420] sm:$0xf] %v3155_v52  ;;  %2297 = vrot.lane.b32.xlu1 %v6499_v58, %s7108_s2  ;;  %v3141_v10 = vpop.permute.xlu0 %3140 }
 0x311   : > { %v3156_v56 = vsel %vm3152_vm5, %v3139_v51, %v3141_v10  ;;  %v3234_v50 = vld [vmem:[#allocation3 + $0x198] sm:$0xff]  ;;  %v6648_v51 = vcombine.high %v6636_v44, %v6636_v44 }
 0x312   : > { %3175 = vst [vmem:[#allocation3 + $0x428] sm:$0xf] %v3156_v56  ;;  %v3143_v19 = vpop.permute.xlu1 %3142  ;;  %2299 = vrot.lane.b32.xlu0 %v6523_v0, %s7108_s2  ;;  %3383 = vmatprep.subr.mxu0 %v3234_v50  ;;  %s7165_s2 = sld [smem:[#allocation22_spill]] }
 0x313   : > { %v3157_v57 = vsel %vm3152_vm5, %v3141_v10, %v3143_v19 }
 0x314   : > { %3176 = vst [vmem:[#allocation3 + $0x430] sm:$0xf] %v3157_v57  ;;  %2098 = vrot.lane.b32.xlu1 %v6182_v39, %s7106_s26  ;;  %v6593_v42 = vpop.permute.xlu0 %3144 }
 0x315   : > { %v3158_v59 = vsel %vm3152_vm5, %v3143_v19, %v6593_v42  ;;  %v3233_v21 = vld [vmem:[#allocation3 + $0x190] sm:$0xff] }
 0x316   : > { %3177 = vst [vmem:[#allocation3 + $0x438] sm:$0xf] %v3158_v59  ;;  %v3009_v60 = vpop.permute.xlu1 %3008  ;;  %2100 = vrot.lane.b32.xlu0 %v6499_v58, %s7106_s26  ;;  %3384 = vmatpush1.msra.mxu0 %v3233_v21 }
 0x317   : > { %v3025_v47 = vsel %vm7110_vm8, %v6387_v49, %v3009_v60  ;;  %3385 = vmatprep.subr.mxu0 %v3224_v12  ;;  %v3204_v49 = vld [vmem:[#allocation3 + $0xa8] sm:$0xff] }
 0x318   : > { %3044 = vst [vmem:[#allocation3 + $0x3d0] sm:$0xf] %v3025_v47  ;;  %2102 = vrot.lane.b32.xlu1 %v6535_v8, %s7106_s26  ;;  %3386 = vmatpush1.msra.mxu0 %v3223_v63  ;;  %v3011_v39 = vpop.permute.xlu0 %3010  ;;  %v3315_v8 = vld [vmem:[#allocation3 + $0x420] sm:$0xf]  ;;  %v6623_v34 = vld [vmem:[%s7165_s2] sm:$0xff]  ;;  %v6670_v63 = vcombine.low %v6636_v44, %v6636_v44 }
 0x319   : > { %v3026_v3 = vsel %vm7110_vm8, %v3009_v60, %v3011_v39  ;;  %3387 = vmatprep.subr.mxu0 %v3214_v2  ;;  %v3316_v6 = vld [vmem:[#allocation3 + $0x428] sm:$0xf] }
 0x31a   : > { %3045 = vst [vmem:[#allocation3 + $0x3d8] sm:$0xf] %v3026_v3  ;;  %v3013_v7 = vpop.permute.xlu1 %3012  ;;  %2104 = vrot.lane.b32.xlu0 %v6513_v41, %s7106_s26  ;;  %3388 = vmatpush1.msra.mxu0 %v3213_v4  ;;  %s7170_s26 = smov 45  }
 0x31b   : > { %v3027_v5 = vsel %vm7110_vm8, %v3011_v39, %v3013_v7  ;;  %3939 = vmatprep.subr.msk.mxu1 %vm342_vm10, %v3316_v6  ;;  %3389 = vmatprep.subr.mxu0 %v3204_v49  ;;  %v3317_v40 = vld [vmem:[#allocation3 + $0x430] sm:$0xf] }
 0x31c   : > { %3046 = vst [vmem:[#allocation3 + $0x3e0] sm:$0xf] %v3027_v5  ;;  %3940 = vmatpush1.msk.msra.mxu1 %vm342_vm10, %v3315_v8  ;;  %2163 = vrot.lane.b32.xlu1 %v4439_v14, %s4729_s9  ;;  %v6610_v46 = vpop.permute.xlu0 %3014 }
 0x31d   : > { %3390 = vmatpush1.msra.mxu0 %v3203_v16  ;;  %v3028_v20 = vsel %vm7110_vm8, %v3013_v7, %v6610_v46  ;;  %vm3329_vm8 = vcmask 883712   ;;  %v3318_v28 = vld [vmem:[#allocation3 + $0x438] sm:$0xf] }
 0x31e   : > { %3047 = vst [vmem:[#allocation3 + $0x3e8] sm:$0xf] %v3028_v20  ;;  %3391 = vmatprep.subr.mxu0 %v3194_v18  ;;  %v3074_v11 = vpop.permute.xlu1 %3073  ;;  %2165 = vrot.lane.b32.xlu0 %v6509_v36, %s4729_s9 }
 0x31f   : > { %v3090_v25 = vsel %vm3087_vm3, %v6400_v54, %v3074_v11  ;;  %3392 = vmatpush1.msra.mxu0 %v3193_v22  ;;  %v6628_v54 = vcombine.high %v6358_v32, %v6358_v32 }
 0x320   : > { %3109 = vst [vmem:[#allocation3 + $0x3d0] sm:$0xf0] %v3090_v25  ;;  %3393 = vmatprep.subr.mxu0 %v3184_v53  ;;  %2167 = vrot.lane.b32.xlu1 %v6499_v58, %s4729_s9  ;;  %v3076_v31 = vpop.permute.xlu0 %3075 }
 0x321   : > { %v3091_v36 = vsel %vm3087_vm3, %v3074_v11, %v3076_v31  ;;  %3394 = vmatpush1.msra.mxu0 %v3183_v27 }
 0x322   : > { %3110 = vst [vmem:[#allocation3 + $0x3d8] sm:$0xf0] %v3091_v36  ;;  %3942 = vmatprep.subr.msk.mxu0 %vm342_vm10, %v3318_v28  ;;  %v3078_v58 = vpop.permute.xlu1 %3077  ;;  %2169 = vrot.lane.b32.xlu0 %v6523_v0, %s4729_s9 }
 0x323   : > { %v3092_v38 = vsel %vm3087_vm3, %v3076_v31, %v3078_v58  ;;  %3938 = vmatmul.mubr.msk.f32.vlgmr.msra.gmra.mxu0 %vm3329_vm8, %v6623_v34 }
 0x324   : > { %3111 = vst [vmem:[#allocation3 + $0x3e0] sm:$0xf0] %v3092_v38  ;;  %3943 = vmatpush1.msk.msra.mxu0 %vm342_vm10, %v3317_v40  ;;  %3146 = vrot.lane.b32.xlu1 %v6628_v54, %s4717_s11  ;;  %v6641_v45 = vpop.permute.xlu0 %3079 }
 0x325   : > { %v3093_v48 = vsel %vm3087_vm3, %v3078_v58, %v6641_v45  ;;  %3569 = vmatprep.mubr.f32.mxu0 %v4702_v55 }
 0x326   : > { %3112 = vst [vmem:[#allocation3 + $0x3e8] sm:$0xf0] %v3093_v48  ;;  %v2879_v0 = vpop.permute.xlu1 %2878  ;;  %3148 = vrot.lane.b32.xlu0 %v6636_v44, %s4717_s11 }
 0x327   : > { %v2895_v52 = vsel %vm2892_vm2, %v6415_v62, %v2879_v0  ;;  %v3305_v57 = vld [vmem:[#allocation3 + $0x3d0] sm:$0xff] }
 0x328   : > { %2914 = vst [vmem:[#allocation3 + $0x380] sm:$0xf] %v2895_v52  ;;  %3150 = vrot.lane.b32.xlu1 %v6648_v51, %s4717_s11  ;;  %v2881_v10 = vpop.permute.xlu0 %2880 }
 0x329   : > { %v2896_v56 = vsel %vm2892_vm2, %v2879_v0, %v2881_v10  ;;  %v3306_v50 = vld [vmem:[#allocation3 + $0x3d8] sm:$0xff] }
 0x32a   : > { %2915 = vst [vmem:[#allocation3 + $0x388] sm:$0xf] %v2896_v56  ;;  %v2883_v19 = vpop.permute.xlu1 %2882  ;;  %3016 = vrot.lane.b32.xlu0 %v6628_v54, %s4718_s4  ;;  %3440 = vmatprep.subr.mxu1 %v3306_v50 }
 0x32b   : > { %v2897_v59 = vsel %vm2892_vm2, %v2881_v10, %v2883_v19  ;;  %3441 = vmatpush1.msra.mxu1 %v3305_v57  ;;  %v3307_v47 = vld [vmem:[#allocation3 + $0x3e0] sm:$0xff] }
 0x32c   : > { %2916 = vst [vmem:[#allocation3 + $0x390] sm:$0xf] %v2897_v59  ;;  %3018 = vrot.lane.b32.xlu1 %v6636_v44, %s4718_s4  ;;  %v6662_v62 = vpop.permute.xlu0 %2884 }
 0x32d   : > { %v2898_v21 = vsel %vm2892_vm2, %v2883_v19, %v6662_v62  ;;  %v3308_v60 = vld [vmem:[#allocation3 + $0x3e8] sm:$0xff] }
 0x32e   : > { %2917 = vst [vmem:[#allocation3 + $0x398] sm:$0xf] %v2898_v21  ;;  %v2944_v12 = vpop.permute.xlu1 %2943  ;;  %3081 = vrot.lane.b32.xlu0 %v6358_v32, %s4683_s29  ;;  %3511 = vmatprep.subr.mxu0 %v3308_v60 }
 0x32f   : > { %v2960_v39 = vsel %vm2957_vm9, %v6423_v1, %v2944_v12  ;;  %3512 = vmatpush1.msra.mxu0 %v3307_v47 }
 0x330   : > { %2979 = vst [vmem:[#allocation3 + $0x380] sm:$0xf0] %v2960_v39  ;;  %3083 = vrot.lane.b32.xlu1 %v6670_v63, %s4683_s29  ;;  %v2946_v2 = vpop.permute.xlu0 %2945 }
 0x331   : > { %v2961_v3 = vsel %vm2957_vm9, %v2944_v12, %v2946_v2 }
 0x332   : > { %2980 = vst [vmem:[#allocation3 + $0x388] sm:$0xf0] %v2961_v3  ;;  %v2948_v4 = vpop.permute.xlu1 %2947  ;;  %3020 = vrot.lane.b32.xlu0 %v6648_v51, %s4718_s4  ;;  %s7177_s4 = sld [smem:[#allocation23_spill]] }
 0x333   : > { %v2962_v6 = vsel %vm2957_vm9, %v2946_v2, %v2948_v4 }
 0x334   : > { %2981 = vst [vmem:[#allocation3 + $0x390] sm:$0xf0] %v2962_v6  ;;  %3085 = vrot.lane.b32.xlu1 %v6636_v44, %s4683_s29  ;;  %v6682_v1 = vpop.permute.xlu0 %2949  ;;  %s7171_s29 = smov 59  }
 0x335   : > { %v2963_v7 = vsel %vm2957_vm9, %v2948_v4, %v6682_v1 }
 0x336   : > { %2982 = vst [vmem:[#allocation3 + $0x398] sm:$0xf0] %v2963_v7  ;;  %v2749_v49 = vpop.permute.xlu1 %2748  ;;  %2886 = vrot.lane.b32.xlu0 %v6628_v54, %s4719_s18 }
 0x337   : > { %v2765_v5 = vsel %vm2762_vm0, %v6437_v9, %v2749_v49  ;;  %v3295_v18 = vld [vmem:[#allocation3 + $0x380] sm:$0xff] }
 0x338   : > { %2784 = vst [vmem:[#allocation3 + $0x330] sm:$0xf] %v2765_v5  ;;  %2888 = vrot.lane.b32.xlu1 %v6636_v44, %s4719_s18  ;;  %v2751_v8 = vpop.permute.xlu0 %2750 }
 0x339   : > { %v2766_v14 = vsel %vm2762_vm0, %v2749_v49, %v2751_v8  ;;  %v3296_v16 = vld [vmem:[#allocation3 + $0x388] sm:$0xff] }
 0x33a   : > { %2785 = vst [vmem:[#allocation3 + $0x338] sm:$0xf] %v2766_v14  ;;  %v2753_v20 = vpop.permute.xlu1 %2752  ;;  %2951 = vrot.lane.b32.xlu0 %v6358_v32, %s4720_s13  ;;  %3442 = vmatprep.subr.mxu1 %v3296_v16  ;;  %v6760_v14 = vld [vmem:[#allocation2 + $0x24] sm:$0xff] }
 0x33b   : > { %v2767_v11 = vsel %vm2762_vm0, %v2751_v8, %v2753_v20  ;;  %3443 = vmatpush1.msra.mxu1 %v3295_v18  ;;  %v3297_v31 = vld [vmem:[#allocation3 + $0x390] sm:$0xff]  ;;  %v6772_v18 = vcombine.low %v6760_v14, %v6760_v14 }
 0x33c   : > { %2786 = vst [vmem:[#allocation3 + $0x340] sm:$0xf] %v2767_v11  ;;  %2953 = vrot.lane.b32.xlu1 %v6670_v63, %s4720_s13  ;;  %v6698_v9 = vpop.permute.xlu0 %2754 }
 0x33d   : > { %v2768_v22 = vsel %vm2762_vm0, %v2753_v20, %v6698_v9  ;;  %v3298_v25 = vld [vmem:[#allocation3 + $0x398] sm:$0xff] }
 0x33e   : > { %2787 = vst [vmem:[#allocation3 + $0x348] sm:$0xf] %v2768_v22  ;;  %v2814_v53 = vpop.permute.xlu1 %2813  ;;  %2890 = vrot.lane.b32.xlu0 %v6648_v51, %s4719_s18  ;;  %3513 = vmatprep.subr.mxu0 %v3298_v25  ;;  %v6778_v22 = vcombine.high %v6760_v14, %v6760_v14  ;;  %s314_s18 = sand.u32 1, %s4596_s16  }
 0x33f   : > { %v2830_v27 = vsel %vm2827_vm12, %v6445_v15, %v2814_v53  ;;  %3514 = vmatpush1.msra.mxu0 %v3297_v31  ;;  %s3730_s7 = scalar_lea.sflag [#allocation6], %s314_s18 }
 0x340   : > { %2849 = vst [vmem:[#allocation3 + $0x330] sm:$0xf0] %v2830_v27  ;;  %2955 = vrot.lane.b32.xlu1 %v6636_v44, %s4720_s13  ;;  %v2816_v36 = vpop.permute.xlu0 %2815  ;;  %s3972_s13 = smul.u32 80, %s314_s18 }
 0x341   : > { %v2831_v28 = vsel %vm2827_vm12, %v2814_v53, %v2816_v36 }
 0x342   : > { %2850 = vst [vmem:[#allocation3 + $0x338] sm:$0xf0] %v2831_v28  ;;  %v2818_v58 = vpop.permute.xlu1 %2817  ;;  %2756 = vrot.lane.b32.xlu0 %v6628_v54, %s4721_s3 }
 0x343   : > { %v2832_v38 = vsel %vm2827_vm12, %v2816_v36, %v2818_v58 }
 0x344   : > { %2851 = vst [vmem:[#allocation3 + $0x340] sm:$0xf0] %v2832_v38  ;;  %2758 = vrot.lane.b32.xlu1 %v6636_v44, %s4721_s3  ;;  %v6714_v15 = vpop.permute.xlu0 %2819 }
 0x345   : > { %v2833_v40 = vsel %vm2827_vm12, %v2818_v58, %v6714_v15 }
 0x346   : > { %2852 = vst [vmem:[#allocation3 + $0x348] sm:$0xf0] %v2833_v40  ;;  %v2619_v48 = vpop.permute.xlu1 %2618  ;;  %2821 = vrot.lane.b32.xlu0 %v6358_v32, %s4722_s17 }
 0x347   : > { %v2635_v0 = vsel %vm2632_vm13, %v6459_v24, %v2619_v48  ;;  %v3285_v19 = vld [vmem:[#allocation3 + $0x330] sm:$0xff] }
 0x348   : > { %2654 = vst [vmem:[#allocation3 + $0x2e0] sm:$0xf] %v2635_v0  ;;  %2823 = vrot.lane.b32.xlu1 %v6670_v63, %s4722_s17  ;;  %v2621_v52 = vpop.permute.xlu0 %2620 }
 0x349   : > { %v2636_v10 = vsel %vm2632_vm13, %v2619_v48, %v2621_v52  ;;  %v3286_v56 = vld [vmem:[#allocation3 + $0x338] sm:$0xff] }
 0x34a   : > { %2655 = vst [vmem:[#allocation3 + $0x2e8] sm:$0xf] %v2636_v10  ;;  %v2623_v50 = vpop.permute.xlu1 %2622  ;;  %2760 = vrot.lane.b32.xlu0 %v6648_v51, %s4721_s3  ;;  %3444 = vmatprep.subr.mxu1 %v3286_v56 }
 0x34b   : > { %v2637_v57 = vsel %vm2632_vm13, %v2621_v52, %v2623_v50  ;;  %3445 = vmatpush1.msra.mxu1 %v3285_v19  ;;  %v3287_v12 = vld [vmem:[#allocation3 + $0x340] sm:$0xff] }
 0x34c   : > { %2656 = vst [vmem:[#allocation3 + $0x2f0] sm:$0xf] %v2637_v57  ;;  %2825 = vrot.lane.b32.xlu1 %v6636_v44, %s4722_s17  ;;  %v6730_v24 = vpop.permute.xlu0 %2624 }
 0x34d   : > { %v2638_v59 = vsel %vm2632_vm13, %v2623_v50, %v6730_v24  ;;  %v3288_v21 = vld [vmem:[#allocation3 + $0x348] sm:$0xff] }
 0x34e   : > { %2657 = vst [vmem:[#allocation3 + $0x2f8] sm:$0xf] %v2638_v59  ;;  %v2684_v60 = vpop.permute.xlu1 %2683  ;;  %2626 = vrot.lane.b32.xlu0 %v6628_v54, %s4723_s30  ;;  %3515 = vmatprep.subr.mxu0 %v3288_v21 }
 0x34f   : > { %v2700_v47 = vsel %vm2697_vm6, %v6467_v29, %v2684_v60  ;;  %3516 = vmatpush1.msra.mxu0 %v3287_v12 }
 0x350   : > { %2719 = vst [vmem:[#allocation3 + $0x2e0] sm:$0xf0] %v2700_v47  ;;  %2628 = vrot.lane.b32.xlu1 %v6636_v44, %s4723_s30  ;;  %v2686_v39 = vpop.permute.xlu0 %2685 }
 0x351   : > { %v2701_v2 = vsel %vm2697_vm6, %v2684_v60, %v2686_v39 }
 0x352   : > { %2720 = vst [vmem:[#allocation3 + $0x2e8] sm:$0xf0] %v2701_v2  ;;  %v2688_v3 = vpop.permute.xlu1 %2687  ;;  %2691 = vrot.lane.b32.xlu0 %v6358_v32, %s4724_s8 }
 0x353   : > { %v2702_v54 = vsel %vm2697_vm6, %v2686_v39, %v2688_v3 }
 0x354   : > { %2721 = vst [vmem:[#allocation3 + $0x2f0] sm:$0xf0] %v2702_v54  ;;  %2693 = vrot.lane.b32.xlu1 %v6670_v63, %s4724_s8  ;;  %v6746_v29 = vpop.permute.xlu0 %2689 }
 0x355   : > { %v2703_v4 = vsel %vm2697_vm6, %v2688_v3, %v6746_v29 }
 0x356   : > { %2722 = vst [vmem:[#allocation3 + $0x2f8] sm:$0xf0] %v2703_v4  ;;  %v2489_v6 = vpop.permute.xlu1 %2488  ;;  %2630 = vrot.lane.b32.xlu0 %v6648_v51, %s4723_s30  ;;  %s6994_s30 = scalar_lea.vmem [#allocation9], %s3972_s13 }
 0x357   : > { %v2505_v7 = vsel %vm7112_vm15, %v6481_v43, %v2489_v6  ;;  %v3275_v8 = vld [vmem:[#allocation3 + $0x2e0] sm:$0xff] }
 0x358   : > { %2524 = vst [vmem:[#allocation3 + $0x290] sm:$0xf] %v2505_v7  ;;  %2695 = vrot.lane.b32.xlu1 %v6636_v44, %s4724_s8  ;;  %v2491_v32 = vpop.permute.xlu0 %2490  ;;  %s7214_s8 = sld [smem:[#allocation15_spill]] }
 0x359   : > { %v2506_v63 = vsel %vm7112_vm15, %v2489_v6, %v2491_v32  ;;  %v3276_v49 = vld [vmem:[#allocation3 + $0x2e8] sm:$0xff] }
 0x35a   : > { %2525 = vst [vmem:[#allocation3 + $0x298] sm:$0xf] %v2506_v63  ;;  %v2493_v5 = vpop.permute.xlu1 %2492  ;;  %2496 = vrot.lane.b32.xlu0 %v6350_v26, %s4691_s21  ;;  %3446 = vmatprep.subr.mxu1 %v3276_v49 }
 0x35b   : > { %v2507_v51 = vsel %vm7112_vm15, %v2491_v32, %v2493_v5  ;;  %3447 = vmatpush1.msra.mxu1 %v3275_v8  ;;  %v3277_v26 = vld [vmem:[#allocation3 + $0x2f0] sm:$0xff] }
 0x35c   : > { %2526 = vst [vmem:[#allocation3 + $0x2a0] sm:$0xf] %v2507_v51  ;;  %2498 = vrot.lane.b32.xlu1 %v6760_v14, %s4691_s21  ;;  %v6764_v43 = vpop.permute.xlu0 %2494 }
 0x35d   : > { %v2508_v44 = vsel %vm7112_vm15, %v2493_v5, %v6764_v43  ;;  %v3278_v16 = vld [vmem:[#allocation3 + $0x2f8] sm:$0xff] }
 0x35e   : > { %2527 = vst [vmem:[#allocation3 + $0x2a8] sm:$0xf] %v2508_v44  ;;  %v2554_v20 = vpop.permute.xlu1 %2553  ;;  %2561 = vrot.lane.b32.xlu0 %v6513_v41, %s4725_s12  ;;  %3517 = vmatprep.subr.mxu0 %v3278_v16 }
 0x35f   : > { %v2570_v11 = vsel %vm7111_vm11, %v6489_v33, %v2554_v20  ;;  %3518 = vmatpush1.msra.mxu0 %v3277_v26  ;;  %v6788_v33 = vcombine.high %v6513_v41, %v6513_v41 }
 0x360   : > { %2589 = vst [vmem:[#allocation3 + $0x290] sm:$0xf0] %v2570_v11  ;;  %2563 = vrot.lane.b32.xlu1 %v6772_v18, %s4725_s12  ;;  %v2556_v25 = vpop.permute.xlu0 %2555 }
 0x361   : > { %v2571_v53 = vsel %vm7111_vm11, %v2554_v20, %v2556_v25 }
 0x362   : > { %2590 = vst [vmem:[#allocation3 + $0x298] sm:$0xf0] %v2571_v53  ;;  %v2558_v31 = vpop.permute.xlu1 %2557  ;;  %2500 = vrot.lane.b32.xlu0 %v6778_v22, %s4691_s21  ;;  %s7176_s21 = smov 60  }
 0x363   : > { %v2572_v27 = vsel %vm7111_vm11, %v2556_v25, %v2558_v31 }
 0x364   : > { %2591 = vst [vmem:[#allocation3 + $0x2a0] sm:$0xf0] %v2572_v27  ;;  %2565 = vrot.lane.b32.xlu1 %v6760_v14, %s4725_s12  ;;  %v6792_v36 = vpop.permute.xlu0 %2559  ;;  %s3973_s12 = smul.u32 10, %s7134_s25 }
 0x365   : > { %v2573_v28 = vsel %vm7111_vm11, %v2558_v31, %v6792_v36  ;;  %vm7166_vm11 = vcmask 261120  }
 0x366   : > { %2592 = vst [vmem:[#allocation3 + $0x2a8] sm:$0xf0] %v2573_v28  ;;  %v2359_v58 = vpop.permute.xlu1 %2358  ;;  %2366 = vrot.lane.b32.xlu0 %v6788_v33, %s4726_s10  ;;  %vm7167_vm15 = vmmov %vm7166_vm11 }
 0x367   : > { %v2375_v38 = vsel %vm7113_vm4, %v6505_v23, %v2359_v58  ;;  %v3265_v10 = vld [vmem:[#allocation3 + $0x290] sm:$0xff] }
 0x368   : > { %2394 = vst [vmem:[#allocation3 + $0x240] sm:$0xf] %v2375_v38  ;;  %2368 = vrot.lane.b32.xlu1 %v6760_v14, %s4726_s10  ;;  %v2361_v40 = vpop.permute.xlu0 %2360 }
 0x369   : > { %v2376_v48 = vsel %vm7113_vm4, %v2359_v58, %v2361_v40  ;;  %v3266_v0 = vld [vmem:[#allocation3 + $0x298] sm:$0xff] }
 0x36a   : > { %2395 = vst [vmem:[#allocation3 + $0x248] sm:$0xf] %v2376_v48  ;;  %v2363_v52 = vpop.permute.xlu1 %2362  ;;  %2431 = vrot.lane.b32.xlu0 %v6513_v41, %s4727_s6  ;;  %3448 = vmatprep.subr.mxu1 %v3266_v0 }
 0x36b   : > { %v2377_v56 = vsel %vm7113_vm4, %v2361_v40, %v2363_v52  ;;  %3449 = vmatpush1.msra.mxu1 %v3265_v10  ;;  %v3267_v59 = vld [vmem:[#allocation3 + $0x2a0] sm:$0xff] }
 0x36c   : > { %2396 = vst [vmem:[#allocation3 + $0x250] sm:$0xf] %v2377_v56  ;;  %2433 = vrot.lane.b32.xlu1 %v6772_v18, %s4727_s6  ;;  %v6808_v23 = vpop.permute.xlu0 %2364 }
 0x36d   : > { %v2378_v50 = vsel %vm7113_vm4, %v2363_v52, %v6808_v23  ;;  %v3268_v19 = vld [vmem:[#allocation3 + $0x2a8] sm:$0xff]  ;;  %vm7168_vm4 = vmmov %vm7166_vm11 }
 0x36e   : > { %2397 = vst [vmem:[#allocation3 + $0x258] sm:$0xf] %v2378_v50  ;;  %v2424_v57 = vpop.permute.xlu1 %2423  ;;  %2370 = vrot.lane.b32.xlu0 %v6778_v22, %s4726_s10  ;;  %3519 = vmatprep.subr.mxu0 %v3268_v19  ;;  %v4730_v19 = vmov 0   ;;  %s3974_s10 = smul.u32 20, %s7214_s8 }
 0x36f   : > { %v2440_v21 = vsel %vm7166_vm11, %v6519_v30, %v2424_v57  ;;  %3520 = vmatpush1.msra.mxu0 %v3267_v59  ;;  %vm7169_vm11 = vmmov %vm7168_vm4  ;;  %4179 = vset.pattern.permute.xlu0 %v4730_v19  ;;  %v3187_v19 = vld [vmem:[#allocation3 + $0x20] sm:$0xff] }
 0x370   : > { %2459 = vst [vmem:[#allocation3 + $0x240] sm:$0xf0] %v2440_v21  ;;  %2435 = vrot.lane.b32.xlu1 %v6760_v14, %s4727_s6  ;;  %v2426_v60 = vpop.permute.xlu0 %2425  ;;  %s3742_s6 = sadd.s32 %s3974_s10, %s3973_s12 }
 0x371   : > { %v2441_v12 = vsel %vm7167_vm15, %v2424_v57, %v2426_v60  ;;  %vm7172_vm15 = vcmask 367616  }
 0x372   : > { %2460 = vst [vmem:[#allocation3 + $0x248] sm:$0xf0] %v2441_v12  ;;  %v2428_v47 = vpop.permute.xlu1 %2427  ;;  %2236 = vrot.lane.b32.xlu0 %v6788_v33, %s4728_s5 }
 0x373   : > { %v2442_v39 = vsel %vm7168_vm4, %v2426_v60, %v2428_v47  ;;  %vm7173_vm4 = vmmov %vm7172_vm15 }
 0x374   : > { %2461 = vst [vmem:[#allocation3 + $0x250] sm:$0xf0] %v2442_v39  ;;  %2238 = vrot.lane.b32.xlu1 %v6760_v14, %s4728_s5  ;;  %v6824_v30 = vpop.permute.xlu0 %2429 }
 0x375   : > { %v2443_v2 = vsel %vm7169_vm11, %v2428_v47, %v6824_v30  ;;  %vm7174_vm11 = vmmov %vm7173_vm4 }
 0x376   : > { %2462 = vst [vmem:[#allocation3 + $0x258] sm:$0xf0] %v2443_v2  ;;  %v2229_v3 = vpop.permute.xlu1 %2228  ;;  %2301 = vrot.lane.b32.xlu0 %v6513_v41, %s7170_s26 }
 0x377   : > { %v2245_v54 = vsel %vm2242_vm1, %v6541_v13, %v2229_v3  ;;  %v3255_v63 = vld [vmem:[#allocation3 + $0x240] sm:$0xff] }
 0x378   : > { %2264 = vst [vmem:[#allocation3 + $0x1f0] sm:$0xf] %v2245_v54  ;;  %2303 = vrot.lane.b32.xlu1 %v6772_v18, %s7170_s26  ;;  %v2231_v4 = vpop.permute.xlu0 %2230 }
 0x379   : > { %v2246_v6 = vsel %vm2242_vm1, %v2229_v3, %v2231_v4  ;;  %v3256_v7 = vld [vmem:[#allocation3 + $0x248] sm:$0xff] }
 0x37a   : > { %2265 = vst [vmem:[#allocation3 + $0x1f8] sm:$0xf] %v2246_v6  ;;  %v2233_v32 = vpop.permute.xlu1 %2232  ;;  %2240 = vrot.lane.b32.xlu0 %v6778_v22, %s4728_s5  ;;  %3450 = vmatprep.subr.mxu1 %v3256_v7  ;;  %v3225_v7 = vld [vmem:[#allocation3 + $0x150] sm:$0xff]  ;;  %s3951_s5 = sshll.u32 %s3742_s6, 7 }
 0x37b   : > { %v2247_v49 = vsel %vm2242_vm1, %v2231_v4, %v2233_v32  ;;  %3451 = vmatpush1.msra.mxu1 %v3255_v63  ;;  %v3257_v44 = vld [vmem:[#allocation3 + $0x250] sm:$0xff]  ;;  %v3226_v4 = vld [vmem:[#allocation3 + $0x158] sm:$0xff] }
 0x37c   : > { %2266 = vst [vmem:[#allocation3 + $0x200] sm:$0xf] %v2247_v49  ;;  %2305 = vrot.lane.b32.xlu1 %v6760_v14, %s7170_s26  ;;  %v6840_v13 = vpop.permute.xlu0 %2234 }
 0x37d   : > { %v2248_v5 = vsel %vm2242_vm1, %v2233_v32, %v6840_v13  ;;  %v3258_v8 = vld [vmem:[#allocation3 + $0x258] sm:$0xff]  ;;  %v3216_v32 = vld [vmem:[#allocation3 + $0x108] sm:$0xff] }
 0x37e   : > { %2267 = vst [vmem:[#allocation3 + $0x208] sm:$0xf] %v2248_v5  ;;  %v2294_v51 = vpop.permute.xlu1 %2293  ;;  %2106 = vrot.lane.b32.xlu0 %v6788_v33, %s7171_s29  ;;  %3521 = vmatprep.subr.mxu0 %v3258_v8  ;;  %v3215_v5 = vld [vmem:[#allocation3 + $0x100] sm:$0xff] }
 0x37f   : > { %v2310_v16 = vsel %vm7172_vm15, %v6549_v61, %v2294_v51  ;;  %3522 = vmatpush1.msra.mxu0 %v3257_v44  ;;  %vm7175_vm15 = vmmov %vm7173_vm4  ;;  %v3206_v44 = vld [vmem:[#allocation3 + $0xb8] sm:$0xff] }
 0x380   : > { %2329 = vst [vmem:[#allocation3 + $0x1f0] sm:$0xf0] %v2310_v16  ;;  %2108 = vrot.lane.b32.xlu1 %v6760_v14, %s7171_s29  ;;  %v2296_v20 = vpop.permute.xlu0 %2295  ;;  %v3228_v16 = vld [vmem:[#allocation3 + $0x168] sm:$0xff] }
 0x381   : > { %v2311_v26 = vsel %vm7173_vm4, %v2294_v51, %v2296_v20  ;;  %vm7178_vm4 = vcmask 191488  }
 0x382   : > { %2330 = vst [vmem:[#allocation3 + $0x1f8] sm:$0xf0] %v2311_v26  ;;  %v2298_v11 = vpop.permute.xlu1 %2297  ;;  %2171 = vrot.lane.b32.xlu0 %v6513_v41, %s4729_s9  ;;  %v3227_v26 = vld [vmem:[#allocation3 + $0x160] sm:$0xff] }
 0x383   : > { %v2312_v25 = vsel %vm7174_vm11, %v2296_v20, %v2298_v11  ;;  %vm7179_vm11 = vcmask 752640  }
 0x384   : > { %2331 = vst [vmem:[#allocation3 + $0x200] sm:$0xf0] %v2312_v25  ;;  %2173 = vrot.lane.b32.xlu1 %v6772_v18, %s4729_s9  ;;  %v6856_v61 = vpop.permute.xlu0 %2299  ;;  %v3196_v25 = vld [vmem:[#allocation3 + $0x68] sm:$0xff] }
 0x385   : > { %v2313_v53 = vsel %vm7175_vm15, %v2298_v11, %v6856_v61 }
 0x386   : > { %2332 = vst [vmem:[#allocation3 + $0x208] sm:$0xf0] %v2313_v53  ;;  %v2099_v31 = vpop.permute.xlu1 %2098  ;;  %2110 = vrot.lane.b32.xlu0 %v6778_v22, %s7171_s29  ;;  %v3218_v53 = vld [vmem:[#allocation3 + $0x118] sm:$0xff]  ;;  %s7215_s29 = sld [smem:[#allocation24_spill]] }
 0x387   : > { %v2115_v27 = vsel %vm2112_vm7, %v6563_v17, %v2099_v31  ;;  %v3245_v38 = vld [vmem:[#allocation3 + $0x1f0] sm:$0xff] }
 0x388   : > { %2134 = vst [vmem:[#allocation3 + $0x1a0] sm:$0xf] %v2115_v27  ;;  %2175 = vrot.lane.b32.xlu1 %v6760_v14, %s4729_s9  ;;  %v2101_v41 = vpop.permute.xlu0 %2100  ;;  %v3195_v27 = vld [vmem:[#allocation3 + $0x60] sm:$0xff]  ;;  %s3746_s9 = sshll.u32 %s6994_s30, 4  ;;  %s3747_s9 = int_to_ptr.vmem [resolvable:$true] %s3746_s9 }
 0x389   : > { %v2116_v33 = vsel %vm2112_vm7, %v2099_v31, %v2101_v41  ;;  %v3246_v28 = vld [vmem:[#allocation3 + $0x1f8] sm:$0xff]  ;;  %s4493_s11 = scalar_lea.vmem %s3747_s9, 1280 }
 0x38a   : > { %2135 = vst [vmem:[#allocation3 + $0x1a8] sm:$0xf] %v2116_v33  ;;  %v2103_v58 = vpop.permute.xlu1 %2102  ;;  %2043 = vrot.lane.b32.xlu0 %v6772_v18, %s7176_s21  ;;  %3452 = vmatprep.subr.mxu1 %v3246_v28  ;;  %v3186_v28 = vld [vmem:[#allocation3 + $0x18] sm:$0xff]  ;;  %p4494_p11 = scmp.ne.s32.totalorder %s3747_s9, %s4493_s11 }
 0x38b   : > { %v2117_v22 = vsel %vm2112_vm7, %v2101_v41, %v2103_v58  ;;  %3453 = vmatpush1.msra.mxu1 %v3245_v38  ;;  %v3247_v52 = vld [vmem:[#allocation3 + $0x200] sm:$0xff]  ;;  %v3217_v41 = vld [vmem:[#allocation3 + $0x110] sm:$0xff] }
 0x38c   : > { %2136 = vst [vmem:[#allocation3 + $0x1b0] sm:$0xf] %v2117_v22  ;;  %2045 = vrot.lane.b32.xlu1 %v6760_v14, %s7176_s21  ;;  %v6872_v17 = vpop.permute.xlu0 %2104  ;;  %v3323_v14 = vld [vmem:[%s7177_s4] sm:$0xff]  ;;  %v3207_v22 = vld [vmem:[#allocation3 + $0xc0] sm:$0xff]  ;;  %s7010_s21 = scalar_lea.hbm %s7215_s29, %s3951_s5  ;;  %p4495_p12 = pnand %p4494_p11, %p4895_p8 }
 0x38d   : > { %v2118_v40 = vsel %vm2112_vm7, %v2103_v58, %v6872_v17  ;;  %v3248_v48 = vld [vmem:[#allocation3 + $0x208] sm:$0xff]  ;;  %s4731_s4 = smov [#allocation9]  }
 0x38e   : > { %2137 = vst [vmem:[#allocation3 + $0x1b8] sm:$0xf] %v2118_v40  ;;  %v2164_v0 = vpop.permute.xlu1 %2163  ;;  %3523 = vmatprep.subr.mxu0 %v3248_v48  ;;  %3326 = vperm.xlu0 %4179, %v3323_v14   ;;  %v3208_v58 = vld [vmem:[#allocation3 + $0xc8] sm:$0xff]  ;;  %v3198_v48 = vld [vmem:[#allocation3 + $0x78] sm:$0xff]  ;;  %p4496_p10 = pneg %p4495_p12  ;;  %s4497_s13 = sshll.u32 %s4731_s4, 4  ;;  %s4498_s13 = int_to_ptr.vmem [resolvable:$false] %s4497_s13 }
 0x38f   : > { %v2180_v18 = vsel %vm2177_vm14, %v6571_v35, %v2164_v0  ;;  %3524 = vmatpush1.msra.mxu0 %v3247_v52  ;;  %v3188_v14 = vld [vmem:[#allocation3 + $0x28] sm:$0xff]  ;;  %s4499_s3 = scalar_lea.vmem %s4498_s13, 2560  ;;  %p4500_p4 = scmp.lt.s32.totalorder %s3747_s9, %s4498_s13 }
 0x390   : > { %2199 = vst [vmem:[#allocation3 + $0x1a0] sm:$0xf0] %v2180_v18  ;;  %v2166_v10 = vpop.permute.xlu0 %2165  ;;  %v3197_v18 = vld [vmem:[#allocation3 + $0x70] sm:$0xff]  ;;  %p4501_p1 = scmp.lt.s32.totalorder %s4499_s3, %s4493_s11 }
 0x391   : > { %v2181_v56 = vsel %vm2177_vm14, %v2164_v0, %v2166_v10 }
 0x392   : > { %2200 = vst [vmem:[#allocation3 + $0x1a8] sm:$0xf0] %v2181_v56  ;;  %v2168_v50 = vpop.permute.xlu1 %2167  ;;  %p4502_p2 = por %p4501_p1, %p4500_p4 }
 0x393   : > { %v2182_v57 = vsel %vm2177_vm14, %v2166_v10, %v2168_v50 }
 0x394   : > { %2201 = vst [vmem:[#allocation3 + $0x1b0] sm:$0xf0] %v2182_v57  ;;  %v6883_v59 = vpop.permute.xlu0 %2169  ;;  %p4503_p5 = pnand %p4502_p2, %p4496_p10 }
 0x395   : > { %v2183_v35 = vsel %vm2177_vm14, %v2168_v50, %v6883_v59 }
 0x396   : > { %2202 = vst [vmem:[#allocation3 + $0x1b8] sm:$0xf0] %v2183_v35  ;;  %v3147_v21 = vpop.permute.xlu1 %3146 }
 0x397   : > { %v3159_v60 = vsel %vm3152_vm5, %v6593_v42, %v3147_v21  ;;  %v3235_v3 = vld [vmem:[#allocation3 + $0x1a0] sm:$0xff] }
 0x398   : > { %3178 = vst [vmem:[#allocation3 + $0x440] sm:$0xf] %v3159_v60  ;;  %v3149_v12 = vpop.permute.xlu0 %3148 }
 0x399   : > { %v3160_v47 = vsel %vm3152_vm5, %v3147_v21, %v3149_v12  ;;  %v3236_v39 = vld [vmem:[#allocation3 + $0x1a8] sm:$0xff] }
 0x39a   : > { %3179 = vst [vmem:[#allocation3 + $0x448] sm:$0xf] %v3160_v47  ;;  %v3151_v2 = vpop.permute.xlu1 %3150  ;;  %3454 = vmatprep.subr.mxu1 %v3236_v39 }
 0x39b   : > { %v3161_v54 = vsel %vm3152_vm5, %v3149_v12, %v3151_v2  ;;  %3181 = vst.msk [vmem:[#allocation3 + $0x458] sm:$0xf] %vm7178_vm4, %v3151_v2  ;;  %3455 = vmatpush1.msra.mxu1 %v3235_v3  ;;  %v3237_v8 = vld [vmem:[#allocation3 + $0x1b0] sm:$0xff]  ;;  %vm7180_vm5 = vmmov %vm7179_vm11 }
 0x39c   : > { %3180 = vst [vmem:[#allocation3 + $0x450] sm:$0xf] %v3161_v54  ;;  %3456 = vmatprep.subr.mxu1 %v3226_v4  ;;  %v3017_v6 = vpop.permute.xlu0 %3016  ;;  %vm7181_vm15 = vmmov %vm7180_vm5 }
 0x39d   : > { %v3029_v42 = vsel %vm7179_vm11, %v6610_v46, %v3017_v6  ;;  %3457 = vmatpush1.msra.mxu1 %v3225_v7  ;;  %v3238_v63 = vld [vmem:[#allocation3 + $0x1b8] sm:$0xff]  ;;  %v3205_v46 = vld [vmem:[#allocation3 + $0xb0] sm:$0xff]  ;;  %vm7182_vm11 = vcmask 195588  }
 0x39e   : > { %3048 = vst [vmem:[#allocation3 + $0x3f0] sm:$0xf] %v3029_v42  ;;  %v3019_v49 = vpop.permute.xlu1 %3018  ;;  %3458 = vmatprep.subr.mxu1 %v3216_v32  ;;  %3525 = vmatprep.subr.mxu0 %v3238_v63 }
 0x39f   : > { %v3030_v51 = vsel %vm7180_vm5, %v3017_v6, %v3019_v49  ;;  %3459 = vmatpush1.msra.mxu1 %v3215_v5  ;;  %3526 = vmatpush1.msra.mxu0 %v3237_v8  ;;  %v3319_v56 = vld [vmem:[#allocation3 + $0x440] sm:$0xf]  ;;  %vm7189_vm5 = vcmask 252928  }
 0x3a0   : > { %3049 = vst [vmem:[#allocation3 + $0x3f8] sm:$0xf] %v3030_v51  ;;  %3460 = vmatprep.subr.mxu1 %v3206_v44  ;;  %v3082_v20 = vpop.permute.xlu0 %3081  ;;  %3527 = vmatprep.subr.mxu0 %v3228_v16 }
 0x3a1   : > { %v3094_v11 = vsel %vm3087_vm3, %v6641_v45, %v3082_v20  ;;  %3461 = vmatpush1.msra.mxu1 %v3205_v46  ;;  %3528 = vmatpush1.msra.mxu0 %v3227_v26  ;;  %v3185_v45 = vld [vmem:[#allocation3 + $0x10] sm:$0xff]  ;;  %v3320_v0 = vld [vmem:[#allocation3 + $0x448] sm:$0xf] }
 0x3a2   : > { %3113 = vst [vmem:[#allocation3 + $0x3f0] sm:$0xf0] %v3094_v11  ;;  %v3084_v31 = vpop.permute.xlu1 %3083  ;;  %3462 = vmatprep.subr.mxu1 %v3196_v25  ;;  %3529 = vmatprep.subr.mxu0 %v3218_v53  ;;  %v3322_v35 = vld [vmem:[#allocation3 + $0x458] sm:$0xf] }
 0x3a3   : > { %v3095_v33 = vsel %vm3087_vm3, %v3082_v20, %v3084_v31  ;;  %3463 = vmatpush1.msra.mxu1 %v3195_v27  ;;  %3530 = vmatpush1.msra.mxu0 %v3217_v41  ;;  %v3321_v60 = vld [vmem:[#allocation3 + $0x450] sm:$0xf] }
 0x3a4   : > { %3114 = vst [vmem:[#allocation3 + $0x3f8] sm:$0xf0] %v3095_v33  ;;  %3464 = vmatprep.subr.mxu1 %v3186_v28  ;;  %v3021_v38 = vpop.permute.xlu0 %3020  ;;  %3531 = vmatprep.subr.mxu0 %v3208_v58 }
 0x3a5   : > { %v3031_v40 = vsel %vm7181_vm15, %v3019_v49, %v3021_v38  ;;  %3051 = vst.msk [vmem:[#allocation3 + $0x408] sm:$0xf] %vm7178_vm4, %v3021_v38  ;;  %3465 = vmatpush1.msra.mxu1 %v3185_v45  ;;  %3532 = vmatpush1.msra.mxu0 %v3207_v22  ;;  %vm7190_vm15 = vmmov %vm7189_vm5 }
 0x3a6   : > { %3050 = vst [vmem:[#allocation3 + $0x400] sm:$0xf] %v3031_v40  ;;  %v3086_v52 = vpop.permute.xlu1 %3085  ;;  %3533 = vmatprep.subr.mxu0 %v3198_v48  ;;  %3945 = vmatprep.subr.msk.mxu1 %vm342_vm10, %v3320_v0 }
 0x3a7   : > { %v3096_v10 = vsel %vm3087_vm3, %v3084_v31, %v3086_v52  ;;  %3116 = vst.msk [vmem:[#allocation3 + $0x408] sm:$0xf0] %vm7182_vm11, %v3086_v52  ;;  %3941 = vmatmul.mubr.msk.f32.vlgmr.msra.gmra.mxu1 %vm3329_vm8, %v6623_v34  ;;  %3534 = vmatpush1.msra.mxu0 %v3197_v18  ;;  %vm7184_vm3 = vmmov %vm7182_vm11 }
 0x3a8   : > { %3115 = vst [vmem:[#allocation3 + $0x400] sm:$0xf0] %v3096_v10  ;;  %3946 = vmatpush1.msk.msra.mxu1 %vm342_vm10, %v3319_v56  ;;  %v2887_v50 = vpop.permute.xlu0 %2886  ;;  %3535 = vmatprep.subr.mxu0 %v3188_v14 }
 0x3a9   : > { %v2899_v57 = vsel %vm2892_vm2, %v6662_v62, %v2887_v50  ;;  %3536 = vmatpush1.msra.mxu0 %v3187_v19  ;;  %3640 = vmatprep.mubr.f32.mxu1 %v4702_v55  ;;  %v3309_v39 = vld [vmem:[#allocation3 + $0x3f0] sm:$0xff] }
 0x3aa   : > { %2918 = vst [vmem:[#allocation3 + $0x3a0] sm:$0xf] %v2899_v57  ;;  %v2889_v21 = vpop.permute.xlu1 %2888  ;;  %3948 = vmatprep.subr.msk.mxu0 %vm342_vm10, %v3322_v35  ;;  %3944 = vmatmul.mubr.msk.f32.vlgmr.msra.gmra.mxu0 %vm3329_vm8, %v6623_v34 }
 0x3ab   : > { %v2900_v12 = vsel %vm2892_vm2, %v2887_v50, %v2889_v21  ;;  %3949 = vmatpush1.msk.msra.mxu0 %vm342_vm10, %v3321_v60  ;;  %v3310_v47 = vld [vmem:[#allocation3 + $0x3f8] sm:$0xff]  ;;  %3711 = vmatprep.mubr.f32.mxu0 %v4702_v55  ;;  %vm7183_vm10 = vmmov %vm7178_vm4 }
 0x3ac   : > { %2919 = vst [vmem:[#allocation3 + $0x3a8] sm:$0xf] %v2900_v12  ;;  %3582 = vmatprep.subr.mxu1 %v3310_v47  ;;  %v2952_v62 = vpop.permute.xlu0 %2951 }
 0x3ad   : > { %v2964_v2 = vsel %vm2957_vm9, %v6682_v1, %v2952_v62  ;;  %3583 = vmatpush1.msra.mxu1 %v3309_v39 }
 0x3ae   : > { %2983 = vst [vmem:[#allocation3 + $0x3a0] sm:$0xf0] %v2964_v2  ;;  %v2954_v3 = vpop.permute.xlu1 %2953  ;;  %v3312_v54 = vld [vmem:[#allocation3 + $0x408] sm:$0xff] }
 0x3af   : > { %v2965_v34 = vsel %vm2957_vm9, %v2952_v62, %v2954_v3  ;;  %3653 = vmatprep.subr.mxu0 %v3312_v54  ;;  %v3311_v4 = vld [vmem:[#allocation3 + $0x400] sm:$0xff] }
 0x3b0   : > { %2984 = vst [vmem:[#allocation3 + $0x3a8] sm:$0xf0] %v2965_v34  ;;  %v2891_v6 = vpop.permute.xlu0 %2890  ;;  %3654 = vmatpush1.msra.mxu0 %v3311_v4 }
 0x3b1   : > { %v2901_v55 = vsel %vm2892_vm2, %v2889_v21, %v2891_v6  ;;  %2921 = vst.msk [vmem:[#allocation3 + $0x3b8] sm:$0xf] %vm7183_vm10, %v2891_v6  ;;  %vm7185_vm2 = vmmov %vm7178_vm4 }
 0x3b2   : > { %2920 = vst [vmem:[#allocation3 + $0x3b0] sm:$0xf] %v2901_v55  ;;  %v2956_v7 = vpop.permute.xlu1 %2955  ;;  %vm7193_vm4 = vmmov %vm7189_vm5 }
 0x3b3   : > { %v2966_v42 = vsel %vm2957_vm9, %v2954_v3, %v2956_v7  ;;  %2986 = vst.msk [vmem:[#allocation3 + $0x3b8] sm:$0xf0] %vm7184_vm3, %v2956_v7  ;;  %vm7186_vm9 = vmmov %vm7184_vm3 }
 0x3b4   : > { %2985 = vst [vmem:[#allocation3 + $0x3b0] sm:$0xf0] %v2966_v42  ;;  %v2757_v1 = vpop.permute.xlu0 %2756 }
 0x3b5   : > { %v2769_v32 = vsel %vm2762_vm0, %v6698_v9, %v2757_v1  ;;  %v3299_v51 = vld [vmem:[#allocation3 + $0x3a0] sm:$0xff] }
 0x3b6   : > { %2788 = vst [vmem:[#allocation3 + $0x350] sm:$0xf] %v2769_v32  ;;  %v2759_v63 = vpop.permute.xlu1 %2758 }
 0x3b7   : > { %v2770_v49 = vsel %vm2762_vm0, %v2757_v1, %v2759_v63  ;;  %v3300_v5 = vld [vmem:[#allocation3 + $0x3a8] sm:$0xff] }
 0x3b8   : > { %2789 = vst [vmem:[#allocation3 + $0x358] sm:$0xf] %v2770_v49  ;;  %3584 = vmatprep.subr.mxu1 %v3300_v5  ;;  %v2822_v8 = vpop.permute.xlu0 %2821 }
 0x3b9   : > { %v2834_v44 = vsel %vm2827_vm12, %v6714_v15, %v2822_v8  ;;  %3585 = vmatpush1.msra.mxu1 %v3299_v51 }
 0x3ba   : > { %2853 = vst [vmem:[#allocation3 + $0x350] sm:$0xf0] %v2834_v44  ;;  %v2824_v16 = vpop.permute.xlu1 %2823  ;;  %v3302_v20 = vld [vmem:[#allocation3 + $0x3b8] sm:$0xff] }
 0x3bb   : > { %v2835_v46 = vsel %vm2827_vm12, %v2822_v8, %v2824_v16  ;;  %3655 = vmatprep.subr.mxu0 %v3302_v20  ;;  %v3301_v9 = vld [vmem:[#allocation3 + $0x3b0] sm:$0xff] }
 0x3bc   : > { %2854 = vst [vmem:[#allocation3 + $0x358] sm:$0xf0] %v2835_v46  ;;  %v2761_v26 = vpop.permute.xlu0 %2760  ;;  %3656 = vmatpush1.msra.mxu0 %v3301_v9 }
 0x3bd   : > { %v2771_v11 = vsel %vm2762_vm0, %v2759_v63, %v2761_v26  ;;  %2791 = vst.msk [vmem:[#allocation3 + $0x368] sm:$0xf] %vm7185_vm2, %v2761_v26  ;;  %vm7187_vm0 = vmmov %vm7185_vm2  ;;  %vm7196_vm2 = vcmask 359424  }
 0x3be   : > { %2790 = vst [vmem:[#allocation3 + $0x360] sm:$0xf] %v2771_v11  ;;  %v2826_v25 = vpop.permute.xlu1 %2825  ;;  %vm7194_vm11 = vmmov %vm7187_vm0 }
 0x3bf   : > { %v2836_v53 = vsel %vm2827_vm12, %v2824_v16, %v2826_v25  ;;  %2856 = vst.msk [vmem:[#allocation3 + $0x368] sm:$0xf0] %vm7186_vm9, %v2826_v25  ;;  %vm7188_vm12 = vmmov %vm7184_vm3 }
 0x3c0   : > { %2855 = vst [vmem:[#allocation3 + $0x360] sm:$0xf0] %v2836_v53  ;;  %v2627_v15 = vpop.permute.xlu0 %2626  ;;  %vm7197_vm9 = vmmov %vm7196_vm2 }
 0x3c1   : > { %v2639_v31 = vsel %vm2632_vm13, %v6730_v24, %v2627_v15  ;;  %v3289_v58 = vld [vmem:[#allocation3 + $0x350] sm:$0xff] }
 0x3c2   : > { %2658 = vst [vmem:[#allocation3 + $0x300] sm:$0xf] %v2639_v31  ;;  %v2629_v27 = vpop.permute.xlu1 %2628 }
 0x3c3   : > { %v2640_v41 = vsel %vm2632_vm13, %v2627_v15, %v2629_v27  ;;  %v3290_v33 = vld [vmem:[#allocation3 + $0x358] sm:$0xff] }
 0x3c4   : > { %2659 = vst [vmem:[#allocation3 + $0x308] sm:$0xf] %v2640_v41  ;;  %3586 = vmatprep.subr.mxu1 %v3290_v33  ;;  %v2692_v28 = vpop.permute.xlu0 %2691 }
 0x3c5   : > { %v2704_v38 = vsel %vm2697_vm6, %v6746_v29, %v2692_v28  ;;  %3587 = vmatpush1.msra.mxu1 %v3289_v58 }
 0x3c6   : > { %2723 = vst [vmem:[#allocation3 + $0x300] sm:$0xf0] %v2704_v38  ;;  %v2694_v45 = vpop.permute.xlu1 %2693  ;;  %v3292_v22 = vld [vmem:[#allocation3 + $0x368] sm:$0xff] }
 0x3c7   : > { %v2705_v40 = vsel %vm2697_vm6, %v2692_v28, %v2694_v45  ;;  %3657 = vmatprep.subr.mxu0 %v3292_v22  ;;  %v3291_v24 = vld [vmem:[#allocation3 + $0x360] sm:$0xff] }
 0x3c8   : > { %2724 = vst [vmem:[#allocation3 + $0x308] sm:$0xf0] %v2705_v40  ;;  %v2631_v48 = vpop.permute.xlu0 %2630  ;;  %3658 = vmatpush1.msra.mxu0 %v3291_v24 }
 0x3c9   : > { %v2641_v0 = vsel %vm2632_vm13, %v2629_v27, %v2631_v48  ;;  %2661 = vst.msk [vmem:[#allocation3 + $0x318] sm:$0xf] %vm7187_vm0, %v2631_v48  ;;  %vm7191_vm13 = vcmask 244736   ;;  %vm7198_vm0 = vcmask 261120  }
 0x3ca   : > { %2660 = vst [vmem:[#allocation3 + $0x310] sm:$0xf] %v2641_v0  ;;  %v2696_v52 = vpop.permute.xlu1 %2695 }
 0x3cb   : > { %v2706_v18 = vsel %vm2697_vm6, %v2694_v45, %v2696_v52  ;;  %2726 = vst.msk [vmem:[#allocation3 + $0x318] sm:$0xf0] %vm7188_vm12, %v2696_v52  ;;  %vm7192_vm6 = vmmov %vm7191_vm13 }
 0x3cc   : > { %2725 = vst [vmem:[#allocation3 + $0x310] sm:$0xf0] %v2706_v18  ;;  %v2497_v29 = vpop.permute.xlu0 %2496  ;;  %vm7195_vm10 = vmmov %vm7192_vm6 }
 0x3cd   : > { %v2509_v10 = vsel %vm7189_vm5, %v6764_v43, %v2497_v29  ;;  %v3279_v57 = vld [vmem:[#allocation3 + $0x300] sm:$0xff]  ;;  %vm7199_vm12 = vmmov %vm7198_vm0 }
 0x3ce   : > { %2528 = vst [vmem:[#allocation3 + $0x2b0] sm:$0xf] %v2509_v10  ;;  %v2499_v56 = vpop.permute.xlu1 %2498  ;;  %vm7200_vm5 = vmmov %vm7196_vm2 }
 0x3cf   : > { %v2510_v14 = vsel %vm7190_vm15, %v2497_v29, %v2499_v56  ;;  %v3280_v50 = vld [vmem:[#allocation3 + $0x308] sm:$0xff]  ;;  %vm7201_vm15 = vmmov %vm7194_vm11 }
 0x3d0   : > { %2529 = vst [vmem:[#allocation3 + $0x2b8] sm:$0xf] %v2510_v14  ;;  %3588 = vmatprep.subr.mxu1 %v3280_v50  ;;  %v2562_v19 = vpop.permute.xlu0 %2561 }
 0x3d1   : > { %v2574_v35 = vsel %vm7191_vm13, %v6792_v36, %v2562_v19  ;;  %3589 = vmatpush1.msra.mxu1 %v3279_v57  ;;  %vm7202_vm13 = vmmov %vm7198_vm0 }
 0x3d2   : > { %2593 = vst [vmem:[#allocation3 + $0x2b0] sm:$0xf0] %v2574_v35  ;;  %v2564_v21 = vpop.permute.xlu1 %2563  ;;  %v3282_v60 = vld [vmem:[#allocation3 + $0x318] sm:$0xff] }
 0x3d3   : > { %v2575_v12 = vsel %vm7192_vm6, %v2562_v19, %v2564_v21  ;;  %3659 = vmatprep.subr.mxu0 %v3282_v60  ;;  %v3281_v43 = vld [vmem:[#allocation3 + $0x310] sm:$0xff]  ;;  %vm7203_vm6 = vmmov %vm7184_vm3 }
 0x3d4   : > { %2594 = vst [vmem:[#allocation3 + $0x2b8] sm:$0xf0] %v2575_v12  ;;  %v2501_v47 = vpop.permute.xlu0 %2500  ;;  %3660 = vmatpush1.msra.mxu0 %v3281_v43  ;;  %v3229_v12 = vld [vmem:[#allocation3 + $0x170] sm:$0xff]  ;;  %v3220_v43 = vld [vmem:[#allocation3 + $0x128] sm:$0xff] }
 0x3d5   : > { %v2511_v62 = vsel %vm7193_vm4, %v2499_v56, %v2501_v47  ;;  %2531 = vst.msk [vmem:[#allocation3 + $0x2c8] sm:$0xf] %vm7194_vm11, %v2501_v47  ;;  %vm7204_vm4 = vcmask 367616  }
 0x3d6   : > { %2530 = vst [vmem:[#allocation3 + $0x2c0] sm:$0xf] %v2511_v62  ;;  %v2566_v39 = vpop.permute.xlu1 %2565  ;;  %vm7205_vm11 = vmmov %vm7204_vm4  ;;  %v3219_v62 = vld [vmem:[#allocation3 + $0x120] sm:$0xff] }
 0x3d7   : > { %v2576_v2 = vsel %vm7195_vm10, %v2564_v21, %v2566_v39  ;;  %2596 = vst.msk [vmem:[#allocation3 + $0x2c8] sm:$0xf0] %vm7184_vm3, %v2566_v39  ;;  %vm7206_vm10 = vmmov %vm7201_vm15  ;;  %v3222_v39 = vld [vmem:[#allocation3 + $0x138] sm:$0xff] }
 0x3d8   : > { %2595 = vst [vmem:[#allocation3 + $0x2c0] sm:$0xf0] %v2576_v2  ;;  %v2367_v36 = vpop.permute.xlu0 %2366  ;;  %vm7207_vm3 = vmmov %vm7204_vm4 }
 0x3d9   : > { %v2379_v3 = vsel %vm7196_vm2, %v6808_v23, %v2367_v36  ;;  %v3269_v55 = vld [vmem:[#allocation3 + $0x2b0] sm:$0xff]  ;;  %vm7208_vm2 = vmmov %vm7203_vm6 }
 0x3da   : > { %2398 = vst [vmem:[#allocation3 + $0x260] sm:$0xf] %v2379_v3  ;;  %v2369_v54 = vpop.permute.xlu1 %2368  ;;  %v3221_v3 = vld [vmem:[#allocation3 + $0x130] sm:$0xff] }
 0x3db   : > { %v2380_v34 = vsel %vm7197_vm9, %v2367_v36, %v2369_v54  ;;  %v3270_v4 = vld [vmem:[#allocation3 + $0x2b8] sm:$0xff]  ;;  %vm7210_vm9 = vmmov %vm7208_vm2 }
 0x3dc   : > { %2399 = vst [vmem:[#allocation3 + $0x268] sm:$0xf] %v2380_v34  ;;  %3590 = vmatprep.subr.mxu1 %v3270_v4  ;;  %v2432_v6 = vpop.permute.xlu0 %2431  ;;  %v3210_v36 = vld [vmem:[#allocation3 + $0xd8] sm:$0xff]  ;;  %v3212_v34 = vld [vmem:[#allocation3 + $0xe8] sm:$0xff] }
 0x3dd   : > { %v2444_v7 = vsel %vm7198_vm0, %v6824_v30, %v2432_v6  ;;  %3591 = vmatpush1.msra.mxu1 %v3269_v55  ;;  %vm7211_vm0 = vcmask 490496   ;;  %v3200_v4 = vld [vmem:[#allocation3 + $0x88] sm:$0xff]  ;;  %v3199_v55 = vld [vmem:[#allocation3 + $0x80] sm:$0xff] }
 0x3de   : > { %2463 = vst [vmem:[#allocation3 + $0x260] sm:$0xf0] %v2444_v7  ;;  %v2434_v42 = vpop.permute.xlu1 %2433  ;;  %v3272_v1 = vld [vmem:[#allocation3 + $0x2c8] sm:$0xff]  ;;  %v3202_v7 = vld [vmem:[#allocation3 + $0x98] sm:$0xff] }
 0x3df   : > { %v2445_v32 = vsel %vm7199_vm12, %v2432_v6, %v2434_v42  ;;  %3661 = vmatprep.subr.mxu0 %v3272_v1  ;;  %v3271_v23 = vld [vmem:[#allocation3 + $0x2c0] sm:$0xff]  ;;  %vm7212_vm12 = vmmov %vm7211_vm0  ;;  %v3190_v1 = vld [vmem:[#allocation3 + $0x38] sm:$0xff] }
 0x3e0   : > { %2464 = vst [vmem:[#allocation3 + $0x268] sm:$0xf0] %v2445_v32  ;;  %v2371_v63 = vpop.permute.xlu0 %2370  ;;  %3662 = vmatpush1.msra.mxu0 %v3271_v23  ;;  %v3211_v6 = vld [vmem:[#allocation3 + $0xe0] sm:$0xff]  ;;  %v3201_v32 = vld [vmem:[#allocation3 + $0x90] sm:$0xff] }
 0x3e1   : > { %v2381_v49 = vsel %vm7200_vm5, %v2369_v54, %v2371_v63  ;;  %2401 = vst.msk [vmem:[#allocation3 + $0x278] sm:$0xf] %vm7201_vm15, %v2371_v63  ;;  %vm7213_vm5 = vmmov %vm7208_vm2  ;;  %v3209_v54 = vld [vmem:[#allocation3 + $0xd0] sm:$0xff]  ;;  %v3192_v63 = vld [vmem:[#allocation3 + $0x48] sm:$0xff] }
 0x3e2   : > { %2400 = vst [vmem:[#allocation3 + $0x270] sm:$0xf] %v2381_v49  ;;  %v2436_v5 = vpop.permute.xlu1 %2435  ;;  %v3189_v23 = vld [vmem:[#allocation3 + $0x30] sm:$0xff] }
 0x3e3   : > { %v2446_v8 = vsel %vm7202_vm13, %v2434_v42, %v2436_v5  ;;  %2466 = vst.msk [vmem:[#allocation3 + $0x278] sm:$0xf0] %vm7203_vm6, %v2436_v5  ;;  %v3429_v2 = vpop.f32.mrf.mxu0  ;;  %v3191_v5 = vld [vmem:[#allocation3 + $0x40] sm:$0xff] }
 0x3e4   : > { %2465 = vst [vmem:[#allocation3 + $0x270] sm:$0xf0] %v2446_v8  ;;  %v2237_v30 = vpop.permute.xlu0 %2236 }
 0x3e5   : > { %v2249_v51 = vsel %vm2242_vm1, %v6840_v13, %v2237_v30  ;;  %v3259_v9 = vld [vmem:[#allocation3 + $0x260] sm:$0xff]  ;;  %v3431_v42 = vpop.f32.mrf.mxu0 }
 0x3e6   : > { %2268 = vst [vmem:[#allocation3 + $0x210] sm:$0xf] %v2249_v51  ;;  %v2239_v44 = vpop.permute.xlu1 %2238  ;;  %v4440_v51 = vld [vmem:[%s7165_s2] sm:$0xff] }
 0x3e7   : > { %v2250_v16 = vsel %vm2242_vm1, %v2237_v30, %v2239_v44  ;;  %v3260_v20 = vld [vmem:[#allocation3 + $0x268] sm:$0xff] }
 0x3e8   : > { %2269 = vst [vmem:[#allocation3 + $0x218] sm:$0xf] %v2250_v16  ;;  %3592 = vmatprep.subr.mxu1 %v3260_v20  ;;  %v2302_v46 = vpop.permute.xlu0 %2301 }
 0x3e9   : > { %v2314_v26 = vsel %vm7204_vm4, %v6856_v61, %v2302_v46  ;;  %3593 = vmatpush1.msra.mxu1 %v3259_v9 }
 0x3ea   : > { %2333 = vst [vmem:[#allocation3 + $0x210] sm:$0xf0] %v2314_v26  ;;  %v2304_v11 = vpop.permute.xlu1 %2303  ;;  %v3262_v25 = vld [vmem:[#allocation3 + $0x278] sm:$0xff] }
 0x3eb   : > { %v2315_v53 = vsel %vm7205_vm11, %v2302_v46, %v2304_v11  ;;  %3663 = vmatprep.subr.mxu0 %v3262_v25  ;;  %v3261_v13 = vld [vmem:[#allocation3 + $0x270] sm:$0xff] }
 0x3ec   : > { %2334 = vst [vmem:[#allocation3 + $0x218] sm:$0xf0] %v2315_v53  ;;  %v2241_v15 = vpop.permute.xlu0 %2240  ;;  %3664 = vmatpush1.msra.mxu0 %v3261_v13 }
 0x3ed   : > { %v2251_v31 = vsel %vm2242_vm1, %v2239_v44, %v2241_v15  ;;  %2271 = vst.msk [vmem:[#allocation3 + $0x228] sm:$0xf] %vm7206_vm10, %v2241_v15  ;;  %vm7209_vm1 = vmmov %vm7206_vm10 }
 0x3ee   : > { %2270 = vst [vmem:[#allocation3 + $0x220] sm:$0xf] %v2251_v31  ;;  %v2306_v27 = vpop.permute.xlu1 %2305 }
 0x3ef   : > { %v2316_v41 = vsel %vm7207_vm3, %v2304_v11, %v2306_v27  ;;  %2336 = vst.msk [vmem:[#allocation3 + $0x228] sm:$0xf0] %vm7208_vm2, %v2306_v27 }
 0x3f0   : > { %2335 = vst [vmem:[#allocation3 + $0x220] sm:$0xf0] %v2316_v41  ;;  %v2107_v61 = vpop.permute.xlu0 %2106 }
 0x3f1   : > { %v2119_v33 = vsel %vm2112_vm7, %v6872_v17, %v2107_v61  ;;  %v3249_v22 = vld [vmem:[#allocation3 + $0x210] sm:$0xff] }
 0x3f2   : > { %2138 = vst [vmem:[#allocation3 + $0x1c0] sm:$0xf] %v2119_v33  ;;  %v2109_v28 = vpop.permute.xlu1 %2108 }
 0x3f3   : > { %v2120_v58 = vsel %vm2112_vm7, %v2107_v61, %v2109_v28  ;;  %v3250_v38 = vld [vmem:[#allocation3 + $0x218] sm:$0xff] }
 0x3f4   : > { %2139 = vst [vmem:[#allocation3 + $0x1c8] sm:$0xf] %v2120_v58  ;;  %3594 = vmatprep.subr.mxu1 %v3250_v38  ;;  %v2172_v45 = vpop.permute.xlu0 %2171 }
 0x3f5   : > { %v2184_v40 = vsel %vm2177_vm14, %v6883_v59, %v2172_v45  ;;  %3595 = vmatpush1.msra.mxu1 %v3249_v22 }
 0x3f6   : > { %2203 = vst [vmem:[#allocation3 + $0x1c0] sm:$0xf0] %v2184_v40  ;;  %v2174_v24 = vpop.permute.xlu1 %2173  ;;  %v3252_v48 = vld [vmem:[#allocation3 + $0x228] sm:$0xff] }
 0x3f7   : > { %v2185_v0 = vsel %vm2177_vm14, %v2172_v45, %v2174_v24  ;;  %3665 = vmatprep.subr.mxu0 %v3252_v48  ;;  %v3251_v17 = vld [vmem:[#allocation3 + $0x220] sm:$0xff] }
 0x3f8   : > { %2204 = vst [vmem:[#allocation3 + $0x1c8] sm:$0xf0] %v2185_v0  ;;  %v2111_v52 = vpop.permute.xlu0 %2110  ;;  %3666 = vmatpush1.msra.mxu0 %v3251_v17 }
 0x3f9   : > { %v2121_v18 = vsel %vm2112_vm7, %v2109_v28, %v2111_v52  ;;  %2141 = vst.msk [vmem:[#allocation3 + $0x1d8] sm:$0xf] %vm7209_vm1, %v2111_v52 }
 0x3fa   : > { %2140 = vst [vmem:[#allocation3 + $0x1d0] sm:$0xf] %v2121_v18  ;;  %v2176_v29 = vpop.permute.xlu1 %2175 }
 0x3fb   : > { %v2186_v10 = vsel %vm2177_vm14, %v2174_v24, %v2176_v29  ;;  %2206 = vst.msk [vmem:[#allocation3 + $0x1d8] sm:$0xf0] %vm7210_vm9, %v2176_v29  ;;  %vm3727_vm14 = vcmask 195584  }
 0x3fc   : > { %2205 = vst [vmem:[#allocation3 + $0x1d0] sm:$0xf0] %v2186_v10  ;;  %v2044_v59 = vpop.permute.xlu0 %2043 }
 0x3fd   : > { %v2055_v56 = vsel %vm7211_vm0, %v6366_v37, %v2044_v59  ;;  %v3239_v57 = vld [vmem:[#allocation3 + $0x1c0] sm:$0xff] }
 0x3fe   : > { %2074 = vst [vmem:[#allocation3 + $0x178] sm:$0xf0] %v2055_v56  ;;  %v2046_v14 = vpop.permute.xlu1 %2045 }
 0x3ff   : > { %v2056_v50 = vsel %vm7212_vm12, %v2044_v59, %v2046_v14  ;;  %2076 = vst.msk [vmem:[#allocation3 + $0x188] sm:$0xf0] %vm7213_vm5, %v2046_v14  ;;  %v3240_v19 = vld [vmem:[#allocation3 + $0x1c8] sm:$0xff] }
 0x400   : > { %2075 = vst [vmem:[#allocation3 + $0x180] sm:$0xf0] %v2056_v50  ;;  %3596 = vmatprep.subr.mxu1 %v3240_v19 }
 0x401   : > { %3597 = vmatpush1.msra.mxu1 %v3239_v57 }
 0x402   : > { %v3242_v35 = vld [vmem:[#allocation3 + $0x1d8] sm:$0xff] }
 0x403   : > { %3667 = vmatprep.subr.mxu0 %v3242_v35  ;;  %v3241_v21 = vld [vmem:[#allocation3 + $0x1d0] sm:$0xff] }
 0x404   : > { %3668 = vmatpush1.msra.mxu0 %v3241_v21 }
 0x405   : > { %v3230_v60 = vld [vmem:[#allocation3 + $0x178] sm:$0xff] }
 0x406   : > { %3598 = vmatprep.subr.mxu1 %v3230_v60  ;;  %v3232_v37 = vld [vmem:[#allocation3 + $0x188] sm:$0xff] }
 0x407   : > { %3599 = vmatpush1.msra.mxu1 %v3229_v12  ;;  %3669 = vmatprep.subr.mxu0 %v3232_v37  ;;  %v3231_v47 = vld [vmem:[#allocation3 + $0x180] sm:$0xff] }
 0x408   : > { %3600 = vmatprep.subr.mxu1 %v3220_v43  ;;  %3670 = vmatpush1.msra.mxu0 %v3231_v47 }
 0x409   : > { %3601 = vmatpush1.msra.mxu1 %v3219_v62  ;;  %3671 = vmatprep.subr.mxu0 %v3222_v39  ;;  %v3327_v49 = vpop.permute.xlu0 %3326 }
 0x40a   : > { %3602 = vmatprep.subr.mxu1 %v3210_v36  ;;  %3672 = vmatpush1.msra.mxu0 %v3221_v3  ;;  %v3430_v8 = vadd.f32 %v3429_v2, %v3327_v49  ;;  %v3432_v30 = vadd.f32 %v3431_v42, %v3327_v49 }
 0x40b   : > { %3603 = vmatpush1.msra.mxu1 %v3209_v54  ;;  %3673 = vmatprep.subr.mxu0 %v3212_v34 }
 0x40c   : > { %3604 = vmatprep.subr.mxu1 %v3200_v4  ;;  %3674 = vmatpush1.msra.mxu0 %v3211_v6  ;;  %3718 = vst [vmem:[%s6994_s30] sm:$0xff] %v3430_v8  ;;  %3719 = vst [vmem:[%s6994_s30 + $0x8] sm:$0xff] %v3432_v30 }
 0x40d   : > { %3605 = vmatpush1.msra.mxu1 %v3199_v55  ;;  %3675 = vmatprep.subr.mxu0 %v3202_v7 }
 0x40e   : > { %3606 = vmatprep.subr.mxu1 %v3190_v1  ;;  %3676 = vmatpush1.msra.mxu0 %v3201_v32 }
 0x40f   : > { %3607 = vmatpush1.msra.mxu1 %v3189_v23  ;;  %3677 = vmatprep.subr.mxu0 %v3192_v63 }
 0x410   : > { %3947 = vmatmul.mubr.msk.f32.vlgmr.msra.gmra.mxu1 %vm3329_vm8, %v4440_v51  ;;  %3678 = vmatpush1.msra.mxu0 %v3191_v5 }
 0x411   : > { %3950 = vmatmul.mubr.msk.f32.vlgmr.msra.gmra.mxu0 %vm3329_vm8, %v4440_v51 }
 0x467   : > { %v3500_v44 = vpop.f32.mrf.mxu1 }
 0x468   : > { %v3501_v16 = vadd.f32 %v3500_v44, %v3327_v49 }
 0x469   : > { %v3502_v20 = vpop.f32.mrf.mxu1 }
 0x46a   : > { %3720 = vst [vmem:[%s6994_s30 + $0x10] sm:$0xff] %v3501_v16  ;;  %v3571_v46 = vpop.f32.mrf.mxu0  ;;  %v3503_v9 = vadd.f32 %v3502_v20, %v3327_v49 }
 0x46b   : > { %v3572_v26 = vadd.f32 %v3571_v46, %v3327_v49 }
 0x46c   : > { %3721 = vst [vmem:[%s6994_s30 + $0x18] sm:$0xff] %v3503_v9  ;;  %v3573_v11 = vpop.f32.mrf.mxu0 }
 0x46d   : > { %3722 = vst [vmem:[%s6994_s30 + $0x20] sm:$0xff] %v3572_v26  ;;  %v3574_v25 = vadd.f32 %v3573_v11, %v3327_v49 }
 0x46f   : > { %3723 = vst [vmem:[%s6994_s30 + $0x28] sm:$0xff] %v3574_v25 }
 0x4d0   : > { %v3642_v53 = vpop.f32.mrf.mxu1 }
 0x4d1   : > { %v3643_v13 = vadd.f32 %v3642_v53, %v3327_v49  ;;  %v3713_v15 = vpop.f32.mrf.mxu0 }
 0x4d2   : > { %v3714_v31 = vadd.f32 %v3713_v15, %v3327_v49  ;;  %v3644_v27 = vpop.f32.mrf.mxu1 }
 0x4d3   : > { %3724 = vst [vmem:[%s6994_s30 + $0x30] sm:$0xff] %v3643_v13  ;;  %v3645_v41 = vadd.f32 %v3644_v27, %v3327_v49  ;;  %v3715_v61 = vpop.f32.mrf.mxu0 }
 0x4d4   : > { %3726 = vst [vmem:[%s6994_s30 + $0x40] sm:$0xff] %v3714_v31  ;;  %v3716_v33 = vadd.f32 %v3715_v61, %v3327_v49 }
 0x4d5   : > { %3725 = vst [vmem:[%s6994_s30 + $0x38] sm:$0xff] %v3645_v41 }
 0x4d6   : > { %3728 = vst.msk [vmem:[%s6994_s30 + $0x48] sm:$0xff] %vm3727_vm14, %v3716_v33 }
 0x4d7   : > { %4506 = shalt.err (!%p4503_p5)
}
 0x4d8   : > { %s4507_s17 = scalar_lea.hbm %s7010_s21, 1280  ;;  %s4511_s8 = scalar_lea.hbm %s7215_s29, 5120 }
 0x4d9   : > { %p4508_p9 = scmp.ne.s32.totalorder %s7010_s21, %s4507_s17  ;;  %p4512_p7 = scmp.lt.s32.totalorder %s7010_s21, %s7215_s29 }
 0x4da   : > { %p4513_p6 = scmp.lt.s32.totalorder %s4511_s8, %s4507_s17 }
 0x4db   : > { %p4509_p13 = pnand %p4508_p9, %p4895_p8 }
 0x4dc   : > { %p4514_p0 = por %p4513_p6, %p4512_p7 }
 0x4dd   : > { %p4510_p3 = pneg %p4509_p13 }
 0x4df   : > { %p4515_p11 = pnand %p4514_p0, %p4510_p3 }
 0x4e1   : > { %4518 = shalt.err (!%p4515_p11)
}
 0x4e2   : > { %3977 = dma.vmem_to_hbm [thread:$0]  (%p4895_p8), %s3747_s9, 1280, %s7010_s21, %s3730_s7  }
 0x4e3 PF: > { %p3983_p12 = scmp.ge.s32.totalorder %s4644_s28, 2  ;;  %s3758_s6 = sand.u32 1, %s4592_s15  }
 0x4e4   : > { %p7216_p10 = scmp.ne.s32.totalorder %s7133_s14, 0  ;;  %s3759_s5 = scalar_lea.sflag [#allocation6], %s3758_s6 }
 0x4e6   : > { %p3980_p4 = pnand %p3983_p12, %p7216_p10 }
 0x4e8   : > { %p3981_p1 = pneg %p3980_p4 }
 0x4ea   : > { %4584 = dma.done.wait (%p3981_p1), %s3759_s5, 1280  }
 0x4eb   : > { %4586 = vsyncadd (%p3981_p1), %s3759_s5, 4294966016  ;;  %s23_s28 = sadd.s32 1, %s4644_s28   ;;  %s7218_s24 = sld [smem:[#allocation13_spill]] }
 0x4ec   : > { %p7037_p2 = scmp.ge.s32.totalorder %s23_s28, 6   ;;  %s7219_s17 = sld [smem:[#allocation21_spill]] }
 0x4ed   : > { %s7220_s9 = sld [smem:[#allocation20_spill]]  ;;  %s7226_s15 = smov %s4596_s16 }
 0x4ee   : > { %s7221_s14 = sld [smem:[#allocation19_spill]]  ;;  %s7228_s18 = smov %s4608_s19 }
 0x4ef   : > { %s7222_s26 = sld [smem:[#allocation16_spill]]  ;;  %s7229_s19 = smov %s4612_s20 }
 0x4f0   : > { %s7223_s7 = sld [smem:[#allocation17_spill]]  ;;  %s7231_s21 = smov %s4620_s22 }
 0x4f1   : > { %s7224_s11 = sld [smem:[#allocation18_spill]]  ;;  %s7227_s16 = smov %s7218_s24 }
 0x4f2   : > { %s7232_s22 = smov %s4624_s23  ;;  %s7235_s25 = smov %s4640_s27 }
 0x4f3   : > { %s7230_s20 = smov %s7220_s9  ;;  %22 = sbr.rel (!%p7037_p2) target bundleno = 16 (0x10), region = 101 }
 0x4f4   : > { %s7233_s23 = smov %s7221_s14 }
 0x4f5   : > { %s7234_s24 = smov %s7222_s26 }
 0x4f6   : > { %s7236_s26 = smov %s7223_s7 }
 0x4f7   : > { %s7237_s27 = smov %s7224_s11 }
 0x4f8   :  { %3764 = vsyncpa [#allocation5], 1 }
 0x4f9   :  { %3766 = vsyncpa [#allocation5 + $0x1], 1 }
 0x4fa   :  { %3767 = vsyncpa [#allocation8], 1 }
 0x4fb   :  { %3769 = vsyncpa [#allocation8 + $0x1], 1 }
 0x4fc   :  { %3770 = vsyncpa [#allocation6], 1 }
 0x4fd   :  { %3772 = vsyncpa [#allocation6 + $0x1], 1 }

</bundles_post_ra>
